<compile_context>
chip_gen: v6e
topology: v6e:2x2x1
jax: 0.10.0
libtpu: 0.0.40
codegen_flags: <defaults>
</compile_context>

<pallas_src>
import functools

import jax
import jax.numpy as jnp
from jax.experimental import pallas as pl
from jax.experimental.pallas import tpu as pltpu


# ----------------------------------------------------------------------------
# Fused kernel: conv0(5x5)+tanh -> conv1(3x3)+tanh -> conv2(3x3), one row tile.
#
# Layout of every activation value: (channels, flat_pixels) where
#   flat = y * Wp + x,  x in [0, Wp) with global col gc = x - 4 for the input
# and the usual top-left-tap anchoring for the conv outputs (see masks below).
# A conv tap (dy, dx) is then just a lane-offset slice of the producer slab.
# ----------------------------------------------------------------------------
def _espcn_fused_kernel(x_ref, w0_ref, w1_ref, w2_ref,
                        b0_ref, b1_ref, b2_ref,
                        yid_ref, xid_ref, o_ref,
                        *, H, W, Ht, Wp, K0, K1):
    t = pl.program_id(1)
    r0 = t * Ht                       # first output row of this tile

    L0 = (Ht + 6) * Wp                # conv0 slab: 2-row halo each side + slack
    L1 = (Ht + 3) * Wp                # conv1 slab: 1-row halo each side + slack
    L2 = Ht * Wp                      # conv2 slab: exactly the tile's rows

    c_out = w2_ref.shape[1]           # in_channel * r^2

    yv = yid_ref[...]                 # (1, L0) int32: flat // Wp
    xv = xid_ref[...]                 # (1, L0) int32: flat %  Wp

    # ---------------- conv0: 5x5, all 25 taps folded into one matmul ----------
    xs = x_ref[0, 0]                                               # (CP, Lin) f32
    p0 = jnp.concatenate(
        [xs[:, dy * Wp + dx: dy * Wp + dx + L0]
         for dy in range(K0) for dx in range(K0)], axis=0)         # (25*CP, L0)
    h0 = jnp.dot(w0_ref[...], p0.astype(jnp.bfloat16),
                 preferred_element_type=jnp.float32)               # (64, L0)
    h0 = jnp.tanh(h0 + b0_ref[...])
    # SAME-padding zeros of conv0's output (global row = r0 + y - 2, col = x - 2)
    ok0 = ((yv >= 2 - r0) & (yv < H + 2 - r0) & (xv >= 2) & (xv < W + 2))
    h0 = jnp.where(ok0, h0, 0.0).astype(jnp.bfloat16)              # (64, L0)

    # ---------------- conv1: 3x3, 64->32, fold the 3 taps of each row (K=192) --
    c_mid = w1_ref.shape[1]
    acc1 = jnp.zeros((c_mid, L1), jnp.float32)
    for dy in range(K1):
        p1 = jnp.concatenate(
            [h0[:, dy * Wp + dx: dy * Wp + dx + L1] for dx in range(K1)],
            axis=0)                                                # (192, L1)
        acc1 = acc1 + jnp.dot(w1_ref[dy], p1,
                              preferred_element_type=jnp.float32)
    h1 = jnp.tanh(acc1 + b1_ref[...])
    ok1 = ((yv[:, :L1] >= 1 - r0) & (yv[:, :L1] < H + 1 - r0) &
           (xv[:, :L1] >= 1) & (xv[:, :L1] < W + 1))
    h1 = jnp.where(ok1, h1, 0.0).astype(jnp.bfloat16)              # (32, L1)

    # ---------------- conv2: 3x3, 32 -> C*r^2 (K=96), no activation ------------
    acc2 = jnp.zeros((c_out, L2), jnp.float32)
    for dy in range(K1):
        p2 = jnp.concatenate(
            [h1[:, dy * Wp + dx: dy * Wp + dx + L2] for dx in range(K1)],
            axis=0)                                                # (96, L2)
        acc2 = acc2 + jnp.dot(w2_ref[dy], p2,
                              preferred_element_type=jnp.float32)
    y2 = acc2 + b2_ref[...]                                        # (c_out, L2)

    # Strip the width padding and store one output row at a time (pre-shuffle
    # NCHW layout, so no NHWC->NCHW transpose is needed afterwards).
    for y in range(Ht):
        o_ref[0, :, y, :] = y2[:, y * Wp: y * Wp + W].astype(o_ref.dtype)


# ----------------------------------------------------------------------------
# Wrapper: padding / tiling / weight repacking + pallas_call + PixelShuffle.
# ----------------------------------------------------------------------------
def espcn_forward(x_nchw, params, upf):
    N, Cin, H, W = x_nchw.shape
    K0, K1 = 5, 3
    r = upf
    C2 = Cin * r * r

    # Row tile: multiple of 8 that divides H (fall back to the whole image).
    Ht = 8 if (H % 8 == 0 and H > 8) else H
    T = H // Ht

    CP = max(8, ((Cin + 7) // 8) * 8)      # pad channels to the f32 sublane tile
    HALO = (K0 // 2) + 2 * (K1 // 2)       # 4 rows / cols of receptive-field halo
    SLACK = 3                               # extra zero rows so tap slices stay in-bounds
    Wp = W + 2 * HALO
    Hin = H + 2 * HALO + SLACK
    Lin = (Ht + 2 * HALO + SLACK) * Wp
    L0 = (Ht + 6) * Wp

    # Pad the (small) input once, flatten (row, col) -> lanes, gather row tiles
    # (with halo) so BlockSpec blocks never overlap.
    xp = jnp.pad(x_nchw.astype(jnp.float32),
                 ((0, 0), (0, CP - Cin), (HALO, HALO + SLACK), (HALO, HALO)))
    xp = xp.reshape(N, CP, Hin * Wp)
    xt = jnp.stack([xp[:, :, t * Ht * Wp: t * Ht * Wp + Lin] for t in range(T)],
                   axis=1)                                          # (N, T, CP, Lin)

    # Repack weights as folded per-tap matrices (channels fastest), bf16.
    w0, w1, w2 = params["w0"], params["w1"], params["w2"]
    c0, c1 = w0.shape[0], w1.shape[0]                               # 64, 32
    w0m = jnp.pad(jnp.transpose(w0, (0, 2, 3, 1)),                  # (64,5,5,Cin)
                  ((0, 0), (0, 0), (0, 0), (0, CP - Cin)))
    w0m = w0m.reshape(c0, K0 * K0 * CP).astype(jnp.bfloat16)        # (64, 200)
    w1m = jnp.transpose(w1, (2, 0, 3, 1)).reshape(
        K1, c1, K1 * c0).astype(jnp.bfloat16)                        # (3, 32, 192)
    w2m = jnp.transpose(w2, (2, 0, 3, 1)).reshape(
        K1, C2, K1 * c1).astype(jnp.bfloat16)                        # (3, 48, 96)
    b0 = params["b0"].reshape(c0, 1).astype(jnp.float32)
    b1 = params["b1"].reshape(c1, 1).astype(jnp.float32)
    b2 = params["b2"].reshape(C2, 1).astype(jnp.float32)

    # Precomputed (row, col) coordinates of the flat pixel index (avoids
    # in-kernel integer div/mod); shared by the conv0/conv1 validity masks.
    ar = jnp.arange(L0, dtype=jnp.int32)
    yid = (ar // Wp).reshape(1, L0)
    xid = (ar % Wp).reshape(1, L0)

    kern = functools.partial(_espcn_fused_kernel,
                             H=H, W=W, Ht=Ht, Wp=Wp, K0=K0, K1=K1)
    out_pre = pl.pallas_call(
        kern,
        out_shape=jax.ShapeDtypeStruct((N, C2, H, W), jnp.float32),
        grid_spec=pltpu.PrefetchScalarGridSpec(
            num_scalar_prefetch=0,
            grid=(N, T),
            in_specs=[
                pl.BlockSpec((1, 1, CP, Lin), lambda n, t: (n, t, 0, 0)),
                pl.BlockSpec((c0, K0 * K0 * CP), lambda n, t: (0, 0)),
                pl.BlockSpec((K1, c1, K1 * c0), lambda n, t: (0, 0, 0)),
                pl.BlockSpec((K1, C2, K1 * c1), lambda n, t: (0, 0, 0)),
                pl.BlockSpec((c0, 1), lambda n, t: (0, 0)),
                pl.BlockSpec((c1, 1), lambda n, t: (0, 0)),
                pl.BlockSpec((C2, 1), lambda n, t: (0, 0)),
                pl.BlockSpec((1, L0), lambda n, t: (0, 0)),
                pl.BlockSpec((1, L0), lambda n, t: (0, 0)),
            ],
            out_specs=pl.BlockSpec((1, C2, Ht, W), lambda n, t: (n, 0, t, 0)),
        ),
        compiler_params=pltpu.CompilerParams(
            dimension_semantics=("parallel", "parallel")),
    )(xt, w0m, w1m, w2m, b0, b1, b2, yid, xid)

    # PixelShuffle (pure data movement): one fused XLA reshape/transpose.
    out = out_pre.reshape(N, Cin, r, r, H, W)
    out = jnp.transpose(out, (0, 1, 4, 2, 5, 3))
    return out.reshape(N, Cin, H * r, W * r)


# ----------------------------------------------------------------------------
# Deterministic parameter init (PyTorch-style uniform(+-1/sqrt(fan_in)))
# ----------------------------------------------------------------------------
def init_params(key, in_channel=3, upf=4):
    shapes = [
        (64, in_channel, 5, 5),
        (32, 64, 3, 3),
        (in_channel * upf * upf, 32, 3, 3),
    ]
    params = {}
    for idx, (cout, cin, k, _) in enumerate(shapes):
        key, kw, kb = jax.random.split(key, 3)
        bound = 1.0 / jnp.sqrt(cin * k * k)
        params[f"w{idx}"] = jax.random.uniform(
            kw, (cout, cin, k, k), jnp.float32, -bound, bound)
        params[f"b{idx}"] = jax.random.uniform(
            kb, (cout,), jnp.float32, -bound, bound)
    return params


# ----------------------------------------------------------------------------
# Pure-JAX reference (f32, HIGHEST precision) for correctness check.
# ----------------------------------------------------------------------------
def espcn_reference(x_nchw, params, upf):
    def conv(x, w, b):
        y = jax.lax.conv_general_dilated(
            x, w, (1, 1), "SAME",
            dimension_numbers=("NCHW", "OIHW", "NCHW"),
            precision=jax.lax.Precision.HIGHEST)
        return y + b.reshape(1, -1, 1, 1)

    out = jnp.tanh(conv(x_nchw, params["w0"], params["b0"]))
    out = jnp.tanh(conv(out, params["w1"], params["b1"]))
    out = conv(out, params["w2"], params["b2"])
    N, Cr2, H, W = out.shape
    C = Cr2 // (upf * upf)
    out = out.reshape(N, C, upf, upf, H, W)
    out = jnp.transpose(out, (0, 1, 4, 2, 5, 3))
    return out.reshape(N, C, H * upf, W * upf)


if __name__ == "__main__":
    in_channel, upf = 3, 4
    N, H, W = 2, 16, 16

    key = jax.random.PRNGKey(0)
    key, kx = jax.random.split(key)
    x = jax.random.normal(kx, (N, in_channel, H, W), jnp.float32)
    params = init_params(key, in_channel=in_channel, upf=upf)

    fwd = jax.jit(functools.partial(espcn_forward, upf=upf))
    out = jax.block_until_ready(fwd(x, params))

    assert out.shape == (N, in_channel, H * upf, W * upf), out.shape

    ref = espcn_reference(x, params, upf)
    max_err = float(jnp.max(jnp.abs(out - ref)))
    # conv matmuls use bf16 inputs with f32 accumulation -> expect ~1e-2 abs err.
    assert max_err < 1e-1, f"mismatch vs reference: max_err={max_err}"

    print("KERNEL_OK")
</pallas_src>

<mosaic_0001>
module attributes {stable_mosaic.version = 11 : i64} {
  func.func @_espcn_fused_kernel(%arg0: i32, %arg1: i32, %arg2: memref<1x1x8x456xf32, #tpu.memory_space<vmem>>, %arg3: memref<64x200xbf16, #tpu.memory_space<vmem>>, %arg4: memref<3x32x192xbf16, #tpu.memory_space<vmem>>, %arg5: memref<3x48x96xbf16, #tpu.memory_space<vmem>>, %arg6: memref<64x1xf32, #tpu.memory_space<vmem>>, %arg7: memref<32x1xf32, #tpu.memory_space<vmem>>, %arg8: memref<48x1xf32, #tpu.memory_space<vmem>>, %arg9: memref<1x336xi32, #tpu.memory_space<vmem>>, %arg10: memref<1x336xi32, #tpu.memory_space<vmem>>, %arg11: memref<1x48x8x16xf32, #tpu.memory_space<vmem>>) attributes {dimension_semantics = [#tpu.dimension_semantics<parallel>, #tpu.dimension_semantics<parallel>], iteration_bounds = array<i64: 2, 2>, scalar_prefetch = 0 : i64, scratch_operands = 0 : i64, tpu.core_type = #tpu.core_type<tc>, window_params = [{transform_indices = @transform_0, window_bounds = array<i64: 1, 1, 8, 456>}, {pipeline_mode = #tpu.pipeline_mode<synchronous>, transform_indices = @transform_1, window_bounds = array<i64: 64, 200>}, {pipeline_mode = #tpu.pipeline_mode<synchronous>, transform_indices = @transform_2, window_bounds = array<i64: 3, 32, 192>}, {pipeline_mode = #tpu.pipeline_mode<synchronous>, transform_indices = @transform_3, window_bounds = array<i64: 3, 48, 96>}, {pipeline_mode = #tpu.pipeline_mode<synchronous>, transform_indices = @transform_4, window_bounds = array<i64: 64, 1>}, {pipeline_mode = #tpu.pipeline_mode<synchronous>, transform_indices = @transform_5, window_bounds = array<i64: 32, 1>}, {pipeline_mode = #tpu.pipeline_mode<synchronous>, transform_indices = @transform_6, window_bounds = array<i64: 48, 1>}, {pipeline_mode = #tpu.pipeline_mode<synchronous>, transform_indices = @transform_7, window_bounds = array<i64: 1, 336>}, {pipeline_mode = #tpu.pipeline_mode<synchronous>, transform_indices = @transform_8, window_bounds = array<i64: 1, 336>}, {transform_indices = @transform_9, window_bounds = array<i64: 1, 48, 8, 16>}]} {
    %c8_i32 = arith.constant 8 : i32
    %0 = arith.muli %arg1, %c8_i32 : i32
    %c0 = arith.constant 0 : index
    %c0_0 = arith.constant 0 : index
    %1 = vector.load %arg9[%c0, %c0_0] : memref<1x336xi32, #tpu.memory_space<vmem>>, vector<1x336xi32>
    %c0_1 = arith.constant 0 : index
    %c0_2 = arith.constant 0 : index
    %2 = vector.load %arg10[%c0_1, %c0_2] : memref<1x336xi32, #tpu.memory_space<vmem>>, vector<1x336xi32>
    %c0_3 = arith.constant 0 : index
    %c0_4 = arith.constant 0 : index
    %c0_5 = arith.constant 0 : index
    %c0_6 = arith.constant 0 : index
    %3 = vector.load %arg2[%c0_3, %c0_4, %c0_5, %c0_6] : memref<1x1x8x456xf32, #tpu.memory_space<vmem>>, vector<1x1x8x456xf32>
    %4 = vector.shape_cast %3 : vector<1x1x8x456xf32> to vector<8x456xf32>
    %5 = vector.extract_strided_slice %4 {offsets = [0, 0], sizes = [8, 336], strides = [1, 1]} : vector<8x456xf32> to vector<8x336xf32>
    %6 = vector.extract_strided_slice %4 {offsets = [0, 1], sizes = [8, 336], strides = [1, 1]} : vector<8x456xf32> to vector<8x336xf32>
    %7 = vector.extract_strided_slice %4 {offsets = [0, 2], sizes = [8, 336], strides = [1, 1]} : vector<8x456xf32> to vector<8x336xf32>
    %8 = vector.extract_strided_slice %4 {offsets = [0, 3], sizes = [8, 336], strides = [1, 1]} : vector<8x456xf32> to vector<8x336xf32>
    %9 = vector.extract_strided_slice %4 {offsets = [0, 4], sizes = [8, 336], strides = [1, 1]} : vector<8x456xf32> to vector<8x336xf32>
    %10 = vector.extract_strided_slice %4 {offsets = [0, 24], sizes = [8, 336], strides = [1, 1]} : vector<8x456xf32> to vector<8x336xf32>
    %11 = vector.extract_strided_slice %4 {offsets = [0, 25], sizes = [8, 336], strides = [1, 1]} : vector<8x456xf32> to vector<8x336xf32>
    %12 = vector.extract_strided_slice %4 {offsets = [0, 26], sizes = [8, 336], strides = [1, 1]} : vector<8x456xf32> to vector<8x336xf32>
    %13 = vector.extract_strided_slice %4 {offsets = [0, 27], sizes = [8, 336], strides = [1, 1]} : vector<8x456xf32> to vector<8x336xf32>
    %14 = vector.extract_strided_slice %4 {offsets = [0, 28], sizes = [8, 336], strides = [1, 1]} : vector<8x456xf32> to vector<8x336xf32>
    %15 = vector.extract_strided_slice %4 {offsets = [0, 48], sizes = [8, 336], strides = [1, 1]} : vector<8x456xf32> to vector<8x336xf32>
    %16 = vector.extract_strided_slice %4 {offsets = [0, 49], sizes = [8, 336], strides = [1, 1]} : vector<8x456xf32> to vector<8x336xf32>
    %17 = vector.extract_strided_slice %4 {offsets = [0, 50], sizes = [8, 336], strides = [1, 1]} : vector<8x456xf32> to vector<8x336xf32>
    %18 = vector.extract_strided_slice %4 {offsets = [0, 51], sizes = [8, 336], strides = [1, 1]} : vector<8x456xf32> to vector<8x336xf32>
    %19 = vector.extract_strided_slice %4 {offsets = [0, 52], sizes = [8, 336], strides = [1, 1]} : vector<8x456xf32> to vector<8x336xf32>
    %20 = vector.extract_strided_slice %4 {offsets = [0, 72], sizes = [8, 336], strides = [1, 1]} : vector<8x456xf32> to vector<8x336xf32>
    %21 = vector.extract_strided_slice %4 {offsets = [0, 73], sizes = [8, 336], strides = [1, 1]} : vector<8x456xf32> to vector<8x336xf32>
    %22 = vector.extract_strided_slice %4 {offsets = [0, 74], sizes = [8, 336], strides = [1, 1]} : vector<8x456xf32> to vector<8x336xf32>
    %23 = vector.extract_strided_slice %4 {offsets = [0, 75], sizes = [8, 336], strides = [1, 1]} : vector<8x456xf32> to vector<8x336xf32>
    %24 = vector.extract_strided_slice %4 {offsets = [0, 76], sizes = [8, 336], strides = [1, 1]} : vector<8x456xf32> to vector<8x336xf32>
    %25 = vector.extract_strided_slice %4 {offsets = [0, 96], sizes = [8, 336], strides = [1, 1]} : vector<8x456xf32> to vector<8x336xf32>
    %26 = vector.extract_strided_slice %4 {offsets = [0, 97], sizes = [8, 336], strides = [1, 1]} : vector<8x456xf32> to vector<8x336xf32>
    %27 = vector.extract_strided_slice %4 {offsets = [0, 98], sizes = [8, 336], strides = [1, 1]} : vector<8x456xf32> to vector<8x336xf32>
    %28 = vector.extract_strided_slice %4 {offsets = [0, 99], sizes = [8, 336], strides = [1, 1]} : vector<8x456xf32> to vector<8x336xf32>
    %29 = vector.extract_strided_slice %4 {offsets = [0, 100], sizes = [8, 336], strides = [1, 1]} : vector<8x456xf32> to vector<8x336xf32>
    %30 = tpu.concatenate %5, %6, %7, %8, %9, %10, %11, %12, %13, %14, %15, %16, %17, %18, %19, %20 in 0 : vector<8x336xf32>, vector<8x336xf32>, vector<8x336xf32>, vector<8x336xf32>, vector<8x336xf32>, vector<8x336xf32>, vector<8x336xf32>, vector<8x336xf32>, vector<8x336xf32>, vector<8x336xf32>, vector<8x336xf32>, vector<8x336xf32>, vector<8x336xf32>, vector<8x336xf32>, vector<8x336xf32>, vector<8x336xf32> -> vector<128x336xf32>
    %31 = tpu.concatenate %21, %22, %23, %24, %25, %26, %27, %28, %29 in 0 : vector<8x336xf32>, vector<8x336xf32>, vector<8x336xf32>, vector<8x336xf32>, vector<8x336xf32>, vector<8x336xf32>, vector<8x336xf32>, vector<8x336xf32>, vector<8x336xf32> -> vector<72x336xf32>
    %32 = tpu.concatenate %30, %31 in 0 : vector<128x336xf32>, vector<72x336xf32> -> vector<200x336xf32>
    %c0_7 = arith.constant 0 : index
    %c0_8 = arith.constant 0 : index
    %33 = vector.load %arg3[%c0_7, %c0_8] : memref<64x200xbf16, #tpu.memory_space<vmem>>, vector<64x200xbf16>
    %34 = arith.truncf %32 : vector<200x336xf32> to vector<200x336xbf16>
    %cst = arith.constant dense<0.000000e+00> : vector<64x336xf32>
    %35 = tpu.matmul %33, %34, %cst {dimension_numbers = #tpu.dot_dimension_numbers<[1], [0], [0], [1], [0, 0, 1, 1], [], []>} : vector<64x200xbf16>, vector<200x336xbf16>, vector<64x336xf32> -> vector<64x336xf32>
    %c0_9 = arith.constant 0 : index
    %c0_10 = arith.constant 0 : index
    %36 = vector.load %arg6[%c0_9, %c0_10] : memref<64x1xf32, #tpu.memory_space<vmem>>, vector<64x1xf32>
    %37 = vector.broadcast %36 : vector<64x1xf32> to vector<64x336xf32>
    %38 = arith.addf %35, %37 : vector<64x336xf32>
    %39 = math.tanh %38 : vector<64x336xf32>
    %c2_i32 = arith.constant 2 : i32
    %40 = arith.subi %c2_i32, %0 : i32
    %41 = vector.broadcast %40 : i32 to vector<1x336xi32>
    %42 = arith.cmpi sge, %1, %41 : vector<1x336xi32>
    %c18_i32 = arith.constant 18 : i32
    %43 = arith.subi %c18_i32, %0 : i32
    %44 = vector.broadcast %43 : i32 to vector<1x336xi32>
    %45 = arith.cmpi slt, %1, %44 : vector<1x336xi32>
    %46 = arith.andi %42, %45 : vector<1x336xi1>
    %c2_i32_11 = arith.constant 2 : i32
    %47 = vector.broadcast %c2_i32_11 : i32 to vector<1x336xi32>
    %48 = arith.cmpi sge, %2, %47 : vector<1x336xi32>
    %49 = arith.andi %46, %48 : vector<1x336xi1>
    %c18_i32_12 = arith.constant 18 : i32
    %50 = vector.broadcast %c18_i32_12 : i32 to vector<1x336xi32>
    %51 = arith.cmpi slt, %2, %50 : vector<1x336xi32>
    %52 = arith.andi %49, %51 : vector<1x336xi1>
    %cst_13 = arith.constant 0.000000e+00 : f32
    %53 = vector.shape_cast %52 : vector<1x336xi1> to vector<1x336xi1>
    %54 = vector.broadcast %53 : vector<1x336xi1> to vector<64x336xi1>
    %55 = vector.broadcast %cst_13 : f32 to vector<64x336xf32>
    %56 = arith.select %54, %39, %55 : vector<64x336xi1>, vector<64x336xf32>
    %57 = arith.truncf %56 : vector<64x336xf32> to vector<64x336xbf16>
    %cst_14 = arith.constant 0.000000e+00 : f32
    %58 = vector.broadcast %cst_14 : f32 to vector<32x264xf32>
    %59 = vector.extract_strided_slice %57 {offsets = [0, 0], sizes = [64, 264], strides = [1, 1]} : vector<64x336xbf16> to vector<64x264xbf16>
    %60 = vector.extract_strided_slice %57 {offsets = [0, 1], sizes = [64, 264], strides = [1, 1]} : vector<64x336xbf16> to vector<64x264xbf16>
    %61 = vector.extract_strided_slice %57 {offsets = [0, 2], sizes = [64, 264], strides = [1, 1]} : vector<64x336xbf16> to vector<64x264xbf16>
    %62 = tpu.concatenate %59, %60, %61 in 0 : vector<64x264xbf16>, vector<64x264xbf16>, vector<64x264xbf16> -> vector<192x264xbf16>
    %c0_15 = arith.constant 0 : index
    %c0_16 = arith.constant 0 : index
    %c0_17 = arith.constant 0 : index
    %63 = vector.load %arg4[%c0_15, %c0_16, %c0_17] : memref<3x32x192xbf16, #tpu.memory_space<vmem>>, vector<1x32x192xbf16>
    %64 = vector.shape_cast %63 : vector<1x32x192xbf16> to vector<32x192xbf16>
    %cst_18 = arith.constant dense<0.000000e+00> : vector<32x264xf32>
    %65 = tpu.matmul %64, %62, %cst_18 {dimension_numbers = #tpu.dot_dimension_numbers<[1], [0], [0], [1], [0, 0, 1, 1], [], []>} : vector<32x192xbf16>, vector<192x264xbf16>, vector<32x264xf32> -> vector<32x264xf32>
    %66 = arith.addf %58, %65 : vector<32x264xf32>
    %67 = vector.extract_strided_slice %57 {offsets = [0, 24], sizes = [64, 264], strides = [1, 1]} : vector<64x336xbf16> to vector<64x264xbf16>
    %68 = vector.extract_strided_slice %57 {offsets = [0, 25], sizes = [64, 264], strides = [1, 1]} : vector<64x336xbf16> to vector<64x264xbf16>
    %69 = vector.extract_strided_slice %57 {offsets = [0, 26], sizes = [64, 264], strides = [1, 1]} : vector<64x336xbf16> to vector<64x264xbf16>
    %70 = tpu.concatenate %67, %68, %69 in 0 : vector<64x264xbf16>, vector<64x264xbf16>, vector<64x264xbf16> -> vector<192x264xbf16>
    %c1 = arith.constant 1 : index
    %c0_19 = arith.constant 0 : index
    %c0_20 = arith.constant 0 : index
    %71 = vector.load %arg4[%c1, %c0_19, %c0_20] : memref<3x32x192xbf16, #tpu.memory_space<vmem>>, vector<1x32x192xbf16>
    %72 = vector.shape_cast %71 : vector<1x32x192xbf16> to vector<32x192xbf16>
    %cst_21 = arith.constant dense<0.000000e+00> : vector<32x264xf32>
    %73 = tpu.matmul %72, %70, %cst_21 {dimension_numbers = #tpu.dot_dimension_numbers<[1], [0], [0], [1], [0, 0, 1, 1], [], []>} : vector<32x192xbf16>, vector<192x264xbf16>, vector<32x264xf32> -> vector<32x264xf32>
    %74 = arith.addf %66, %73 : vector<32x264xf32>
    %75 = vector.extract_strided_slice %57 {offsets = [0, 48], sizes = [64, 264], strides = [1, 1]} : vector<64x336xbf16> to vector<64x264xbf16>
    %76 = vector.extract_strided_slice %57 {offsets = [0, 49], sizes = [64, 264], strides = [1, 1]} : vector<64x336xbf16> to vector<64x264xbf16>
    %77 = vector.extract_strided_slice %57 {offsets = [0, 50], sizes = [64, 264], strides = [1, 1]} : vector<64x336xbf16> to vector<64x264xbf16>
    %78 = tpu.concatenate %75, %76, %77 in 0 : vector<64x264xbf16>, vector<64x264xbf16>, vector<64x264xbf16> -> vector<192x264xbf16>
    %c2 = arith.constant 2 : index
    %c0_22 = arith.constant 0 : index
    %c0_23 = arith.constant 0 : index
    %79 = vector.load %arg4[%c2, %c0_22, %c0_23] : memref<3x32x192xbf16, #tpu.memory_space<vmem>>, vector<1x32x192xbf16>
    %80 = vector.shape_cast %79 : vector<1x32x192xbf16> to vector<32x192xbf16>
    %cst_24 = arith.constant dense<0.000000e+00> : vector<32x264xf32>
    %81 = tpu.matmul %80, %78, %cst_24 {dimension_numbers = #tpu.dot_dimension_numbers<[1], [0], [0], [1], [0, 0, 1, 1], [], []>} : vector<32x192xbf16>, vector<192x264xbf16>, vector<32x264xf32> -> vector<32x264xf32>
    %82 = arith.addf %74, %81 : vector<32x264xf32>
    %c0_25 = arith.constant 0 : index
    %c0_26 = arith.constant 0 : index
    %83 = vector.load %arg7[%c0_25, %c0_26] : memref<32x1xf32, #tpu.memory_space<vmem>>, vector<32x1xf32>
    %84 = vector.broadcast %83 : vector<32x1xf32> to vector<32x264xf32>
    %85 = arith.addf %82, %84 : vector<32x264xf32>
    %86 = math.tanh %85 : vector<32x264xf32>
    %87 = vector.extract_strided_slice %1 {offsets = [0, 0], sizes = [1, 264], strides = [1, 1]} : vector<1x336xi32> to vector<1x264xi32>
    %c1_i32 = arith.constant 1 : i32
    %88 = arith.subi %c1_i32, %0 : i32
    %89 = vector.broadcast %88 : i32 to vector<1x264xi32>
    %90 = arith.cmpi sge, %87, %89 : vector<1x264xi32>
    %91 = vector.extract_strided_slice %1 {offsets = [0, 0], sizes = [1, 264], strides = [1, 1]} : vector<1x336xi32> to vector<1x264xi32>
    %c17_i32 = arith.constant 17 : i32
    %92 = arith.subi %c17_i32, %0 : i32
    %93 = vector.broadcast %92 : i32 to vector<1x264xi32>
    %94 = arith.cmpi slt, %91, %93 : vector<1x264xi32>
    %95 = arith.andi %90, %94 : vector<1x264xi1>
    %96 = vector.extract_strided_slice %2 {offsets = [0, 0], sizes = [1, 264], strides = [1, 1]} : vector<1x336xi32> to vector<1x264xi32>
    %c1_i32_27 = arith.constant 1 : i32
    %97 = vector.broadcast %c1_i32_27 : i32 to vector<1x264xi32>
    %98 = arith.cmpi sge, %96, %97 : vector<1x264xi32>
    %99 = arith.andi %95, %98 : vector<1x264xi1>
    %100 = vector.extract_strided_slice %2 {offsets = [0, 0], sizes = [1, 264], strides = [1, 1]} : vector<1x336xi32> to vector<1x264xi32>
    %c17_i32_28 = arith.constant 17 : i32
    %101 = vector.broadcast %c17_i32_28 : i32 to vector<1x264xi32>
    %102 = arith.cmpi slt, %100, %101 : vector<1x264xi32>
    %103 = arith.andi %99, %102 : vector<1x264xi1>
    %cst_29 = arith.constant 0.000000e+00 : f32
    %104 = vector.shape_cast %103 : vector<1x264xi1> to vector<1x264xi1>
    %105 = vector.broadcast %104 : vector<1x264xi1> to vector<32x264xi1>
    %106 = vector.broadcast %cst_29 : f32 to vector<32x264xf32>
    %107 = arith.select %105, %86, %106 : vector<32x264xi1>, vector<32x264xf32>
    %108 = arith.truncf %107 : vector<32x264xf32> to vector<32x264xbf16>
    %cst_30 = arith.constant 0.000000e+00 : f32
    %109 = vector.broadcast %cst_30 : f32 to vector<48x192xf32>
    %110 = vector.extract_strided_slice %108 {offsets = [0, 0], sizes = [32, 192], strides = [1, 1]} : vector<32x264xbf16> to vector<32x192xbf16>
    %111 = vector.extract_strided_slice %108 {offsets = [0, 1], sizes = [32, 192], strides = [1, 1]} : vector<32x264xbf16> to vector<32x192xbf16>
    %112 = vector.extract_strided_slice %108 {offsets = [0, 2], sizes = [32, 192], strides = [1, 1]} : vector<32x264xbf16> to vector<32x192xbf16>
    %113 = tpu.concatenate %110, %111, %112 in 0 : vector<32x192xbf16>, vector<32x192xbf16>, vector<32x192xbf16> -> vector<96x192xbf16>
    %c0_31 = arith.constant 0 : index
    %c0_32 = arith.constant 0 : index
    %c0_33 = arith.constant 0 : index
    %114 = vector.load %arg5[%c0_31, %c0_32, %c0_33] : memref<3x48x96xbf16, #tpu.memory_space<vmem>>, vector<1x48x96xbf16>
    %115 = vector.shape_cast %114 : vector<1x48x96xbf16> to vector<48x96xbf16>
    %cst_34 = arith.constant dense<0.000000e+00> : vector<48x192xf32>
    %116 = tpu.matmul %115, %113, %cst_34 {dimension_numbers = #tpu.dot_dimension_numbers<[1], [0], [0], [1], [0, 0, 1, 1], [], []>} : vector<48x96xbf16>, vector<96x192xbf16>, vector<48x192xf32> -> vector<48x192xf32>
    %117 = arith.addf %109, %116 : vector<48x192xf32>
    %118 = vector.extract_strided_slice %108 {offsets = [0, 24], sizes = [32, 192], strides = [1, 1]} : vector<32x264xbf16> to vector<32x192xbf16>
    %119 = vector.extract_strided_slice %108 {offsets = [0, 25], sizes = [32, 192], strides = [1, 1]} : vector<32x264xbf16> to vector<32x192xbf16>
    %120 = vector.extract_strided_slice %108 {offsets = [0, 26], sizes = [32, 192], strides = [1, 1]} : vector<32x264xbf16> to vector<32x192xbf16>
    %121 = tpu.concatenate %118, %119, %120 in 0 : vector<32x192xbf16>, vector<32x192xbf16>, vector<32x192xbf16> -> vector<96x192xbf16>
    %c1_35 = arith.constant 1 : index
    %c0_36 = arith.constant 0 : index
    %c0_37 = arith.constant 0 : index
    %122 = vector.load %arg5[%c1_35, %c0_36, %c0_37] : memref<3x48x96xbf16, #tpu.memory_space<vmem>>, vector<1x48x96xbf16>
    %123 = vector.shape_cast %122 : vector<1x48x96xbf16> to vector<48x96xbf16>
    %cst_38 = arith.constant dense<0.000000e+00> : vector<48x192xf32>
    %124 = tpu.matmul %123, %121, %cst_38 {dimension_numbers = #tpu.dot_dimension_numbers<[1], [0], [0], [1], [0, 0, 1, 1], [], []>} : vector<48x96xbf16>, vector<96x192xbf16>, vector<48x192xf32> -> vector<48x192xf32>
    %125 = arith.addf %117, %124 : vector<48x192xf32>
    %126 = vector.extract_strided_slice %108 {offsets = [0, 48], sizes = [32, 192], strides = [1, 1]} : vector<32x264xbf16> to vector<32x192xbf16>
    %127 = vector.extract_strided_slice %108 {offsets = [0, 49], sizes = [32, 192], strides = [1, 1]} : vector<32x264xbf16> to vector<32x192xbf16>
    %128 = vector.extract_strided_slice %108 {offsets = [0, 50], sizes = [32, 192], strides = [1, 1]} : vector<32x264xbf16> to vector<32x192xbf16>
    %129 = tpu.concatenate %126, %127, %128 in 0 : vector<32x192xbf16>, vector<32x192xbf16>, vector<32x192xbf16> -> vector<96x192xbf16>
    %c2_39 = arith.constant 2 : index
    %c0_40 = arith.constant 0 : index
    %c0_41 = arith.constant 0 : index
    %130 = vector.load %arg5[%c2_39, %c0_40, %c0_41] : memref<3x48x96xbf16, #tpu.memory_space<vmem>>, vector<1x48x96xbf16>
    %131 = vector.shape_cast %130 : vector<1x48x96xbf16> to vector<48x96xbf16>
    %cst_42 = arith.constant dense<0.000000e+00> : vector<48x192xf32>
    %132 = tpu.matmul %131, %129, %cst_42 {dimension_numbers = #tpu.dot_dimension_numbers<[1], [0], [0], [1], [0, 0, 1, 1], [], []>} : vector<48x96xbf16>, vector<96x192xbf16>, vector<48x192xf32> -> vector<48x192xf32>
    %133 = arith.addf %125, %132 : vector<48x192xf32>
    %c0_43 = arith.constant 0 : index
    %c0_44 = arith.constant 0 : index
    %134 = vector.load %arg8[%c0_43, %c0_44] : memref<48x1xf32, #tpu.memory_space<vmem>>, vector<48x1xf32>
    %135 = vector.broadcast %134 : vector<48x1xf32> to vector<48x192xf32>
    %136 = arith.addf %133, %135 : vector<48x192xf32>
    %137 = vector.extract_strided_slice %136 {offsets = [0, 0], sizes = [48, 16], strides = [1, 1]} : vector<48x192xf32> to vector<48x16xf32>
    %c0_45 = arith.constant 0 : index
    %c0_46 = arith.constant 0 : index
    %c0_47 = arith.constant 0 : index
    %c0_48 = arith.constant 0 : index
    %138 = vector.load %arg11[%c0_45, %c0_46, %c0_47, %c0_48] : memref<1x48x8x16xf32, #tpu.memory_space<vmem>>, vector<1x48x1x16xf32>
    %139 = vector.shape_cast %138 : vector<1x48x1x16xf32> to vector<48x16xf32>
    %140 = vector.shape_cast %137 : vector<48x16xf32> to vector<1x48x1x16xf32>
    tpu.vector_store %arg11[%c0_45, %c0_46, %c0_47, %c0_48], %140 {strides = array<i32>} : memref<1x48x8x16xf32, #tpu.memory_space<vmem>>, vector<1x48x1x16xf32>,
    %141 = vector.extract_strided_slice %136 {offsets = [0, 24], sizes = [48, 16], strides = [1, 1]} : vector<48x192xf32> to vector<48x16xf32>
    %c0_49 = arith.constant 0 : index
    %c0_50 = arith.constant 0 : index
    %c1_51 = arith.constant 1 : index
    %c0_52 = arith.constant 0 : index
    %142 = vector.load %arg11[%c0_49, %c0_50, %c1_51, %c0_52] : memref<1x48x8x16xf32, #tpu.memory_space<vmem>>, vector<1x48x1x16xf32>
    %143 = vector.shape_cast %142 : vector<1x48x1x16xf32> to vector<48x16xf32>
    %144 = vector.shape_cast %141 : vector<48x16xf32> to vector<1x48x1x16xf32>
    tpu.vector_store %arg11[%c0_49, %c0_50, %c1_51, %c0_52], %144 {strides = array<i32>} : memref<1x48x8x16xf32, #tpu.memory_space<vmem>>, vector<1x48x1x16xf32>,
    %145 = vector.extract_strided_slice %136 {offsets = [0, 48], sizes = [48, 16], strides = [1, 1]} : vector<48x192xf32> to vector<48x16xf32>
    %c0_53 = arith.constant 0 : index
    %c0_54 = arith.constant 0 : index
    %c2_55 = arith.constant 2 : index
    %c0_56 = arith.constant 0 : index
    %146 = vector.load %arg11[%c0_53, %c0_54, %c2_55, %c0_56] : memref<1x48x8x16xf32, #tpu.memory_space<vmem>>, vector<1x48x1x16xf32>
    %147 = vector.shape_cast %146 : vector<1x48x1x16xf32> to vector<48x16xf32>
    %148 = vector.shape_cast %145 : vector<48x16xf32> to vector<1x48x1x16xf32>
    tpu.vector_store %arg11[%c0_53, %c0_54, %c2_55, %c0_56], %148 {strides = array<i32>} : memref<1x48x8x16xf32, #tpu.memory_space<vmem>>, vector<1x48x1x16xf32>,
    %149 = vector.extract_strided_slice %136 {offsets = [0, 72], sizes = [48, 16], strides = [1, 1]} : vector<48x192xf32> to vector<48x16xf32>
    %c0_57 = arith.constant 0 : index
    %c0_58 = arith.constant 0 : index
    %c3 = arith.constant 3 : index
    %c0_59 = arith.constant 0 : index
    %150 = vector.load %arg11[%c0_57, %c0_58, %c3, %c0_59] : memref<1x48x8x16xf32, #tpu.memory_space<vmem>>, vector<1x48x1x16xf32>
    %151 = vector.shape_cast %150 : vector<1x48x1x16xf32> to vector<48x16xf32>
    %152 = vector.shape_cast %149 : vector<48x16xf32> to vector<1x48x1x16xf32>
    tpu.vector_store %arg11[%c0_57, %c0_58, %c3, %c0_59], %152 {strides = array<i32>} : memref<1x48x8x16xf32, #tpu.memory_space<vmem>>, vector<1x48x1x16xf32>,
    %153 = vector.extract_strided_slice %136 {offsets = [0, 96], sizes = [48, 16], strides = [1, 1]} : vector<48x192xf32> to vector<48x16xf32>
    %c0_60 = arith.constant 0 : index
    %c0_61 = arith.constant 0 : index
    %c4 = arith.constant 4 : index
    %c0_62 = arith.constant 0 : index
    %154 = vector.load %arg11[%c0_60, %c0_61, %c4, %c0_62] : memref<1x48x8x16xf32, #tpu.memory_space<vmem>>, vector<1x48x1x16xf32>
    %155 = vector.shape_cast %154 : vector<1x48x1x16xf32> to vector<48x16xf32>
    %156 = vector.shape_cast %153 : vector<48x16xf32> to vector<1x48x1x16xf32>
    tpu.vector_store %arg11[%c0_60, %c0_61, %c4, %c0_62], %156 {strides = array<i32>} : memref<1x48x8x16xf32, #tpu.memory_space<vmem>>, vector<1x48x1x16xf32>,
    %157 = vector.extract_strided_slice %136 {offsets = [0, 120], sizes = [48, 16], strides = [1, 1]} : vector<48x192xf32> to vector<48x16xf32>
    %c0_63 = arith.constant 0 : index
    %c0_64 = arith.constant 0 : index
    %c5 = arith.constant 5 : index
    %c0_65 = arith.constant 0 : index
    %158 = vector.load %arg11[%c0_63, %c0_64, %c5, %c0_65] : memref<1x48x8x16xf32, #tpu.memory_space<vmem>>, vector<1x48x1x16xf32>
    %159 = vector.shape_cast %158 : vector<1x48x1x16xf32> to vector<48x16xf32>
    %160 = vector.shape_cast %157 : vector<48x16xf32> to vector<1x48x1x16xf32>
    tpu.vector_store %arg11[%c0_63, %c0_64, %c5, %c0_65], %160 {strides = array<i32>} : memref<1x48x8x16xf32, #tpu.memory_space<vmem>>, vector<1x48x1x16xf32>,
    %161 = vector.extract_strided_slice %136 {offsets = [0, 144], sizes = [48, 16], strides = [1, 1]} : vector<48x192xf32> to vector<48x16xf32>
    %c0_66 = arith.constant 0 : index
    %c0_67 = arith.constant 0 : index
    %c6 = arith.constant 6 : index
    %c0_68 = arith.constant 0 : index
    %162 = vector.load %arg11[%c0_66, %c0_67, %c6, %c0_68] : memref<1x48x8x16xf32, #tpu.memory_space<vmem>>, vector<1x48x1x16xf32>
    %163 = vector.shape_cast %162 : vector<1x48x1x16xf32> to vector<48x16xf32>
    %164 = vector.shape_cast %161 : vector<48x16xf32> to vector<1x48x1x16xf32>
    tpu.vector_store %arg11[%c0_66, %c0_67, %c6, %c0_68], %164 {strides = array<i32>} : memref<1x48x8x16xf32, #tpu.memory_space<vmem>>, vector<1x48x1x16xf32>,
    %165 = vector.extract_strided_slice %136 {offsets = [0, 168], sizes = [48, 16], strides = [1, 1]} : vector<48x192xf32> to vector<48x16xf32>
    %c0_69 = arith.constant 0 : index
    %c0_70 = arith.constant 0 : index
    %c7 = arith.constant 7 : index
    %c0_71 = arith.constant 0 : index
    %166 = vector.load %arg11[%c0_69, %c0_70, %c7, %c0_71] : memref<1x48x8x16xf32, #tpu.memory_space<vmem>>, vector<1x48x1x16xf32>
    %167 = vector.shape_cast %166 : vector<1x48x1x16xf32> to vector<48x16xf32>
    %168 = vector.shape_cast %165 : vector<48x16xf32> to vector<1x48x1x16xf32>
    tpu.vector_store %arg11[%c0_69, %c0_70, %c7, %c0_71], %168 {strides = array<i32>} : memref<1x48x8x16xf32, #tpu.memory_space<vmem>>, vector<1x48x1x16xf32>,
    return
  }
  func.func @transform_0(%arg0: i32, %arg1: i32) -> (i32, i32, i32, i32) {
    %c0_i32 = arith.constant 0 : i32
    %c0_i32_0 = arith.constant 0 : i32
    %c0_i32_1 = arith.constant 0 : i32
    return %arg0, %arg1, %c0_i32, %c0_i32_0 : i32, i32, i32, i32
  }
  func.func @transform_1(%arg0: i32, %arg1: i32) -> (i32, i32) {
    %c0_i32 = arith.constant 0 : i32
    %c0_i32_0 = arith.constant 0 : i32
    %c0_i32_1 = arith.constant 0 : i32
    return %c0_i32, %c0_i32_0 : i32, i32
  }
  func.func @transform_2(%arg0: i32, %arg1: i32) -> (i32, i32, i32) {
    %c0_i32 = arith.constant 0 : i32
    %c0_i32_0 = arith.constant 0 : i32
    %c0_i32_1 = arith.constant 0 : i32
    %c0_i32_2 = arith.constant 0 : i32
    return %c0_i32, %c0_i32_0, %c0_i32_1 : i32, i32, i32
  }
  func.func @transform_3(%arg0: i32, %arg1: i32) -> (i32, i32, i32) {
    %c0_i32 = arith.constant 0 : i32
    %c0_i32_0 = arith.constant 0 : i32
    %c0_i32_1 = arith.constant 0 : i32
    %c0_i32_2 = arith.constant 0 : i32
    return %c0_i32, %c0_i32_0, %c0_i32_1 : i32, i32, i32
  }
  func.func @transform_4(%arg0: i32, %arg1: i32) -> (i32, i32) {
    %c0_i32 = arith.constant 0 : i32
    %c0_i32_0 = arith.constant 0 : i32
    %c0_i32_1 = arith.constant 0 : i32
    return %c0_i32, %c0_i32_0 : i32, i32
  }
  func.func @transform_5(%arg0: i32, %arg1: i32) -> (i32, i32) {
    %c0_i32 = arith.constant 0 : i32
    %c0_i32_0 = arith.constant 0 : i32
    %c0_i32_1 = arith.constant 0 : i32
    return %c0_i32, %c0_i32_0 : i32, i32
  }
  func.func @transform_6(%arg0: i32, %arg1: i32) -> (i32, i32) {
    %c0_i32 = arith.constant 0 : i32
    %c0_i32_0 = arith.constant 0 : i32
    %c0_i32_1 = arith.constant 0 : i32
    return %c0_i32, %c0_i32_0 : i32, i32
  }
  func.func @transform_7(%arg0: i32, %arg1: i32) -> (i32, i32) {
    %c0_i32 = arith.constant 0 : i32
    %c0_i32_0 = arith.constant 0 : i32
    %c0_i32_1 = arith.constant 0 : i32
    return %c0_i32, %c0_i32_0 : i32, i32
  }
  func.func @transform_8(%arg0: i32, %arg1: i32) -> (i32, i32) {
    %c0_i32 = arith.constant 0 : i32
    %c0_i32_0 = arith.constant 0 : i32
    %c0_i32_1 = arith.constant 0 : i32
    return %c0_i32, %c0_i32_0 : i32, i32
  }
  func.func @transform_9(%arg0: i32, %arg1: i32) -> (i32, i32, i32, i32) {
    %c0_i32 = arith.constant 0 : i32
    %c0_i32_0 = arith.constant 0 : i32
    %c0_i32_1 = arith.constant 0 : i32
    return %arg0, %c0_i32, %arg1, %c0_i32_0 : i32, i32, i32, i32
  }
}

</mosaic_0001>

<bundles_post_ra>
// kernel: espcn_forward.1
= control target key start
LH: loop header
LB: loop body
LE: loop exit
PB: predicated region body
PF: predicated region fallthrough
CT: control target
= control target key end

     0   :  { %s6467_s30 = smov 0   ;;  %s6469_s10 = smov 0   ;;  %s10274_s0 = inlined_call_operand.vmem [shape: f32[2,2,8,456], index: 0, kind: input, shape index: {}]   ;;  %s10275_s1 = inlined_call_operand.vmem [shape: bf16[64,200], index: 1, kind: input, shape index: {}]   ;;  %s10276_s2 = inlined_call_operand.vmem [shape: bf16[3,32,192], index: 2, kind: input, shape index: {}]   ;;  %s10277_s3 = inlined_call_operand.vmem [shape: bf16[3,48,96], index: 3, kind: input, shape index: {}]   ;;  %s10278_s4 = inlined_call_operand.vmem [shape: f32[64,1], index: 4, kind: input, shape index: {}]   ;;  %s10279_s5 = inlined_call_operand.vmem [shape: f32[32,1], index: 5, kind: input, shape index: {}]   ;;  %s10280_s6 = inlined_call_operand.vmem [shape: f32[48,1], index: 6, kind: input, shape index: {}]   ;;  %s10281_s7 = inlined_call_operand.vmem [shape: s32[1,336], index: 7, kind: input, shape index: {}]   ;;  %s10282_s8 = inlined_call_operand.vmem [shape: s32[1,336], index: 8, kind: input, shape index: {}]   ;;  %s10283_s9 = inlined_call_operand.vmem [shape: f32[2,48,16,16], index: 9, kind: output, shape index: {}]  }
   0x1   :  { %s6471_s11 = smov 0   ;;  %s6473_s12 = smov 0  }
   0x2   :  { %s6475_s13 = smov 0   ;;  %s6477_s14 = smov 0  }
   0x3   :  { %s6479_s15 = smov 0  }
   0x4 LB: > { %s28_s16 = sadd.s32 1, %s6384_s13  ;;  %s31_s17 = sadd.s32 1, %s6388_s14  ;;  %s6392_s15 = sphi %s6479_s15, %s19_s15   ;;  %s6388_s14 = sphi %s6477_s14, %s10400_s14   ;;  %s6384_s13 = sphi %s6475_s13, %s10399_s13   ;;  %s6380_s12 = sphi %s6473_s12, %s10398_s12   ;;  %s6376_s11 = sphi %s6471_s11, %s10397_s11   ;;  %s6372_s10 = sphi %s6469_s10, %s10396_s10   ;;  %s6368_s30 = sphi %s6467_s30, %s10395_s30  }
   0x5   : > { %p29_p0 = scmp.ge.s32.totalorder %s28_s16, 2  ;;  %s5782_s18 = sadd.s32 4294967295, %s6392_s15  }
   0x6   : > { %p246_p1 = scmp.ne.s32.totalorder %s6372_s10, %s6368_s30  ;;  %p247_p2 = scmp.eq.s32.totalorder %s5782_s18, 3 }
   0x7   : > { %s10402_s16 = smov (%p29_p0, %s28_s16), 0  ;;  %s10404_s17 = smov (!%p29_p0, %s31_s17), %s6388_s14 }
   0x8   : > { %10313 = sst [smem:[#allocation3_spill]] %s10402_s16  ;;  %s232_s19 = ssub.s32 %s6384_s13, %s10402_s16 }
   0x9   : > { %p33_p3 = scmp.ge.s32.totalorder %s10404_s17, 2  ;;  %p5786_p4 = scmp.ge.s32.totalorder %s6392_s15, 1 }
   0xa   : > { %p6513_p5 = por %p247_p2, %p246_p1  ;;  %p307_p6 = scmp.lt.s32.totalorder %s6392_s15, 5 }
   0xb   : > { %s10406_s17 = smov (%p33_p3, %s10404_s17), 0  ;;  %s236_s23 = sadd.s32 1, %s6372_s10 }
   0xc   : > { %10315 = sst [smem:[#allocation4_spill]] %s10406_s17  ;;  %p308_p7 = pnand %p5786_p4, %p307_p6 }
   0xd   : > { %s231_s21 = ssub.s32 %s6388_s14, %s10406_s17 }
   0xe   : > { %s233_s22 = sor.u32 %s232_s19, %s231_s21  ;;  %311 = sbr.rel (%p308_p7) target bundleno = 2564 (0xa04), region = 56 }
   0xf   : > { %p234_p8 = scmp.eq.s32.totalorder %s233_s22, 0 }
  0x11   : > { %s6524_s24 = scalar_select %p234_p8, %s6372_s10, %s236_s23  }
  0x13   : > { %p346_p9 = scmp.lt.s32.totalorder %s6380_s12, 1  ;;  %p348_p10 = scmp.lt.s32.totalorder %s6376_s11, 1  ;;  %v10292_v9 = vmov 0   ;;  %vm456_vm0 = vcmask 826368   ;;  %vm432_vm1 = vcmask 842752   ;;  %vm444_vm2 = vcmask 834560  }
  0x14   : > { %s6394_s21 = smov 103   ;;  %s6395_s22 = smov 101   ;;  %949 = vmatprep.subr.bf16.mxu1 %v10292_v9  ;;  %6232 = vset.pattern.permute.xlu1 %v10292_v9  ;;  %vm579_vm3 = vcmask 859136   ;;  %vm420_vm4 = vcmask 850944   ;;  %vm384_vm5 = vcmask 1031168   ;;  %vm396_vm6 = vcmask 1022976  }
  0x15   : > { %s347_s25 = scalar_select %p346_p9, %s6380_s12, 1  ;;  %6231 = vset.pattern.permute.xlu0 %v10292_v9  ;;  %vm372_vm7 = vcmask 1039360   ;;  %vm540_vm8 = vcmask 621568   ;;  %vm555_vm9 = vcmask 457728   ;;  %vm510_vm10 = vcmask 637952  }
  0x16   : > { %s349_s26 = scalar_select %p348_p10, %s6376_s11, 1  ;;  %vm525_vm11 = vcmask 629760   ;;  %vm853_vm12 = vcmask 588800   ;;  %vm480_vm13 = vcmask 654336   ;;  %vm495_vm14 = vcmask 646144  }
  0x17   : > { %s5788_s27 = sshll.u32 %s347_s25, 3  ;;  %s6396_s16 = smov 102   ;;  %vm468_vm15 = vcmask 818176  }
  0x18   : > { %s5787_s28 = sshll.u32 %s349_s26, 2  ;;  %s6397_s17 = smov 105  }
  0x19   : > { %s352_s29 = sadd.s32 %s5788_s27, %s5787_s28  ;;  %s10290_s23 = smov 104  }
  0x1a   : > { %s5789_s18 = sshll.u32 %s352_s29, 3  ;;  %s6399_s25 = smov 125  }
  0x1b   : > { %s354_s19 = scalar_lea.vmem %s10274_s0, %s5789_s18  ;;  %s6400_s26 = smov 126  }
  0x1c   : > { %v6533_v0 = vld [vmem:[%s354_s19 + $0x8] sm:$0xff]  ;;  %v6535_v1 = vld [vmem:[%s354_s19 + $0x10] sm:$0xff]  ;;  %v6537_v2 = vld [vmem:[%s354_s19] sm:$0xff]  ;;  %s6401_s27 = smov 127   ;;  %s10286_s28 = smov 56  }
  0x1d   : > { %v6006_v3 = vpack.i.bf16 %v6535_v1, %v6533_v0  ;;  %v5996_v4 = vpack.i.bf16 %v6533_v0, %v6537_v2  ;;  %v6543_v5 = vld [vmem:[%s354_s19 + $0x18] sm:$0xff]  ;;  %s6403_s29 = smov 76   ;;  %s6405_s18 = smov 77  }
  0x1e   : > { %v6001_v6 = vpack.i.bf16 %v6543_v5, %v6535_v1  ;;  %v6021_v7 = vpack.i.bf16 %v6537_v2, %v6543_v5  ;;  %v6091_v8 = vpack.i.bf16 %v6543_v5, %v6537_v2  ;;  %s6406_s19 = smov 78  }
  0x1f   : > { %6007 = vrot.lane.b32.xlu1 %v6006_v3, %s6394_s21  ;;  %5997 = vrot.lane.b32.xlu0 %v5996_v4, %s6395_s22 }
  0x23   : > { %6012 = vrot.lane.b32.xlu1 %v6006_v3, %s6396_s16  ;;  %6002 = vrot.lane.b32.xlu0 %v6001_v6, %s6395_s22  ;;  %s10288_s22 = smov 80  }
  0x27   : > { %6022 = vrot.lane.b32.xlu1 %v6021_v7, %s6396_s16  ;;  %6017 = vrot.lane.b32.xlu0 %v6021_v7, %s6394_s21  ;;  %s6407_s21 = smov 79   ;;  %s6409_s16 = smov 100  }
  0x2b   : > { %6032 = vrot.lane.b32.xlu1 %v6006_v3, %s6397_s17  ;;  %6027 = vrot.lane.b32.xlu0 %v6006_v3, %s10290_s23 }
  0x2f   : > { %6042 = vrot.lane.b32.xlu1 %v6021_v7, %s10290_s23  ;;  %6037 = vrot.lane.b32.xlu0 %v6021_v7, %s6397_s17  ;;  %s6410_s17 = smov 124   ;;  %s6916_s23 = sshll.u32 %s6376_s11, 3 }
  0x33   : > { %6052 = vrot.lane.b32.xlu1 %v6006_v3, %s6399_s25  ;;  %6047 = vrot.lane.b32.xlu0 %v6006_v3, %s6400_s26 }
  0x37   : > { %6062 = vrot.lane.b32.xlu1 %v6021_v7, %s6399_s25  ;;  %6057 = vrot.lane.b32.xlu0 %v6021_v7, %s6400_s26  ;;  %s6411_s25 = smov 55  }
  0x3b   : > { %6072 = vrot.lane.b32.xlu1 %v6021_v7, %s6401_s27  ;;  %6067 = vrot.lane.b32.xlu0 %v6006_v3, %s6401_s27 }
  0x3f   : > { %6082 = vrot.lane.b32.xlu1 %v6006_v3, %s10286_s28  ;;  %6077 = vrot.lane.b32.xlu0 %v6006_v3, %s6403_s29 }
  0x43   : > { %6092 = vrot.lane.b32.xlu1 %v6091_v8, %s10286_s28  ;;  %6087 = vrot.lane.b32.xlu0 %v6091_v8, %s6403_s29  ;;  %s1041_s29 = ssub.s32 18, %s6916_s23  ;;  %s1734_s28 = ssub.s32 17, %s6916_s23 }
  0x47   : > { %6102 = vrot.lane.b32.xlu1 %v6006_v3, %s6405_s18  ;;  %6097 = vrot.lane.b32.xlu0 %v6006_v3, %s6406_s19 }
  0x4b   : > { %6112 = vrot.lane.b32.xlu1 %v6091_v8, %s6405_s18  ;;  %6107 = vrot.lane.b32.xlu0 %v6091_v8, %s6406_s19  ;;  %s1731_s18 = ssub.s32 1, %s6916_s23 }
  0x4f   : > { %6122 = vrot.lane.b32.xlu1 %v6006_v3, %s6407_s21  ;;  %6117 = vrot.lane.b32.xlu0 %v6006_v3, %s10288_s22 }
  0x53   : > { %6127 = vrot.lane.b32.xlu1 %v6091_v8, %s6407_s21  ;;  %474 = vrot.lane.b32.xlu0 %v6537_v2, %s10288_s22  ;;  %s1038_s22 = ssub.s32 2, %s6916_s23  ;;  %s343_s23 = sand.u32 1, %s6368_s30  }
  0x57   : > { %6132 = vrot.lane.b32.xlu0 %v6006_v3, %s6409_s16  ;;  %462 = vrot.lane.b32.xlu1 %v6537_v2, %s6409_s16  ;;  %s10323_s16 = smov 104  }
  0x5b   : > { %6137 = vrot.lane.b32.xlu0 %v6006_v3, %s6410_s17  ;;  %402 = vrot.lane.b32.xlu1 %v6537_v2, %s6410_s17  ;;  %s10324_s17 = smov 80  }
  0x5f   : > { %6142 = vrot.lane.b32.xlu0 %v6006_v3, %s6411_s25 }
  0x91   : > { %v6008_v10 = vpop.permute.xlu1 %6007  ;;  %v5998_v11 = vpop.permute.xlu0 %5997 }
  0x92   : > { %v6000_v12 = vunpack.i.h.bf16 %v5998_v11  ;;  %v5999_v13 = vunpack.i.l.bf16 %v5998_v11  ;;  %v6575_v17 = vunpack.i.h.bf16 %v6008_v10  ;;  %v6009_v18 = vunpack.i.l.bf16 %v6008_v10 }
  0x94   : > { %v6578_v19 = vsel %vm456_vm0, %v5999_v13, %v6000_v12  ;;  %v6595_v30 = vsel %vm432_vm1, %v6009_v18, %v6575_v17 }
  0x95   : > { %v6568_v14 = vpop.permute.xlu1 %6012  ;;  %v6570_v15 = vpop.permute.xlu0 %6002 }
  0x96   : > { %v6573_v16 = vunpack.i.l.bf16 %v6570_v15  ;;  %v6014_v28 = vunpack.i.l.bf16 %v6568_v14  ;;  %v6005_v57 = vunpack.i.h.bf16 %v6570_v15  ;;  %v6647_v10 = vunpack.i.h.bf16 %v6568_v14 }
  0x98   : > { %v6582_v20 = vsel %vm456_vm0, %v6000_v12, %v6573_v16  ;;  %v594_v15 = vsel %vm456_vm0, %v6573_v16, %v6005_v57  ;;  %vm408_vm0 = vcmask 1014784  }
  0x99   : > { %v6584_v21 = vpop.permute.xlu1 %6022  ;;  %v6018_v22 = vpop.permute.xlu0 %6017  ;;  %v6161_v23 = vpack.i.bf16 %v6582_v20, %v6578_v19 }
  0x9a   : > { %v6025_v24 = vunpack.i.h.bf16 %v6584_v21  ;;  %v6024_v25 = vunpack.i.l.bf16 %v6584_v21  ;;  %v6020_v26 = vunpack.i.h.bf16 %v6018_v22  ;;  %v6019_v27 = vunpack.i.l.bf16 %v6018_v22 }
  0x9b   : > { %6162 = vrot.lane.b32.xlu0 %v6161_v23, %s6411_s25 }
  0x9c   : > { %v6146_v29 = vpack.i.bf16 %v6024_v25, %v6019_v27  ;;  %v588_v31 = vsel %vm432_vm1, %v6575_v17, %v6019_v27  ;;  %v6602_v35 = vsel %vm432_vm1, %v6020_v26, %v6009_v18  ;;  %v6607_v36 = vsel %vm444_vm2, %v6025_v24, %v6014_v28 }
  0x9d   : > { %v6033_v32 = vpop.permute.xlu1 %6032  ;;  %v6598_v33 = vpop.permute.xlu0 %6027  ;;  %v6171_v34 = vpack.i.bf16 %v588_v31, %v6595_v30  ;;  %v6181_v41 = vpack.i.bf16 %v6607_v36, %v6602_v35  ;;  %v6166_v27 = vpack.i.bf16 %v6005_v57, %v594_v15  ;;  %vm667_vm1 = vcmask 449536  }
  0x9e   : > { %6147 = vrot.lane.b32.xlu1 %v6146_v29, %s6411_s25  ;;  %v6035_v37 = vunpack.i.h.bf16 %v6033_v32  ;;  %v6034_v38 = vunpack.i.l.bf16 %v6033_v32  ;;  %v6029_v46 = vunpack.i.l.bf16 %v6598_v33  ;;  %v6666_v26 = vunpack.i.h.bf16 %v6598_v33 }
  0x9f   : > { %6172 = vrot.lane.b32.xlu0 %v6171_v34, %s6411_s25  ;;  %v591_v29 = vsel %vm444_vm2, %v6647_v10, %v6024_v25  ;;  %v6681_v33 = vsel %vm444_vm2, %v6014_v28, %v6647_v10  ;;  %vm866_vm2 = vcmask 1043456  }
  0xa0   : > { %v581_v48 = vsel %vm579_vm3, %v6034_v38, %v6035_v37  ;;  %v6690_v14 = vsel %vm420_vm4, %v6029_v46, %v6666_v26 }
  0xa1   : > { %v6610_v39 = vpop.permute.xlu1 %6042  ;;  %v6038_v40 = vpop.permute.xlu0 %6037 }
  0xa2   : > { %v6045_v42 = vunpack.i.h.bf16 %v6610_v39  ;;  %v6044_v43 = vunpack.i.l.bf16 %v6610_v39  ;;  %v6040_v44 = vunpack.i.h.bf16 %v6038_v40  ;;  %v6039_v45 = vunpack.i.l.bf16 %v6038_v40 }
  0xa3   : > { %6182 = vrot.lane.b32.xlu0 %v6181_v41, %s6411_s25  ;;  %v6176_v41 = vpack.i.bf16 %v591_v29, %v6681_v33 }
  0xa4   : > { %v6151_v47 = vpack.i.bf16 %v6044_v43, %v6039_v45  ;;  %v582_v49 = vsel %vm579_vm3, %v6035_v37, %v6039_v45  ;;  %v6626_v53 = vsel %vm420_vm4, %v6045_v42, %v6029_v46  ;;  %v580_v54 = vsel %vm579_vm3, %v6040_v44, %v6034_v38 }
  0xa5   : > { %v6622_v50 = vpop.permute.xlu1 %6052  ;;  %v6048_v51 = vpop.permute.xlu0 %6047  ;;  %v6186_v52 = vpack.i.bf16 %v582_v49, %v581_v48  ;;  %v6196_v60 = vpack.i.bf16 %v6626_v53, %v580_v54  ;;  %v585_v28 = vsel %vm420_vm4, %v6666_v26, %v6044_v43 }
  0xa6   : > { %6152 = vrot.lane.b32.xlu1 %v6151_v47, %s6411_s25  ;;  %v6630_v55 = vunpack.i.h.bf16 %v6048_v51  ;;  %v6049_v56 = vunpack.i.l.bf16 %v6048_v51  ;;  %v6054_v4 = vunpack.i.l.bf16 %v6622_v50  ;;  %v6699_v47 = vunpack.i.h.bf16 %v6622_v50 }
  0xa7   : > { %6187 = vrot.lane.b32.xlu0 %v6186_v52, %s6411_s25  ;;  %v6191_v43 = vpack.i.bf16 %v585_v28, %v6690_v14 }
  0xa8   : > { %v6642_v7 = vsel %vm384_vm5, %v6049_v56, %v6630_v55 }
  0xa9   : > { %v6633_v58 = vpop.permute.xlu1 %6062  ;;  %v6058_v59 = vpop.permute.xlu0 %6057 }
  0xaa   : > { %v6065_v61 = vunpack.i.h.bf16 %v6633_v58  ;;  %v6064_v62 = vunpack.i.l.bf16 %v6633_v58  ;;  %v6060_v63 = vunpack.i.h.bf16 %v6058_v59  ;;  %v6059_v3 = vunpack.i.l.bf16 %v6058_v59 }
  0xab   : > { %6197 = vrot.lane.b32.xlu0 %v6196_v60, %s6411_s25 }
  0xac   : > { %v6156_v6 = vpack.i.bf16 %v6064_v62, %v6059_v3  ;;  %v567_v8 = vsel %vm384_vm5, %v6630_v55, %v6059_v3  ;;  %v6657_v23 = vsel %vm384_vm5, %v6060_v63, %v6049_v56  ;;  %v6662_v24 = vsel %vm396_vm6, %v6065_v61, %v6054_v4 }
  0xad   : > { %v6649_v11 = vpop.permute.xlu1 %6072  ;;  %v6068_v12 = vpop.permute.xlu0 %6067  ;;  %v6201_v13 = vpack.i.bf16 %v567_v8, %v6642_v7  ;;  %v6211_v37 = vpack.i.bf16 %v6662_v24, %v6657_v23  ;;  %v570_v58 = vsel %vm396_vm6, %v6699_v47, %v6064_v62 }
  0xae   : > { %v6075_v18 = vunpack.i.h.bf16 %v6649_v11  ;;  %v6069_v22 = vunpack.i.l.bf16 %v6068_v12  ;;  %6157 = vrot.lane.b32.xlu1 %v6156_v6, %s6411_s25  ;;  %v6074_v48 = vunpack.i.l.bf16 %v6649_v11  ;;  %v6702_v49 = vunpack.i.h.bf16 %v6068_v12 }
  0xaf   : > { %6202 = vrot.lane.b32.xlu0 %v6201_v13, %s6411_s25 }
  0xb0   : > { %v6673_v31 = vsel %vm372_vm7, %v6075_v18, %v6069_v22  ;;  %v6715_v8 = vsel %vm372_vm7, %v6069_v22, %v6702_v49  ;;  %v564_v62 = vsel %vm372_vm7, %v6702_v49, %v6074_v48  ;;  %v6235_v22 = vld [vmem:[%s10275_s1 + $0x4] ss:$8 sps:$4 sm:$0xff]  }
  0xb1   : > { %v6083_v32 = vpop.permute.xlu1 %6082  ;;  %v6078_v34 = vpop.permute.xlu0 %6077  ;;  %v6221_v42 = vpack.i.bf16 %v6673_v31, %v6537_v2  ;;  %5800 = vmatprep.mubr.msk.bf16.mxu0 %vm853_vm12, %v6235_v22  ;;  %5804 = vmatprep.mubr.msk.bf16.mxu1 %vm853_vm12, %v6235_v22 }
  0xb2   : > { %v6085_v21 = vunpack.i.h.bf16 %v6083_v32  ;;  %v6084_v38 = vunpack.i.l.bf16 %v6083_v32  ;;  %v6080_v40 = vunpack.i.h.bf16 %v6078_v34  ;;  %v6079_v25 = vunpack.i.l.bf16 %v6078_v34  ;;  %6167 = vrot.lane.b32.xlu1 %v6166_v27, %s6411_s25 }
  0xb3   : > { %6212 = vrot.lane.b32.xlu0 %v6211_v37, %s6411_s25  ;;  %v6726_v32 = vsel %vm396_vm6, %v6054_v4, %v6699_v47  ;;  %v6216_v4 = vpack.i.bf16 %v564_v62, %v6715_v8 }
  0xb4   : > { %v542_v44 = vsel %vm540_vm8, %v6079_v25, %v6080_v40  ;;  %v557_v45 = vsel %vm555_vm9, %v6084_v38, %v6085_v21  ;;  %v6206_v34 = vpack.i.bf16 %v570_v58, %v6726_v32 }
  0xb5   : > { %v6093_v51 = vpop.permute.xlu1 %6092  ;;  %v6088_v52 = vpop.permute.xlu0 %6087  ;;  %v752_v46 = vpack.c.bf16 %v557_v45, %v542_v44 }
  0xb6   : > { %v6095_v54 = vunpack.i.h.bf16 %v6093_v51  ;;  %v6094_v56 = vunpack.i.l.bf16 %v6093_v51  ;;  %v6090_v39 = vunpack.i.h.bf16 %v6088_v52  ;;  %v6089_v57 = vunpack.i.l.bf16 %v6088_v52  ;;  %6177 = vrot.lane.b32.xlu1 %v6176_v41, %s6411_s25 }
  0xb7   : > { %6222 = vrot.lane.b32.xlu0 %v6221_v42, %s6411_s25  ;;  %876 = vmatprep.subr.bf16.mxu0 %v752_v46 }
  0xb8   : > { %v543_v59 = vsel %vm540_vm8, %v6080_v40, %v6090_v39  ;;  %v558_v60 = vsel %vm555_vm9, %v6085_v21, %v6095_v54  ;;  %v541_v61 = vsel %vm540_vm8, %v6089_v57, %v6079_v25  ;;  %v556_v63 = vsel %vm555_vm9, %v6094_v56, %v6084_v38 }
  0xb9   : > { %v6103_v3 = vpop.permute.xlu1 %6102  ;;  %v6098_v6 = vpop.permute.xlu0 %6097  ;;  %v753_v12 = vpack.c.bf16 %v558_v60, %v543_v59  ;;  %v751_v13 = vpack.c.bf16 %v556_v63, %v541_v61  ;;  %v6226_v60 = vpack.i.bf16 %v6074_v48, %v6543_v5 }
  0xba   : > { %v6105_v15 = vunpack.i.h.bf16 %v6103_v3  ;;  %v6104_v18 = vunpack.i.l.bf16 %v6103_v3  ;;  %v6100_v27 = vunpack.i.h.bf16 %v6098_v6  ;;  %v6099_v29 = vunpack.i.l.bf16 %v6098_v6  ;;  %6192 = vrot.lane.b32.xlu1 %v6191_v43, %s6411_s25 }
  0xbb   : > { %950 = vmatpush1.bf16.msra.mxu1 %v753_v12  ;;  %877 = vmatpush1.bf16.msra.mxu0 %v751_v13 }
  0xbc   : > { %951 = vmatprep.subr.bf16.mxu1 %v10292_v9  ;;  %v512_v37 = vsel %vm510_vm10, %v6099_v29, %v6100_v27  ;;  %v527_v21 = vsel %vm525_vm11, %v6104_v18, %v6105_v15 }
  0xbd   : > { %v6113_v38 = vpop.permute.xlu1 %6112  ;;  %v6108_v50 = vpop.permute.xlu0 %6107  ;;  %v749_v40 = vpack.c.bf16 %v527_v21, %v512_v37 }
  0xbe   : > { %v6115_v25 = vunpack.i.h.bf16 %v6113_v38  ;;  %v6114_v41 = vunpack.i.l.bf16 %v6113_v38  ;;  %v6110_v42 = vunpack.i.h.bf16 %v6108_v50  ;;  %v6109_v28 = vunpack.i.l.bf16 %v6108_v50  ;;  %6207 = vrot.lane.b32.xlu1 %v6206_v34, %s6411_s25 }
  0xbf   : > { %878 = vmatprep.subr.bf16.mxu0 %v749_v40 }
  0xc0   : > { %v513_v44 = vsel %vm510_vm10, %v6100_v27, %v6110_v42  ;;  %v528_v45 = vsel %vm525_vm11, %v6105_v15, %v6115_v25  ;;  %v511_v51 = vsel %vm510_vm10, %v6109_v28, %v6099_v29  ;;  %v526_v52 = vsel %vm525_vm11, %v6114_v41, %v6104_v18 }
  0xc1   : > { %v6123_v46 = vpop.permute.xlu1 %6122  ;;  %v6118_v54 = vpop.permute.xlu0 %6117  ;;  %v750_v56 = vpack.c.bf16 %v528_v45, %v513_v44  ;;  %v748_v39 = vpack.c.bf16 %v526_v52, %v511_v51  ;;  %v740_v42 = vpack.c.bf16 %v6681_v33, %v6595_v30  ;;  %v734_v51 = vpack.c.bf16 %v6726_v32, %v6642_v7  ;;  %v2176_v32 = vld [vmem:[%s10280_s6 + $0x8] sm:$0xff]  ;;  %v2177_v52 = vld [vmem:[%s10280_s6 + $0x10] sm:$0xff] }
  0xc2   : > { %v6125_v57 = vunpack.i.h.bf16 %v6123_v46  ;;  %v6124_v43 = vunpack.i.l.bf16 %v6123_v46  ;;  %v6120_v58 = vunpack.i.h.bf16 %v6118_v54  ;;  %v6119_v59 = vunpack.i.l.bf16 %v6118_v54  ;;  %6217 = vrot.lane.b32.xlu1 %v6216_v4, %s6411_s25  ;;  %v2178_v46 = vld [vmem:[%s10280_s6 + $0x18] sm:$0xff]  ;;  %v2179_v54 = vld [vmem:[%s10280_s6 + $0x20] sm:$0xff] }
  0xc3   : > { %952 = vmatpush1.bf16.msra.mxu1 %v750_v56  ;;  %879 = vmatpush1.bf16.msra.mxu0 %v748_v39  ;;  %v731_v7 = vpack.c.bf16 %v6715_v8, %v6533_v0  ;;  %v773_v0 = vld [vmem:[%s10278_s4 + $0x20] sm:$0xff]  ;;  %v2180_v56 = vld [vmem:[%s10280_s6 + $0x28] sm:$0xff] }
  0xc4   : > { %953 = vmatprep.subr.bf16.mxu1 %v10292_v9  ;;  %v482_v61 = vsel %vm480_vm13, %v6119_v59, %v6120_v58  ;;  %v497_v63 = vsel %vm495_vm14, %v6124_v43, %v6125_v57  ;;  %v2175_v8 = vld [vmem:[%s10280_s6] sm:$0xff] }
  0xc5   : > { %v6128_v3 = vpop.permute.xlu1 %6127  ;;  %v475_v6 = vpop.permute.xlu0 %474  ;;  %v746_v62 = vpack.c.bf16 %v497_v63, %v482_v61 }
  0xc6   : > { %v6130_v12 = vunpack.i.h.bf16 %v6128_v3  ;;  %v6129_v13 = vunpack.i.l.bf16 %v6128_v3  ;;  %v481_v15 = vsel %vm480_vm13, %v475_v6, %v6119_v59  ;;  %6227 = vrot.lane.b32.xlu1 %v6226_v60, %s6411_s25  ;;  %s5915_s25 = smul.u32 384, %s343_s23 }
  0xc7   : > { %880 = vmatprep.subr.bf16.mxu0 %v746_v62 }
  0xc8   : > { %v496_v18 = vsel %vm495_vm14, %v6129_v13, %v6124_v43  ;;  %v498_v5 = vsel %vm495_vm14, %v6125_v57, %v6130_v12  ;;  %s7855_s30 = scalar_lea.vmem [#allocation2], %s5915_s25 }
  0xc9   : > { %v745_v11 = vpack.c.bf16 %v496_v18, %v481_v15  ;;  %v6133_v48 = vpop.permute.xlu0 %6132  ;;  %v463_v27 = vpop.permute.xlu1 %462  ;;  %v747_v29 = vpack.c.bf16 %v498_v5, %v6120_v58 }
  0xca   : > { %v6135_v22 = vunpack.i.h.bf16 %v6133_v48  ;;  %v6134_v34 = vunpack.i.l.bf16 %v6133_v48 }
  0xcb   : > { %954 = vmatpush1.bf16.msra.mxu1 %v747_v29  ;;  %881 = vmatpush1.bf16.msra.mxu0 %v745_v11 }
  0xcc   : > { %v469_v37 = vsel %vm468_vm15, %v463_v27, %v6134_v34  ;;  %955 = vmatprep.subr.bf16.mxu1 %v10292_v9  ;;  %v470_v21 = vsel %vm468_vm15, %v6134_v34, %v6135_v22  ;;  %v744_v38 = vpack.c.bf16 %v6135_v22, %v6573_v16  ;;  %v741_v16 = vpack.c.bf16 %v6647_v10, %v6575_v17  ;;  %v772_v10 = vld [vmem:[%s10278_s4 + $0x18] sm:$0xff] }
  0xcd   : > { %v742_v50 = vpack.c.bf16 %v469_v37, %v6578_v19  ;;  %v6138_v4 = vpop.permute.xlu0 %6137  ;;  %v743_v40 = vpack.c.bf16 %v470_v21, %v6582_v20  ;;  %v403_v28 = vpop.permute.xlu1 %402  ;;  %v739_v19 = vpack.c.bf16 %v6607_v36, %v6602_v35  ;;  %v735_v17 = vpack.c.bf16 %v6699_v47, %v6630_v55  ;;  %v770_v35 = vld [vmem:[%s10278_s4 + $0x8] sm:$0xff]  ;;  %v769_v36 = vld [vmem:[%s10278_s4] sm:$0xff]  ;;  %v771_v55 = vld [vmem:[%s10278_s4 + $0x10] sm:$0xff] }
  0xce   : > { %v6140_v25 = vunpack.i.h.bf16 %v6138_v4  ;;  %v6139_v41 = vunpack.i.l.bf16 %v6138_v4  ;;  %784 = vperm.xlu1 %6232, %v770_v35   ;;  %779 = vperm.xlu0 %6231, %v769_v36   ;;  %v1693_v47 = vld [vmem:[%s10279_s5 + $0x10] sm:$0xff] }
  0xcf   : > { %882 = vmatprep.subr.bf16.mxu0 %v743_v40  ;;  %956 = vmatpush1.bf16.msra.mxu1 %v744_v38 }
  0xd0   : > { %883 = vmatpush1.bf16.msra.mxu0 %v742_v50  ;;  %957 = vmatprep.subr.bf16.mxu1 %v10292_v9  ;;  %v410_v44 = vsel %vm408_vm0, %v6139_v41, %v6140_v25  ;;  %v409_v20 = vsel %vm408_vm0, %v403_v28, %v6139_v41  ;;  %v738_v30 = vpack.c.bf16 %v6666_v26, %v6140_v25  ;;  %v774_v26 = vld [vmem:[%s10278_s4 + $0x28] sm:$0xff] }
  0xd1   : > { %884 = vmatprep.subr.bf16.mxu0 %v740_v42  ;;  %v737_v45 = vpack.c.bf16 %v6690_v14, %v410_v44  ;;  %v736_v33 = vpack.c.bf16 %v6626_v53, %v409_v20  ;;  %v733_v53 = vpack.c.bf16 %v6662_v24, %v6657_v23  ;;  %v732_v23 = vpack.c.bf16 %v6702_v49, %v6535_v1  ;;  %v775_v1 = vld [vmem:[%s10278_s4 + $0x30] sm:$0xff]  ;;  %v1692_v14 = vld [vmem:[%s10279_s5 + $0x8] sm:$0xff]  ;;  %v1694_v49 = vld [vmem:[%s10279_s5 + $0x18] sm:$0xff]  ;;  %v6838_v39 = vpop.permute.xlu0 %6142 }
  0xd2   : > { %v730_v24 = vpack.c.bf16 %v6673_v31, %v6537_v2  ;;  %789 = vperm.xlu1 %6232, %v771_v55   ;;  %794 = vperm.xlu0 %6231, %v772_v10   ;;  %v776_v2 = vld [vmem:[%s10278_s4 + $0x38] sm:$0xff]  ;;  %v1691_v31 = vld [vmem:[%s10279_s5] sm:$0xff] }
  0xd3   : > { %958 = vmatpush1.bf16.msra.mxu1 %v741_v16 }
  0xd4   : > { %885 = vmatpush1.bf16.msra.mxu0 %v739_v19  ;;  %959 = vmatprep.subr.bf16.mxu1 %v10292_v9 }
  0xd5   : > { %886 = vmatprep.subr.bf16.mxu0 %v737_v45 }
  0xd6   : > { %799 = vperm.xlu1 %6232, %v773_v0   ;;  %804 = vperm.xlu0 %6231, %v774_v26  }
  0xd7   : > { %960 = vmatpush1.bf16.msra.mxu1 %v738_v30 }
  0xd8   : > { %887 = vmatpush1.bf16.msra.mxu0 %v736_v33  ;;  %961 = vmatprep.subr.bf16.mxu1 %v10292_v9 }
  0xd9   : > { %888 = vmatprep.subr.bf16.mxu0 %v734_v51 }
  0xda   : > { %809 = vperm.xlu1 %6232, %v775_v1   ;;  %814 = vperm.xlu0 %6231, %v776_v2  }
  0xdb   : > { %962 = vmatpush1.bf16.msra.mxu1 %v735_v17 }
  0xdc   : > { %889 = vmatpush1.bf16.msra.mxu0 %v733_v53  ;;  %963 = vmatprep.subr.bf16.mxu1 %v10292_v9 }
  0xdd   : > { %890 = vmatprep.subr.bf16.mxu0 %v731_v7 }
  0xde   : > { %1697 = vperm.xlu1 %6232, %v1691_v31   ;;  %1702 = vperm.xlu0 %6231, %v1692_v14  }
  0xdf   : > { %964 = vmatpush1.bf16.msra.mxu1 %v732_v23 }
  0xe0   : > { %891 = vmatpush1.bf16.msra.mxu0 %v730_v24  ;;  %971 = vmatprep.subr.bf16.mxu1 %v10292_v9 }
  0xe2   : > { %1707 = vperm.xlu1 %6232, %v1693_v47   ;;  %1712 = vperm.xlu0 %6231, %v1694_v49  }
  0xe6   : > { %2183 = vperm.xlu1 %6232, %v2175_v8   ;;  %2188 = vperm.xlu0 %6231, %v2176_v32   ;;  %v6145_v32 = vunpack.i.h.bf16 %v6838_v39 }
  0xea   : > { %2193 = vperm.xlu1 %6232, %v2177_v52   ;;  %2198 = vperm.xlu0 %6231, %v2178_v46  }
  0xee   : > { %2203 = vperm.xlu1 %6232, %v2179_v54   ;;  %2208 = vperm.xlu0 %6231, %v2180_v56   ;;  %v6144_v56 = vunpack.i.l.bf16 %v6838_v39 }
 0x10d   : > { %v6163_v57 = vpop.permute.xlu0 %6162 }
 0x10e   : > { %v6165_v61 = vunpack.i.h.bf16 %v6163_v57  ;;  %v6164_v63 = vunpack.i.l.bf16 %v6163_v57 }
 0x110   : > { %v6148_v59 = vpop.permute.xlu1 %6147  ;;  %v692_v12 = vsel %vm667_vm1, %v6164_v63, %v6165_v61 }
 0x111   : > { %v6173_v43 = vpop.permute.xlu0 %6172  ;;  %v766_v13 = vpack.c.bf16 %v692_v12, %v692_v12  ;;  %v6149_v29 = vunpack.i.l.bf16 %v6148_v59  ;;  %v6150_v21 = vunpack.i.h.bf16 %v6148_v59 }
 0x112   : > { %v6175_v15 = vunpack.i.h.bf16 %v6173_v43  ;;  %v6174_v18 = vunpack.i.l.bf16 %v6173_v43 }
 0x113   : > { %v868_v50 = vsel %vm866_vm2, %v766_v13, 0 }
 0x114   : > { %v687_v28 = vsel %vm667_vm1, %v6174_v18, %v6175_v15  ;;  %v688_v51 = vsel %vm667_vm1, %v6175_v15, %v6149_v29 }
 0x115   : > { %v6183_v58 = vpop.permute.xlu0 %6182 }
 0x116   : > { %v6184_v22 = vunpack.i.l.bf16 %v6183_v58  ;;  %v6185_v44 = vunpack.i.h.bf16 %v6183_v58 }
 0x118   : > { %v6840_v3 = vpop.permute.xlu1 %6152  ;;  %v686_v33 = vsel %vm667_vm1, %v6184_v22, %v6174_v18 }
 0x119   : > { %v6188_v60 = vpop.permute.xlu0 %6187  ;;  %v6154_v40 = vunpack.i.l.bf16 %v6840_v3  ;;  %v6155_v35 = vunpack.i.h.bf16 %v6840_v3 }
 0x11a   : > { %v6190_v34 = vunpack.i.h.bf16 %v6188_v60  ;;  %v6189_v37 = vunpack.i.l.bf16 %v6188_v60 }
 0x11c   : > { %v681_v17 = vsel %vm667_vm1, %v6189_v37, %v6190_v34  ;;  %v682_v0 = vsel %vm667_vm1, %v6190_v34, %v6154_v40 }
 0x11d   : > { %v6198_v6 = vpop.permute.xlu0 %6197 }
 0x11e   : > { %v6199_v16 = vunpack.i.l.bf16 %v6198_v6  ;;  %v6200_v26 = vunpack.i.h.bf16 %v6198_v6 }
 0x120   : > { %v6842_v62 = vpop.permute.xlu1 %6157  ;;  %v680_v31 = vsel %vm667_vm1, %v6199_v16, %v6189_v37 }
 0x121   : > { %v6845_v5 = vpop.permute.xlu0 %6202  ;;  %v6159_v14 = vunpack.i.l.bf16 %v6842_v62 }
 0x122   : > { %v6205_v47 = vunpack.i.h.bf16 %v6845_v5  ;;  %v6204_v49 = vunpack.i.l.bf16 %v6845_v5 }
 0x124   : > { %v6168_v11 = vpop.permute.xlu1 %6167  ;;  %v675_v13 = vsel %vm667_vm1, %v6204_v49, %v6205_v47  ;;  %v676_v39 = vsel %vm667_vm1, %v6205_v47, %v6159_v14 }
 0x125   : > { %v6170_v48 = vunpack.i.h.bf16 %v6168_v11  ;;  %v6169_v27 = vunpack.i.l.bf16 %v6168_v11  ;;  %v6213_v45 = vpop.permute.xlu0 %6212 }
 0x126   : > { %v6214_v8 = vunpack.i.l.bf16 %v6213_v45  ;;  %v6215_v63 = vunpack.i.h.bf16 %v6213_v45 }
 0x127   : > { %v693_v38 = vsel %vm667_vm1, %v6165_v61, %v6169_v27  ;;  %v694_v4 = vsel %vm667_vm1, %v6169_v27, %v6170_v48  ;;  %v6160_v61 = vunpack.i.h.bf16 %v6842_v62 }
 0x128   : > { %v6178_v25 = vpop.permute.xlu1 %6177  ;;  %v767_v41 = vpack.c.bf16 %v693_v38, %v693_v38  ;;  %v768_v42 = vpack.c.bf16 %v694_v4, %v694_v4  ;;  %v674_v15 = vsel %vm667_vm1, %v6214_v8, %v6204_v49 }
 0x129   : > { %v6180_v19 = vunpack.i.h.bf16 %v6178_v25  ;;  %v6179_v20 = vunpack.i.l.bf16 %v6178_v25  ;;  %v6223_v57 = vpop.permute.xlu0 %6222 }
 0x12a   : > { %5799 = vmatprep.subr.msk.bf16.mxu0 %vm866_vm2, %v767_v41  ;;  %v874_v30 = vsel %vm866_vm2, %v768_v42, 0  ;;  %v6225_v12 = vunpack.i.h.bf16 %v6223_v57  ;;  %v6224_v18 = vunpack.i.l.bf16 %v6223_v57 }
 0x12b   : > { %899 = vmatpush2.bf16.msra.mxu0 %v868_v50  ;;  %972 = vmatpush2.bf16.msra.mxu1 %v874_v30  ;;  %v690_v36 = vsel %vm667_vm1, %v6179_v20, %v6180_v19  ;;  %v689_v53 = vsel %vm667_vm1, %v6185_v44, %v6179_v20  ;;  %v691_v7 = vsel %vm667_vm1, %v6180_v19, %v6150_v21  ;;  %v6233_v44 = vld [vmem:[%s10275_s1] ss:$8 sps:$4 sm:$0xff]   ;;  %v6236_v20 = vld [vmem:[%s10275_s1 + $0x14] ss:$8 sps:$4 sm:$0xff]   ;;  %v6238_v30 = vld [vmem:[%s10275_s1 + $0x10] ss:$8 sps:$4 sm:$0xff]  }
 0x12c   : > { %v6193_v55 = vpop.permute.xlu1 %6192  ;;  %v764_v10 = vpack.c.bf16 %v690_v36, %v687_v28  ;;  %973 = vmatprep.subr.bf16.mxu1 %v10292_v9  ;;  %v763_v23 = vpack.c.bf16 %v689_v53, %v686_v33  ;;  %v765_v24 = vpack.c.bf16 %v691_v7, %v688_v51  ;;  %v669_v21 = vsel %vm667_vm1, %v6144_v56, %v6145_v32  ;;  %v6239_v33 = vld [vmem:[%s10275_s1 + $0x24] ss:$8 sps:$4 sm:$0xff]   ;;  %v6241_v51 = vld [vmem:[%s10275_s1 + $0x20] ss:$8 sps:$4 sm:$0xff]  }
 0x12d   : > { %v6195_v1 = vunpack.i.h.bf16 %v6193_v55  ;;  %v6194_v2 = vunpack.i.l.bf16 %v6193_v55  ;;  %v668_v50 = vsel %vm667_vm1, %v6224_v18, %v6144_v56  ;;  %v357_v36 = vld [vmem:[%s10281_s7] sm:$0x7]  ;;  %v1039_v53 = vstv %s1038_s22  ;;  %s6414_s22 = smov 112  }
 0x12e   : > { %900 = vmatprep.subr.bf16.mxu0 %v764_v10  ;;  %v1042_v7 = vstv %s1041_s29  ;;  %v358_v55 = vld [vmem:[%s10282_s8] sm:$0x7]  ;;  %vm1040_vm3 = vcmp.ge.s32.totalorder %v357_v36, %v1039_v53  ;;  %s6415_s29 = smov 8  }
 0x12f   : > { %901 = vmatpush2.bf16.msra.mxu0 %v763_v23  ;;  %974 = vmatpush2.bf16.msra.mxu1 %v765_v24  ;;  %v684_v52 = vsel %vm667_vm1, %v6194_v2, %v6195_v1  ;;  %v683_v46 = vsel %vm667_vm1, %v6200_v26, %v6194_v2  ;;  %v685_v54 = vsel %vm667_vm1, %v6195_v1, %v6155_v35  ;;  %v6244_v35 = vld [vmem:[%s10275_s1 + $0x30] ss:$8 sps:$4 sm:$0xff]   ;;  %vm1045_vm9 = vcmp.ge.s32.totalorder %v358_v55, 2 }
 0x130   : > { %v6208_v43 = vpop.permute.xlu1 %6207  ;;  %v761_v58 = vpack.c.bf16 %v684_v52, %v681_v17  ;;  %975 = vmatprep.subr.bf16.mxu1 %v10292_v9  ;;  %v760_v59 = vpack.c.bf16 %v683_v46, %v680_v31  ;;  %v762_v60 = vpack.c.bf16 %v685_v54, %v682_v0  ;;  %v6242_v17 = vld [vmem:[%s10275_s1 + $0x34] ss:$8 sps:$4 sm:$0xff]   ;;  %vm1043_vm6 = vcmp.lt.s32.totalorder %v357_v36, %v1042_v7 }
 0x131   : > { %v6210_v3 = vunpack.i.h.bf16 %v6208_v43  ;;  %v6209_v6 = vunpack.i.l.bf16 %v6208_v43  ;;  %vm1044_vm8 = vmand %vm1040_vm3, %vm1043_vm6  ;;  %v1050_v0 = vlaneseq  ;;  %vm1047_vm11 = vcmp.lt.s32.totalorder %v358_v55, 18 }
 0x132   : > { %902 = vmatprep.subr.bf16.mxu0 %v761_v58  ;;  %vm1046_vm10 = vmand %vm1044_vm8, %vm1045_vm9  ;;  %vm1343_vm3 = vcmask 523264  }
 0x133   : > { %903 = vmatpush2.bf16.msra.mxu0 %v760_v59  ;;  %976 = vmatpush2.bf16.msra.mxu1 %v762_v60  ;;  %v678_v5 = vsel %vm667_vm1, %v6209_v6, %v6210_v3  ;;  %v677_v11 = vsel %vm667_vm1, %v6215_v63, %v6209_v6  ;;  %v679_v62 = vsel %vm667_vm1, %v6210_v3, %v6160_v61 }
 0x134   : > { %v6218_v48 = vpop.permute.xlu1 %6217  ;;  %v758_v27 = vpack.c.bf16 %v678_v5, %v675_v13  ;;  %977 = vmatprep.subr.bf16.mxu1 %v10292_v9  ;;  %v757_v29 = vpack.c.bf16 %v677_v11, %v674_v15  ;;  %v759_v22 = vpack.c.bf16 %v679_v62, %v676_v39 }
 0x135   : > { %v6220_v34 = vunpack.i.h.bf16 %v6218_v48  ;;  %v6219_v37 = vunpack.i.l.bf16 %v6218_v48 }
 0x136   : > { %904 = vmatprep.subr.bf16.mxu0 %v758_v27 }
 0x137   : > { %905 = vmatpush2.bf16.msra.mxu0 %v757_v29  ;;  %978 = vmatpush2.bf16.msra.mxu1 %v759_v22  ;;  %v672_v38 = vsel %vm667_vm1, %v6219_v37, %v6220_v34  ;;  %v671_v4 = vsel %vm667_vm1, %v6225_v12, %v6219_v37 }
 0x138   : > { %v6228_v40 = vpop.permute.xlu1 %6227  ;;  %v755_v25 = vpack.c.bf16 %v672_v38, %v669_v21  ;;  %v754_v41 = vpack.c.bf16 %v671_v4, %v668_v50  ;;  %979 = vmatprep.subr.bf16.mxu1 %v10292_v9 }
 0x139   : > { %v6230_v42 = vunpack.i.h.bf16 %v6228_v40  ;;  %v6229_v28 = vunpack.i.l.bf16 %v6228_v40 }
 0x13a   : > { %906 = vmatprep.subr.bf16.mxu0 %v755_v25 }
 0x13b   : > { %907 = vmatpush2.bf16.msra.mxu0 %v754_v41  ;;  %v670_v16 = vsel %vm667_vm1, %v6145_v32, %v6229_v28  ;;  %v673_v19 = vsel %vm667_vm1, %v6220_v34, %v6230_v42  ;;  %v6926_v32 = vshrl.u32 %v1050_v0, 7 }
 0x13c   : > { %v756_v45 = vpack.c.bf16 %v673_v19, %v670_v16 }
 0x13d   : > { %10316 = vst [vmem:[#allocation5_spill] sm:$0xff] %v6926_v32  ;;  %v6929_v59 = vsub.s32 0, %v6926_v32  ;;  %v6933_v6 = vsub.s32 1, %v6926_v32  ;;  %v1060_v39 = vsub.s32 2, %v6926_v32 }
 0x13e   : > { %909 = vmatmul.mubr.bf16.vlgmr.msra.gmra.mxu0 %v6233_v44  ;;  %980 = vmatpush2.bf16.msra.mxu1 %v756_v45 }
 0x13f   : > { %5801 = vmatprep.mubr.msk.bf16.mxu0 %vm853_vm12, %v6236_v20  ;;  %10317 = vst [vmem:[#allocation6_spill] sm:$0xff] %v6929_v59  ;;  %10318 = vst [vmem:[#allocation7_spill] sm:$0xff] %v6933_v6 }
 0x141   : > { %982 = vmatmul.mubr.bf16.vlgmr.msra.gmra.mxu1 %v6233_v44 }
 0x142   : > { %5805 = vmatprep.mubr.msk.bf16.mxu1 %vm853_vm12, %v6236_v20 }
 0x146   : > { %919 = vmatmul.mubr.bf16.gmra.mxu0 %v6238_v30 }
 0x147   : > { %5802 = vmatprep.mubr.msk.bf16.mxu0 %vm853_vm12, %v6239_v33 }
 0x149   : > { %990 = vmatmul.mubr.bf16.gmra.mxu1 %v6238_v30  ;;  %v780_v10 = vpop.permute.xlu0 %779  ;;  %v785_v1 = vpop.permute.xlu1 %784 }
 0x14a   : > { %5806 = vmatprep.mubr.msk.bf16.mxu1 %vm853_vm12, %v6239_v33 }
 0x14d   : > { %v790_v43 = vpop.permute.xlu1 %789  ;;  %v795_v12 = vpop.permute.xlu0 %794 }
 0x14e   : > { %929 = vmatmul.mubr.bf16.gmra.mxu0 %v6241_v51 }
 0x14f   : > { %5803 = vmatprep.mubr.msk.bf16.mxu0 %vm853_vm12, %v6242_v17 }
 0x151   : > { %998 = vmatmul.mubr.bf16.gmra.mxu1 %v6241_v51  ;;  %v6942_v21 = vpop.permute.xlu1 %799  ;;  %v6959_v16 = vpop.permute.xlu0 %804 }
 0x152   : > { %5807 = vmatprep.mubr.msk.bf16.mxu1 %vm853_vm12, %v6242_v17  ;;  %vm1048_vm12 = vmand %vm1046_vm10, %vm1047_vm11 }
 0x153   : > { %v1049_v63 = vsel %vm1048_vm12, 1, %v10292_v9 }
 0x154   : > { %v1053_v11 = vrot.slane %v1049_v63, %v6929_v59  ;;  %v1057_v29 = vrot.slane %v1049_v63, %v6933_v6  ;;  %v6938_v34 = vrot.slane %v1049_v63, %v1060_v39 }
 0x156   : > { %939 = vmatmul.mubr.bf16.gmra.mxu0 %v6244_v35  ;;  %vm6944_vm14 = vcmp.eq.s32.totalorder %v1053_v11, 1  ;;  %vm6953_vm15 = vcmp.eq.s32.totalorder %v1057_v29, 1  ;;  %vm1064_vm0 = vcmp.eq.s32.totalorder %v6938_v34, 1 }
 0x157   : > { %vm7286_vm1 = vmpackc.low %vm6953_vm15, %vm6953_vm15 }
 0x158   : > { %vm5825_vm2 = vmpackc.low %vm6944_vm14, %vm6944_vm14 }
 0x159   : > { %1006 = vmatmul.mubr.bf16.gmra.mxu1 %v6244_v35 }
 0x1fe   : > { %v910_v23 = vpop.f32.mrf.mxu0 }
 0x1ff   : > { %v911_v24 = vadd.f32 %v910_v23, %v780_v10 }
 0x200   : > { %v912_v26 = vpop.f32.mrf.mxu0 }
 0x201   : > { %v913_v2 = vadd.f32 %v912_v26, %v780_v10  ;;  %v983_v31 = vpop.f32.mrf.mxu1  ;;  %6272 = vtanh.f32 %v911_v24 }
 0x202   : > { %v984_v14 = vadd.f32 %v983_v31, %v780_v10  ;;  %v914_v47 = vpop.f32.mrf.mxu0 }
 0x203   : > { %v915_v49 = vadd.f32 %v914_v47, %v785_v1  ;;  %v985_v8 = vpop.f32.mrf.mxu1  ;;  %6274 = vtanh.f32 %v913_v2 }
 0x204   : > { %v916_v52 = vpop.f32.mrf.mxu0 }
 0x205   : > { %6276 = vtanh.f32 %v915_v49  ;;  %v917_v46 = vadd.f32 %v916_v52, %v785_v1  ;;  %v986_v54 = vpop.f32.mrf.mxu1  ;;  %v6993_v49 = vpop.permute.xlu1 %809 }
 0x206   : > { %6278 = vtanh.f32 %v984_v14  ;;  %v987_v56 = vadd.f32 %v986_v54, %v785_v1  ;;  %v920_v57 = vpop.f32.mrf.mxu0 }
 0x207   : > { %6280 = vtanh.f32 %v917_v46  ;;  %v988_v58 = vpop.f32.mrf.mxu1  ;;  %v921_v60 = vadd.f32 %v920_v57, %v790_v43 }
 0x208   : > { %6282 = vtanh.f32 %v987_v56  ;;  %v922_v61 = vpop.f32.mrf.mxu0  ;;  %v7003_v58 = vpop.permute.xlu0 %814 }
 0x209   : > { %v991_v3 = vpop.f32.mrf.mxu1  ;;  %v923_v13 = vadd.f32 %v922_v61, %v790_v43  ;;  %6284 = vtanh.f32 %v921_v60 }
 0x20a   : > { %v924_v15 = vpop.f32.mrf.mxu0  ;;  %v992_v53 = vadd.f32 %v991_v3, %v790_v43 }
 0x20b   : > { %v925_v18 = vadd.f32 %v924_v15, %v795_v12  ;;  %v993_v5 = vpop.f32.mrf.mxu1 }
 0x20c   : > { %v926_v62 = vpop.f32.mrf.mxu0 }
 0x20d   : > { %6286 = vtanh.f32 %v925_v18  ;;  %v927_v48 = vadd.f32 %v926_v62, %v795_v12  ;;  %v994_v27 = vpop.f32.mrf.mxu1 }
 0x20e   : > { %6288 = vtanh.f32 %v923_v13  ;;  %v930_v22 = vpop.f32.mrf.mxu0  ;;  %v6940_v37 = vpop.eup %6272  ;;  %v995_v38 = vadd.f32 %v994_v27, %v795_v12 }
 0x20f   : > { %6290 = vtanh.f32 %v927_v48  ;;  %v996_v50 = vpop.f32.mrf.mxu1  ;;  %v931_v40 = vadd.f32 %v930_v22, %v6942_v21  ;;  %v1065_v45 = vsel %vm6944_vm14, %v6940_v37, 0.0 }
 0x210   : > { %v932_v25 = vpop.f32.mrf.mxu0  ;;  %v6949_v41 = vpop.eup %6274  ;;  %6292 = vtanh.f32 %v995_v38 }
 0x211   : > { %v6951_v42 = vpop.f32.mrf.mxu1  ;;  %v933_v19 = vadd.f32 %v932_v25, %v6942_v21  ;;  %6294 = vtanh.f32 %v931_v40  ;;  %v1066_v10 = vsel %vm6953_vm15, %v6949_v41, 0.0 }
 0x212   : > { %v6957_v44 = vpop.eup %6276  ;;  %v934_v20 = vpop.f32.mrf.mxu0 }
 0x213   : > { %v6279_v30 = vpop.eup %6278  ;;  %v935_v33 = vadd.f32 %v934_v20, %v6959_v16  ;;  %v1001_v51 = vpop.f32.mrf.mxu1  ;;  %v1068_v17 = vsel %vm6944_vm14, %v6957_v44, 0.0 }
 0x214   : > { %v6972_v36 = vpop.eup %6280  ;;  %v936_v7 = vpop.f32.mrf.mxu0  ;;  %v6974_v55 = vpack.c.bf16 %v1068_v17, %v1065_v45  ;;  %v1067_v14 = vsel %vm1064_vm0, %v6279_v30, 0.0 }
 0x215   : > { %v6283_v23 = vpop.eup %6282  ;;  %6296 = vtanh.f32 %v935_v33  ;;  %v937_v24 = vadd.f32 %v936_v7, %v6959_v16  ;;  %v6980_v0 = vpop.f32.mrf.mxu1  ;;  %v1069_v26 = vsel %vm6953_vm15, %v6972_v36, 0.0 }
 0x216   : > { %6298 = vtanh.f32 %v933_v19  ;;  %v940_v2 = vpop.f32.mrf.mxu0  ;;  %1113 = vrot.lane.b32.xlu1 %v6974_v55, %s6401_s27  ;;  %v1090_v31 = vpack.c.bf16 %v1069_v26, %v1066_v10  ;;  %v1070_v47 = vsel %vm1064_vm0, %v6283_v23, 0.0  ;;  %v6997_v56 = vpop.eup %6284  ;;  %v1003_v26 = vadd.f32 %v6980_v0, %v6959_v16 }
 0x217   : > { %6300 = vtanh.f32 %v937_v24  ;;  %v1004_v8 = vpop.f32.mrf.mxu1  ;;  %v1091_v52 = vpack.c.bf16 %v1070_v47, %v1067_v14  ;;  %v941_v46 = vadd.f32 %v940_v2, %v6993_v49  ;;  %v1071_v25 = vsel %vm6944_vm14, %v6997_v56, 0.0 }
 0x218   : > { %v942_v54 = vpop.f32.mrf.mxu0  ;;  %1115 = vrot.lane.b32.xlu0 %v1090_v31, %s6401_s27  ;;  %6302 = vtanh.f32 %v992_v53 }
 0x219   : > { %v6999_v57 = vpop.f32.mrf.mxu1  ;;  %v943_v60 = vadd.f32 %v942_v54, %v6993_v49  ;;  %6304 = vtanh.f32 %v941_v46 }
 0x21a   : > { %v7001_v43 = vpop.eup %6286  ;;  %v944_v61 = vpop.f32.mrf.mxu0  ;;  %1117 = vrot.lane.b32.xlu1 %v1091_v52, %s6401_s27  ;;  %v1008_v46 = vadd.f32 %v6999_v57, %v6993_v49 }
 0x21b   : > { %v7007_v63 = vpop.eup %6288  ;;  %v945_v3 = vadd.f32 %v944_v61, %v7003_v58  ;;  %v1009_v12 = vpop.f32.mrf.mxu1  ;;  %v1074_v38 = vsel %vm6944_vm14, %v7001_v43, 0.0 }
 0x21c   : > { %v7012_v15 = vpop.eup %6290  ;;  %v946_v39 = vpop.f32.mrf.mxu0  ;;  %1156 = vrot.lane.b32.xlu0 %v1090_v31, %s6400_s26  ;;  %v1092_v45 = vpack.c.bf16 %v1074_v38, %v1071_v25  ;;  %v1072_v14 = vsel %vm6953_vm15, %v7007_v63, 0.0 }
 0x21d   : > { %6306 = vtanh.f32 %v945_v3  ;;  %v947_v18 = vadd.f32 %v946_v39, %v7003_v58  ;;  %v1010_v5 = vpop.f32.mrf.mxu1  ;;  %v6293_v48 = vpop.eup %6292  ;;  %v1075_v2 = vsel %vm6953_vm15, %v7012_v15, 0.0 }
 0x21e   : > { %6308 = vtanh.f32 %v943_v60  ;;  %1154 = vrot.lane.b32.xlu1 %v6974_v55, %s6400_s26  ;;  %v7021_v27 = vpop.eup %6294  ;;  %v1076_v30 = vsel %vm1064_vm0, %v6293_v48, 0.0  ;;  %v1011_v16 = vadd.f32 %v1010_v5, %v7003_v58 }
 0x21f   : > { %6310 = vtanh.f32 %v947_v18  ;;  %v1012_v62 = vpop.f32.mrf.mxu1  ;;  %v1077_v0 = vsel %vm6944_vm14, %v7021_v27, 0.0 }
 0x220   : > { %1224 = vrot.lane.b32.xlu0 %v1090_v31, %s10323_s16  ;;  %6312 = vtanh.f32 %v1003_v26 }
 0x222   : > { %v7023_v29 = vpop.eup %6296  ;;  %1158 = vrot.lane.b32.xlu1 %v1091_v52, %s6400_s26 }
 0x223   : > { %v7026_v22 = vpop.eup %6298  ;;  %v10340_v4 = vpack.c.bf16 %v7023_v29, %v7021_v27  ;;  %v10344_v27 = vpack.c.bf16 %v6957_v44, %v6940_v37  ;;  %v6247_v44 = vld [vmem:[%s10276_s2 + $0x24] ss:$8 sps:$4 sm:$0xff]  }
 0x224   : > { %v7033_v40 = vpop.eup %6300  ;;  %1505 = vrot.lane.b32.xlu0 %v1090_v31, %s10324_s17  ;;  %v1000_v31 = vadd.f32 %v6951_v42, %v6942_v21  ;;  %v1080_v21 = vsel %vm6944_vm14, %v7023_v29, 0.0  ;;  %v1078_v54 = vsel %vm6953_vm15, %v7026_v22, 0.0  ;;  %5816 = vmatprep.mubr.msk.bf16.mxu0 %vm1343_vm3, %v6247_v44 }
 0x225   : > { %v6303_v20 = vpop.eup %6302  ;;  %v1081_v47 = vsel %vm6953_vm15, %v7033_v40, 0.0 }
 0x226   : > { %1222 = vrot.lane.b32.xlu1 %v6974_v55, %s10323_s16  ;;  %v7046_v33 = vpop.eup %6304  ;;  %v1073_v51 = vsel %vm1064_vm0, %v6303_v20, 0.0  ;;  %6314 = vtanh.f32 %v1000_v31  ;;  %v1096_v60 = vpack.c.bf16 %v1081_v47, %v1078_v54  ;;  %v7139_v20 = vpop.permute.xlu1 %1697 }
 0x227   : > { %v1094_v53 = vpack.c.bf16 %v1076_v30, %v1073_v51  ;;  %6316 = vtanh.f32 %v1011_v16  ;;  %v1083_v12 = vsel %vm6944_vm14, %v7046_v33, 0.0  ;;  %10325 = vst [vmem:[#allocation8_spill] sm:$0xff] %v7139_v20 }
 0x228   : > { %1119 = vrot.lane.b32.xlu0 %v1092_v45, %s6401_s27  ;;  %6318 = vtanh.f32 %v1008_v46 }
 0x22a   : > { %v7050_v17 = vpop.eup %6306  ;;  %1226 = vrot.lane.b32.xlu1 %v1091_v52, %s10323_s16  ;;  %v7146_v30 = vpop.permute.xlu1 %1707 }
 0x22b   : > { %v7053_v7 = vpop.eup %6308  ;;  %v1086_v49 = vsel %vm6944_vm14, %v7050_v17, 0.0  ;;  %10327 = vst [vmem:[#allocation10_spill] sm:$0xff] %v7146_v30  ;;  %v10338_v28 = vpack.c.bf16 %v7050_v17, %v7046_v33  ;;  %v10343_v33 = vpack.c.bf16 %v6972_v36, %v6949_v41  ;;  %v6250_v36 = vld [vmem:[%s10276_s2 + $0x4] ss:$8 sps:$4 sm:$0xff]  }
 0x22c   : > { %v7057_v23 = vpop.eup %6310  ;;  %1123 = vrot.lane.b32.xlu0 %v1094_v53, %s6401_s27  ;;  %v1098_v18 = vpack.c.bf16 %v1086_v49, %v1083_v12  ;;  %v1084_v34 = vsel %vm6953_vm15, %v7053_v7, 0.0  ;;  %5846 = vmatprep.mubr.msk.bf16.mxu1 %vm1343_vm3, %v6250_v36 }
 0x22d   : > { %v6313_v42 = vpop.eup %6312  ;;  %v1087_v38 = vsel %vm6953_vm15, %v7057_v23, 0.0 }
 0x22e   : > { %1503 = vrot.lane.b32.xlu1 %v6974_v55, %s10324_s17  ;;  %v1093_v55 = vpack.c.bf16 %v1075_v2, %v1072_v14  ;;  %v1082_v58 = vsel %vm1064_vm0, %v6313_v42, 0.0  ;;  %v1099_v25 = vpack.c.bf16 %v1087_v38, %v1084_v34 }
 0x230   : > { %1160 = vrot.lane.b32.xlu0 %v1092_v45, %s6400_s26 }
 0x232   : > { %1507 = vrot.lane.b32.xlu1 %v1091_v52, %s10324_s17  ;;  %v1095_v52 = vpack.c.bf16 %v1080_v21, %v1077_v0 }
 0x233   : > { %v6315_v8 = vpop.eup %6314 }
 0x234   : > { %1164 = vrot.lane.b32.xlu0 %v1094_v53, %s6400_s26  ;;  %v1079_v61 = vsel %vm1064_vm0, %v6315_v8, 0.0  ;;  %v6317_v57 = vpop.eup %6316 }
 0x235   : > { %v1097_v3 = vpack.c.bf16 %v1082_v58, %v1079_v61  ;;  %v6319_v39 = vpop.eup %6318  ;;  %v1088_v5 = vsel %vm1064_vm0, %v6317_v57, 0.0 }
 0x236   : > { %1121 = vrot.lane.b32.xlu1 %v1093_v55, %s6401_s27  ;;  %v1085_v62 = vsel %vm1064_vm0, %v6319_v39, 0.0 }
 0x237   : > { %v1100_v48 = vpack.c.bf16 %v1088_v5, %v1085_v62 }
 0x238   : > { %1228 = vrot.lane.b32.xlu0 %v1092_v45, %s10323_s16 }
 0x23a   : > { %1162 = vrot.lane.b32.xlu1 %v1093_v55, %s6400_s26 }
 0x23c   : > { %1232 = vrot.lane.b32.xlu0 %v1094_v53, %s10323_s16 }
 0x23e   : > { %1230 = vrot.lane.b32.xlu1 %v1093_v55, %s10323_s16 }
 0x240   : > { %1509 = vrot.lane.b32.xlu0 %v1092_v45, %s10324_s17  ;;  %v7142_v45 = vpop.permute.xlu0 %1702 }
 0x241   : > { %10326 = vst [vmem:[#allocation9_spill] sm:$0xff] %v7142_v45 }
 0x242   : > { %1511 = vrot.lane.b32.xlu1 %v1093_v55, %s10324_s17 }
 0x244   : > { %1513 = vrot.lane.b32.xlu0 %v1094_v53, %s10324_s17  ;;  %v7149_v51 = vpop.permute.xlu0 %1712  ;;  %v7152_v53 = vpop.permute.xlu1 %2183 }
 0x245   : > { %10328 = vst [vmem:[#allocation11_spill] sm:$0xff] %v7149_v51  ;;  %10329 = vst [vmem:[#allocation12_spill] sm:$0xff] %v7152_v53 }
 0x246   : > { %1125 = vrot.lane.b32.xlu1 %v1095_v52, %s6401_s27 }
 0x248   : > { %1127 = vrot.lane.b32.xlu0 %v1096_v60, %s6401_s27  ;;  %v7154_v26 = vpop.permute.xlu0 %2188  ;;  %v7156_v2 = vpop.permute.xlu1 %2193 }
 0x249   : > { %10330 = vst [vmem:[#allocation13_spill] sm:$0xff] %v7154_v26  ;;  %10331 = vst [vmem:[#allocation14_spill] sm:$0xff] %v7156_v2 }
 0x24a   : > { %1129 = vrot.lane.b32.xlu1 %v1097_v3, %s6401_s27 }
 0x24c   : > { %1168 = vrot.lane.b32.xlu0 %v1096_v60, %s6400_s26  ;;  %v7158_v31 = vpop.permute.xlu0 %2198  ;;  %v7160_v14 = vpop.permute.xlu1 %2203 }
 0x24d   : > { %10332 = vst [vmem:[#allocation15_spill] sm:$0xff] %v7158_v31  ;;  %10333 = vst [vmem:[#allocation16_spill] sm:$0xff] %v7160_v14 }
 0x24e   : > { %1166 = vrot.lane.b32.xlu1 %v1095_v52, %s6400_s26 }
 0x250   : > { %1236 = vrot.lane.b32.xlu0 %v1096_v60, %s10323_s16  ;;  %v7162_v55 = vpop.permute.xlu0 %2208 }
 0x251   : > { %10334 = vst [vmem:[#allocation17_spill] sm:$0xff] %v7162_v55 }
 0x252   : > { %1170 = vrot.lane.b32.xlu1 %v1097_v3, %s6400_s26 }
 0x254   : > { %1517 = vrot.lane.b32.xlu0 %v1096_v60, %s10324_s17 }
 0x256   : > { %1234 = vrot.lane.b32.xlu1 %v1095_v52, %s10323_s16 }
 0x258   : > { %1131 = vrot.lane.b32.xlu0 %v1098_v18, %s6401_s27 }
 0x25a   : > { %1238 = vrot.lane.b32.xlu1 %v1097_v3, %s10323_s16 }
 0x25c   : > { %1135 = vrot.lane.b32.xlu0 %v1100_v48, %s6401_s27 }
 0x25e   : > { %1515 = vrot.lane.b32.xlu1 %v1095_v52, %s10324_s17 }
 0x260   : > { %1172 = vrot.lane.b32.xlu0 %v1098_v18, %s6400_s26 }
 0x262   : > { %1519 = vrot.lane.b32.xlu1 %v1097_v3, %s10324_s17 }
 0x264   : > { %1176 = vrot.lane.b32.xlu0 %v1100_v48, %s6400_s26 }
 0x266   : > { %1133 = vrot.lane.b32.xlu1 %v1099_v25, %s6401_s27 }
 0x268   : > { %1240 = vrot.lane.b32.xlu0 %v1098_v18, %s10323_s16 }
 0x26a   : > { %1174 = vrot.lane.b32.xlu1 %v1099_v25, %s6400_s26 }
 0x26c   : > { %1244 = vrot.lane.b32.xlu0 %v1100_v48, %s10323_s16 }
 0x26e   : > { %1242 = vrot.lane.b32.xlu1 %v1099_v25, %s10323_s16 }
 0x270   : > { %1521 = vrot.lane.b32.xlu0 %v1098_v18, %s10324_s17 }
 0x272   : > { %1523 = vrot.lane.b32.xlu1 %v1099_v25, %s10324_s17 }
 0x274   : > { %1525 = vrot.lane.b32.xlu0 %v1100_v48, %s10324_s17 }
 0x288   : > { %v1114_v21 = vpop.permute.xlu1 %1113 }
 0x28a   : > { %v1116_v42 = vpop.permute.xlu0 %1115 }
 0x28b   : > { %v7193_v12 = vsel %vm372_vm7, %v1114_v21, %v1116_v42 }
 0x28c   : > { %v1118_v16 = vpop.permute.xlu1 %1117 }
 0x28d   : > { %1250 = vrot.lane.b32.xlu1 %v1118_v16, %s10323_s16  ;;  %v7166_v0 = vsel %vm372_vm7, %v1116_v42, %v1118_v16 }
 0x28e   : > { %v1157_v47 = vpop.permute.xlu0 %1156  ;;  %1248 = vrot.lane.b32.xlu0 %v7166_v0, %s10323_s16 }
 0x290   : > { %v1155_v8 = vpop.permute.xlu1 %1154 }
 0x291   : > { %v7199_v18 = vsel %vm384_vm5, %v1155_v8, %v1157_v47 }
 0x292   : > { %v7170_v52 = vpop.permute.xlu0 %1224 }
 0x294   : > { %v1159_v46 = vpop.permute.xlu1 %1158 }
 0x295   : > { %1274 = vrot.lane.b32.xlu1 %v1159_v46, %s10323_s16  ;;  %v7174_v54 = vsel %vm384_vm5, %v1157_v47, %v1159_v46 }
 0x296   : > { %v7176_v58 = vpop.permute.xlu0 %1505  ;;  %1272 = vrot.lane.b32.xlu0 %v7174_v54, %s10323_s16 }
 0x298   : > { %v7180_v60 = vpop.permute.xlu1 %1222 }
 0x299   : > { %1531 = vrot.lane.b32.xlu1 %v1118_v16, %s10324_s17 }
 0x29a   : > { %v1120_v61 = vpop.permute.xlu0 %1119  ;;  %1529 = vrot.lane.b32.xlu0 %v7166_v0, %s10324_s17 }
 0x29c   : > { %v7185_v3 = vpop.permute.xlu1 %1226 }
 0x29d   : > { %1555 = vrot.lane.b32.xlu1 %v1159_v46, %s10324_s17 }
 0x29e   : > { %v1124_v49 = vpop.permute.xlu0 %1123  ;;  %1553 = vrot.lane.b32.xlu0 %v7174_v54, %s10324_s17 }
 0x2a0   : > { %v7190_v57 = vpop.permute.xlu1 %1503 }
 0x2a1   : > { %1246 = vrot.lane.b32.xlu1 %v7193_v12, %s10323_s16 }
 0x2a2   : > { %v1161_v39 = vpop.permute.xlu0 %1160  ;;  %1256 = vrot.lane.b32.xlu0 %v1124_v49, %s10323_s16 }
 0x2a4   : > { %v7201_v5 = vpop.permute.xlu1 %1507 }
 0x2a5   : > { %1270 = vrot.lane.b32.xlu1 %v7199_v18, %s10323_s16 }
 0x2a6   : > { %v1165_v62 = vpop.permute.xlu0 %1164 }
 0x2a7   : > { %1280 = vrot.lane.b32.xlu0 %v1165_v62, %s10323_s16 }
 0x2a8   : > { %v1122_v48 = vpop.permute.xlu1 %1121 }
 0x2a9   : > { %1527 = vrot.lane.b32.xlu1 %v7193_v12, %s10324_s17  ;;  %v1141_v42 = vsel %vm372_vm7, %v1122_v48, %v1124_v49  ;;  %v1140_v47 = vsel %vm372_vm7, %v1120_v61, %v1122_v48 }
 0x2aa   : > { %v7208_v38 = vpop.permute.xlu0 %1228 }
 0x2ab   : > { %1537 = vrot.lane.b32.xlu0 %v1124_v49, %s10324_s17 }
 0x2ac   : > { %v1163_v34 = vpop.permute.xlu1 %1162 }
 0x2ad   : > { %1551 = vrot.lane.b32.xlu1 %v7199_v18, %s10324_s17  ;;  %v7227_v46 = vsel %vm384_vm5, %v1163_v34, %v1165_v62  ;;  %v7234_v49 = vsel %vm384_vm5, %v1161_v39, %v1163_v34 }
 0x2ae   : > { %v7213_v25 = vpop.permute.xlu0 %1232 }
 0x2af   : > { %1561 = vrot.lane.b32.xlu0 %v1165_v62, %s10324_s17 }
 0x2b0   : > { %v7216_v21 = vpop.permute.xlu1 %1230 }
 0x2b1   : > { %1254 = vrot.lane.b32.xlu1 %v1141_v42, %s10323_s16 }
 0x2b2   : > { %v7220_v16 = vpop.permute.xlu0 %1509 }
 0x2b3   : > { %1252 = vrot.lane.b32.xlu0 %v1140_v47, %s10323_s16 }
 0x2b4   : > { %v7224_v8 = vpop.permute.xlu1 %1511 }
 0x2b5   : > { %1278 = vrot.lane.b32.xlu1 %v7227_v46, %s10323_s16 }
 0x2b6   : > { %v7231_v9 = vpop.permute.xlu0 %1513 }
 0x2b7   : > { %1276 = vrot.lane.b32.xlu0 %v7234_v49, %s10323_s16 }
 0x2b8   : > { %v1126_v35 = vpop.permute.xlu1 %1125 }
 0x2b9   : > { %1535 = vrot.lane.b32.xlu1 %v1141_v42, %s10324_s17 }
 0x2ba   : > { %v1128_v61 = vpop.permute.xlu0 %1127 }
 0x2bb   : > { %1533 = vrot.lane.b32.xlu0 %v1140_v47, %s10324_s17  ;;  %v1142_v31 = vsel %vm372_vm7, %v1126_v35, %v1128_v61 }
 0x2bc   : > { %v1130_v48 = vpop.permute.xlu1 %1129 }
 0x2bd   : > { %1559 = vrot.lane.b32.xlu1 %v7227_v46, %s10324_s17  ;;  %v1143_v34 = vsel %vm372_vm7, %v1128_v61, %v1130_v48 }
 0x2be   : > { %v1169_v62 = vpop.permute.xlu0 %1168 }
 0x2bf   : > { %1557 = vrot.lane.b32.xlu0 %v7234_v49, %s10324_s17 }
 0x2c0   : > { %v1167_v1 = vpop.permute.xlu1 %1166 }
 0x2c1   : > { %1262 = vrot.lane.b32.xlu1 %v1130_v48, %s10323_s16 }
 0x2c2   : > { %v7245_v39 = vpop.permute.xlu0 %1236 }
 0x2c3   : > { %1260 = vrot.lane.b32.xlu0 %v1143_v34, %s10323_s16 }
 0x2c4   : > { %v1171_v13 = vpop.permute.xlu1 %1170 }
 0x2c5   : > { %1286 = vrot.lane.b32.xlu1 %v1171_v13, %s10323_s16  ;;  %v1184_v11 = vsel %vm384_vm5, %v1169_v62, %v1171_v13 }
 0x2c6   : > { %v7251_v50 = vpop.permute.xlu0 %1517 }
 0x2c7   : > { %1284 = vrot.lane.b32.xlu0 %v1184_v11, %s10323_s16 }
 0x2c8   : > { %v7254_v19 = vpop.permute.xlu1 %1234 }
 0x2c9   : > { %1543 = vrot.lane.b32.xlu1 %v1130_v48, %s10324_s17  ;;  %v1183_v48 = vsel %vm384_vm5, %v1167_v1, %v1169_v62 }
 0x2ca   : > { %v1132_v10 = vpop.permute.xlu0 %1131 }
 0x2cb   : > { %1541 = vrot.lane.b32.xlu0 %v1143_v34, %s10324_s17 }
 0x2cc   : > { %v7258_v24 = vpop.permute.xlu1 %1238 }
 0x2cd   : > { %1567 = vrot.lane.b32.xlu1 %v1171_v13, %s10324_s17 }
 0x2ce   : > { %v1136_v55 = vpop.permute.xlu0 %1135 }
 0x2cf   : > { %1565 = vrot.lane.b32.xlu0 %v1184_v11, %s10324_s17 }
 0x2d0   : > { %v7262_v14 = vpop.permute.xlu1 %1515 }
 0x2d1   : > { %1258 = vrot.lane.b32.xlu1 %v1142_v31, %s10323_s16 }
 0x2d2   : > { %v1173_v2 = vpop.permute.xlu0 %1172 }
 0x2d3   : > { %1268 = vrot.lane.b32.xlu0 %v1136_v55, %s10323_s16 }
 0x2d4   : > { %v7268_v26 = vpop.permute.xlu1 %1519 }
 0x2d5   : > { %1282 = vrot.lane.b32.xlu1 %v1183_v48, %s10323_s16 }
 0x2d6   : > { %v1177_v53 = vpop.permute.xlu0 %1176 }
 0x2d7   : > { %1292 = vrot.lane.b32.xlu0 %v1177_v53, %s10323_s16 }
 0x2d8   : > { %v1134_v13 = vpop.permute.xlu1 %1133 }
 0x2d9   : > { %1539 = vrot.lane.b32.xlu1 %v1142_v31, %s10324_s17  ;;  %v1145_v32 = vsel %vm372_vm7, %v1134_v13, %v1136_v55  ;;  %v1144_v35 = vsel %vm372_vm7, %v1132_v10, %v1134_v13  ;;  %v6253_v13 = vld [vmem:[%s10276_s2 + $0x14] ss:$8 sps:$4 sm:$0xff]  }
 0x2da   : > { %1427 = vmatprep.subr.bf16.mxu1 %v1145_v32 }
 0x2db   : > { %1549 = vrot.lane.b32.xlu0 %v1136_v55, %s10324_s17  ;;  %1428 = vmatpush1.bf16.msra.mxu1 %v1144_v35 }
 0x2dc   : > { %1429 = vmatprep.subr.bf16.mxu1 %v1143_v34  ;;  %v1175_v1 = vpop.permute.xlu1 %1174 }
 0x2dd   : > { %1563 = vrot.lane.b32.xlu1 %v1183_v48, %s10324_s17  ;;  %v1186_v10 = vsel %vm384_vm5, %v1175_v1, %v1177_v53 }
 0x2df   : > { %1573 = vrot.lane.b32.xlu0 %v1177_v53, %s10324_s17  ;;  %1430 = vmatpush1.bf16.msra.mxu1 %v1142_v31  ;;  %v1185_v31 = vsel %vm384_vm5, %v1173_v2, %v1175_v1  ;;  %v10339_v53 = vpack.c.bf16 %v7033_v40, %v7026_v22  ;;  %v10342_v22 = vpack.c.bf16 %v7001_v43, %v6997_v56 }
 0x2e0   : > { %1431 = vmatprep.subr.bf16.mxu1 %v1141_v42 }
 0x2e1   : > { %1266 = vrot.lane.b32.xlu1 %v1145_v32, %s10323_s16 }
 0x2e3   : > { %1264 = vrot.lane.b32.xlu0 %v1144_v35, %s10323_s16  ;;  %1432 = vmatpush1.bf16.msra.mxu1 %v1140_v47 }
 0x2e4   : > { %1433 = vmatprep.subr.bf16.mxu1 %v7166_v0  ;;  %v10337_v0 = vpack.c.bf16 %v7057_v23, %v7053_v7  ;;  %v7312_v7 = vpop.permute.xlu0 %1240 }
 0x2e5   : > { %1290 = vrot.lane.b32.xlu1 %v1186_v10, %s10323_s16 }
 0x2e7   : > { %1434 = vmatpush1.bf16.msra.mxu1 %v7193_v12  ;;  %1288 = vrot.lane.b32.xlu0 %v1185_v31, %s10323_s16 }
 0x2e8   : > { %5824 = vmatprep.subr.msk.bf16.mxu1 %vm7286_vm1, %v10337_v0  ;;  %v7326_v40 = vpop.permute.xlu0 %1244 }
 0x2e9   : > { %1547 = vrot.lane.b32.xlu1 %v1145_v32, %s10324_s17  ;;  %v10341_v32 = vpack.c.bf16 %v7012_v15, %v7007_v63  ;;  %v7336_v63 = vpop.permute.xlu1 %1242 }
 0x2eb   : > { %5827 = vmatpush1.bf16.msk.msra.mxu1 %vm5825_vm2, %v10338_v28  ;;  %1545 = vrot.lane.b32.xlu0 %v1144_v35, %s10324_s17 }
 0x2ec   : > { %5830 = vmatprep.subr.msk.bf16.mxu1 %vm7286_vm1, %v10339_v53  ;;  %v7338_v15 = vpop.permute.xlu0 %1521 }
 0x2ed   : > { %1571 = vrot.lane.b32.xlu1 %v1186_v10, %s10324_s17  ;;  %v7340_v56 = vpop.permute.xlu1 %1523 }
 0x2ef   : > { %5833 = vmatpush1.bf16.msk.msra.mxu1 %vm5825_vm2, %v10340_v4  ;;  %1569 = vrot.lane.b32.xlu0 %v1185_v31, %s10324_s17 }
 0x2f0   : > { %5836 = vmatprep.subr.msk.bf16.mxu1 %vm7286_vm1, %v10341_v32  ;;  %v7342_v43 = vpop.permute.xlu0 %1525 }
 0x2f3   : > { %5839 = vmatpush1.bf16.msk.msra.mxu1 %vm5825_vm2, %v10342_v22 }
 0x2f4   : > { %5842 = vmatprep.subr.msk.bf16.mxu1 %vm7286_vm1, %v10343_v33  ;;  %vm4462_vm1 = vcmask 64512  }
 0x2f7   : > { %5845 = vmatpush1.bf16.msk.msra.mxu1 %vm5825_vm2, %v10344_v27 }
 0x2f8   : > { %1451 = vmatprep.subr.bf16.mxu1 %v1186_v10  ;;  %v6256_v10 = vld [vmem:[%s10276_s2 + $0x10] ss:$8 sps:$4 sm:$0xff]  }
 0x2fb   : > { %1452 = vmatpush2.bf16.msra.mxu1 %v1185_v31  ;;  %v10349_v31 = vmov 0  }
 0x2fc   : > { %1453 = vmatprep.subr.bf16.mxu1 %v1184_v11  ;;  %v6248_v11 = vld [vmem:[%s10276_s2] ss:$8 sps:$4 sm:$0xff]  }
 0x2ff   : > { %1454 = vmatpush2.bf16.msra.mxu1 %v1183_v48  ;;  %v7345_v41 = vpop.permute.xlu1 %1250 }
 0x300   : > { %1455 = vmatprep.subr.bf16.mxu1 %v7227_v46  ;;  %v7348_v37 = vpop.permute.xlu0 %1248 }
 0x303   : > { %1456 = vmatpush2.bf16.msra.mxu1 %v7234_v49 }
 0x304   : > { %1457 = vmatprep.subr.bf16.mxu1 %v7174_v54 }
 0x307   : > { %1458 = vmatpush2.bf16.msra.mxu1 %v7199_v18  ;;  %v7362_v29 = vpop.permute.xlu1 %1274 }
 0x308   : > { %v7365_v17 = vpop.permute.xlu0 %1272 }
 0x30a   : > { %1460 = vmatmul.mubr.bf16.vlgmr.msra.gmra.mxu1 %v6248_v11 }
 0x30b   : > { %v7367_v23 = vpop.permute.xlu1 %1531  ;;  %5847 = vmatprep.mubr.msk.bf16.mxu1 %vm1343_vm3, %v6253_v13 }
 0x30c   : > { %v7369_v2 = vpop.permute.xlu0 %1529 }
 0x30f   : > { %v7371_v54 = vpop.permute.xlu1 %1555 }
 0x310   : > { %10345 = vst [vmem:[#allocation18_spill] sm:$0xff] %v7371_v54  ;;  %v7373_v12 = vpop.permute.xlu0 %1553 }
 0x311   : > { %10346 = vst [vmem:[#allocation19_spill] sm:$0xff] %v7373_v12 }
 0x312   : > { %1470 = vmatmul.mubr.bf16.gmra.mxu1 %v6256_v10 }
 0x313   : > { %v1247_v42 = vpop.permute.xlu1 %1246  ;;  %1909 = vmatprep.mubr.bf16.mxu1 %v10349_v31 }
 0x314   : > { %v1257_v47 = vpop.permute.xlu0 %1256 }
 0x317   : > { %v7375_v46 = vpop.permute.xlu1 %1270 }
 0x319   : > { %v7377_v18 = vpop.permute.xlu0 %1280 }
 0x31b   : > { %v7379_v49 = vpop.permute.xlu1 %1527 }
 0x31d   : > { %v7381_v61 = vpop.permute.xlu0 %1537 }
 0x31f   : > { %v7383_v62 = vpop.permute.xlu1 %1551 }
 0x320   : > { %10347 = vst [vmem:[#allocation20_spill] sm:$0xff] %v7383_v62 }
 0x321   : > { %v7385_v34 = vpop.permute.xlu0 %1561 }
 0x322   : > { %10348 = vst [vmem:[#allocation21_spill] sm:$0xff] %v7385_v34 }
 0x323   : > { %v1255_v48 = vpop.permute.xlu1 %1254 }
 0x325   : > { %v1253_v35 = vpop.permute.xlu0 %1252 }
 0x327   : > { %v7391_v1 = vpop.permute.xlu1 %1278 }
 0x329   : > { %v7396_v55 = vpop.permute.xlu0 %1276 }
 0x32b   : > { %v7399_v0 = vpop.permute.xlu1 %1535 }
 0x32d   : > { %v7401_v28 = vpop.permute.xlu0 %1533 }
 0x32f   : > { %v7403_v53 = vpop.permute.xlu1 %1559 }
 0x330   : > { %10350 = vst [vmem:[#allocation22_spill] sm:$0xff] %v7403_v53 }
 0x331   : > { %v7405_v4 = vpop.permute.xlu0 %1557 }
 0x332   : > { %10351 = vst [vmem:[#allocation23_spill] sm:$0xff] %v7405_v4 }
 0x333   : > { %v1263_v32 = vpop.permute.xlu1 %1262 }
 0x335   : > { %v1261_v22 = vpop.permute.xlu0 %1260 }
 0x336   : > { %v1308_v53 = vsel %vm420_vm4, %v1261_v22, %v1263_v32  ;;  %v10359_v32 = vld [vmem:[#allocation18_spill] sm:$0xff] }
 0x337   : > { %v1287_v33 = vpop.permute.xlu1 %1286 }
 0x339   : > { %v1285_v27 = vpop.permute.xlu0 %1284 }
 0x33b   : > { %v7407_v44 = vpop.permute.xlu1 %1543 }
 0x33d   : > { %v7409_v36 = vpop.permute.xlu0 %1541 }
 0x33f   : > { %v7411_v11 = vpop.permute.xlu1 %1567 }
 0x341   : > { %v7413_v13 = vpop.permute.xlu0 %1565 }
 0x342   : > { %10352 = vst [vmem:[#allocation24_spill] sm:$0xff] %v7413_v13  ;;  %v1306_v13 = vsel %vm420_vm4, %v1255_v48, %v1257_v47  ;;  %v1301_v47 = vsel %vm420_vm4, %v7312_v7, %v7336_v63  ;;  %v1297_v7 = vsel %vm420_vm4, %v7208_v38, %v7216_v21  ;;  %v1316_v38 = vsel %vm420_vm4, %v1285_v27, %v1287_v33 }
 0x343   : > { %v1259_v10 = vpop.permute.xlu1 %1258 }
 0x344   : > { %v1307_v34 = vsel %vm420_vm4, %v1259_v10, %v1261_v22  ;;  %v10360_v22 = vld [vmem:[#allocation19_spill] sm:$0xff]  ;;  %v10362_v10 = vmov 0  }
 0x345   : > { %v1269_v6 = vpop.permute.xlu0 %1268  ;;  %v1593_v33 = vsel %vm480_vm13, %v10360_v22, %v10359_v32 }
 0x347   : > { %v1283_v59 = vpop.permute.xlu1 %1282 }
 0x349   : > { %v1293_v51 = vpop.permute.xlu0 %1292 }
 0x34b   : > { %v7415_v30 = vpop.permute.xlu1 %1539 }
 0x34d   : > { %v1550_v45 = vpop.permute.xlu0 %1549 }
 0x34f   : > { %v7417_v20 = vpop.permute.xlu1 %1563 }
 0x350   : > { %10353 = vst [vmem:[#allocation25_spill] sm:$0xff] %v7417_v20  ;;  %v1305_v20 = vsel %vm420_vm4, %v1253_v35, %v1255_v48  ;;  %v1587_v48 = vsel %vm480_vm13, %v7399_v0, %v7381_v61  ;;  %v6259_v35 = vld [vmem:[%s10276_s2 + $0x44] ss:$8 sps:$4 sm:$0xff]   ;;  %v1584_v61 = vsel %vm480_vm13, %v7379_v49, %v7369_v2 }
 0x351   : > { %v7419_v31 = vpop.permute.xlu0 %1573 }
 0x353   : > { %v1267_v62 = vpop.permute.xlu1 %1266 }
 0x354   : > { %v1310_v12 = vsel %vm420_vm4, %v1267_v62, %v1269_v6  ;;  %v1304_v6 = vsel %vm420_vm4, %v7348_v37, %v7345_v41  ;;  %v1299_v41 = vsel %vm420_vm4, %v7254_v19, %v7245_v39  ;;  %v1295_v19 = vsel %vm420_vm4, %v7180_v60, %v7170_v52 }
 0x355   : > { %v1265_v54 = vpop.permute.xlu0 %1264  ;;  %1350 = vmatprep.subr.bf16.mxu0 %v1310_v12  ;;  %v1302_v12 = vsel %vm420_vm4, %v7336_v63, %v7326_v40  ;;  %v1298_v40 = vsel %vm420_vm4, %v7216_v21, %v7213_v25  ;;  %v1315_v21 = vsel %vm420_vm4, %v1283_v59, %v1285_v27  ;;  %v1311_v59 = vsel %vm420_vm4, %v7375_v46, %v7365_v17  ;;  %v6255_v46 = vld [vmem:[%s10276_s2 + $0x30] ss:$8 sps:$4 sm:$0xff]  }
 0x356   : > { %v1309_v4 = vsel %vm420_vm4, %v1265_v54, %v1267_v62  ;;  %v1303_v54 = vsel %vm420_vm4, %v1247_v42, %v7348_v37  ;;  %v6245_v42 = vld [vmem:[%s10276_s2 + $0x20] ss:$8 sps:$4 sm:$0xff]   ;;  %v10361_v27 = vld [vmem:[#allocation20_spill] sm:$0xff] }
 0x357   : > { %1351 = vmatpush1.bf16.msra.mxu0 %v1309_v4  ;;  %v1291_v63 = vpop.permute.xlu1 %1290 }
 0x358   : > { %1352 = vmatprep.subr.bf16.mxu0 %v1308_v53  ;;  %v1318_v25 = vsel %vm420_vm4, %v1291_v63, %v1293_v51  ;;  %v1312_v51 = vsel %vm420_vm4, %v7365_v17, %v7362_v29  ;;  %v1589_v17 = vsel %vm480_vm13, %v7409_v36, %v7407_v44  ;;  %v1592_v44 = vsel %vm480_vm13, %v10361_v27, %v10360_v22  ;;  %v10367_v22 = vld [vmem:[#allocation6_spill] sm:$0xff] }
 0x35b   : > { %1353 = vmatpush1.bf16.msra.mxu0 %v1307_v34  ;;  %v1548_v60 = vpop.permute.xlu1 %1547  ;;  %v6251_v34 = vld [vmem:[%s10276_s2 + $0x34] ss:$8 sps:$4 sm:$0xff]  }
 0x35c   : > { %1354 = vmatprep.subr.bf16.mxu0 %v1306_v13  ;;  %v1591_v62 = vsel %vm480_vm13, %v1548_v60, %v1550_v45  ;;  %v1588_v45 = vsel %vm480_vm13, %v7415_v30, %v7409_v36  ;;  %v1585_v30 = vsel %vm480_vm13, %v7369_v2, %v7367_v23  ;;  %v1581_v23 = vsel %vm480_vm13, %v7251_v50, %v7268_v26  ;;  %v6257_v36 = vld [vmem:[%s10276_s2 + $0x40] ss:$8 sps:$4 sm:$0xff]   ;;  %v6262_v13 = vld [vmem:[%s10276_s2 + $0x50] ss:$8 sps:$4 sm:$0xff]  }
 0x35d   : > { %v1580_v2 = vsel %vm480_vm13, %v7262_v14, %v7251_v50  ;;  %v1577_v26 = vsel %vm480_vm13, %v7176_v58, %v7201_v5  ;;  %v1576_v50 = vsel %vm480_vm13, %v7190_v57, %v7176_v58  ;;  %v10355_v5 = vld [vmem:[#allocation25_spill] sm:$0xff]  ;;  %v10357_v57 = vld [vmem:[#allocation22_spill] sm:$0xff] }
 0x35e   : > { %v10356_v58 = vld [vmem:[#allocation21_spill] sm:$0xff] }
 0x35f   : > { %1355 = vmatpush1.bf16.msra.mxu0 %v1305_v20  ;;  %v1300_v20 = vsel %vm420_vm4, %v7245_v39, %v7258_v24  ;;  %v1296_v24 = vsel %vm420_vm4, %v7170_v52, %v7185_v3  ;;  %v1289_v39 = vpop.permute.xlu0 %1288  ;;  %v1314_v3 = vsel %vm420_vm4, %v7391_v1, %v7377_v18  ;;  %v1313_v52 = vsel %vm420_vm4, %v7396_v55, %v7391_v1 }
 0x360   : > { %1356 = vmatprep.subr.bf16.mxu0 %v1304_v6  ;;  %v1317_v37 = vsel %vm420_vm4, %v1289_v39, %v1291_v63  ;;  %v1586_v1 = vsel %vm480_vm13, %v7401_v28, %v7399_v0  ;;  %v1583_v55 = vsel %vm480_vm13, %v7340_v56, %v7342_v43  ;;  %v1582_v0 = vsel %vm480_vm13, %v7338_v15, %v7340_v56  ;;  %v1572_v56 = vpop.permute.xlu1 %1571 }
 0x361   : > { %v1579_v43 = vsel %vm480_vm13, %v7224_v8, %v7231_v9  ;;  %v1578_v15 = vsel %vm480_vm13, %v7220_v16, %v7224_v8  ;;  %v1599_v9 = vsel %vm480_vm13, %v1572_v56, %v7419_v31  ;;  %v10354_v16 = vld [vmem:[#allocation24_spill] sm:$0xff]  ;;  %v1595_v53 = vsel %vm480_vm13, %v10357_v57, %v10356_v58  ;;  %v10358_v31 = vld [vmem:[#allocation23_spill] sm:$0xff] }
 0x362   : > { %v1597_v8 = vsel %vm480_vm13, %v10354_v16, %v7411_v11  ;;  %v1596_v28 = vsel %vm480_vm13, %v10355_v5, %v10354_v16  ;;  %v1594_v4 = vsel %vm480_vm13, %v10358_v31, %v10357_v57  ;;  %v6260_v11 = vld [vmem:[%s10276_s2 + $0x54] ss:$8 sps:$4 sm:$0xff]  }
 0x363   : > { %1357 = vmatpush1.bf16.msra.mxu0 %v1303_v54  ;;  %v1546_v18 = vpop.permute.xlu0 %1545  ;;  %v10366_v31 = vld [vmem:[#allocation11_spill] sm:$0xff] }
 0x364   : > { %1358 = vmatprep.subr.bf16.mxu0 %v1302_v12  ;;  %v1590_v29 = vsel %vm480_vm13, %v1546_v18, %v1548_v60  ;;  %v6336_v60 = vld [vmem:[%s10281_s7] sm:$0x7] }
 0x367   : > { %1359 = vmatpush1.bf16.msra.mxu0 %v1301_v47  ;;  %v1570_v14 = vpop.permute.xlu0 %1569 }
 0x368   : > { %1360 = vmatprep.subr.bf16.mxu0 %v1300_v20  ;;  %v1598_v49 = vsel %vm480_vm13, %v1570_v14, %v1572_v56 }
 0x36b   : > { %1361 = vmatpush1.bf16.msra.mxu0 %v1299_v41 }
 0x36c   : > { %1362 = vmatprep.subr.bf16.mxu0 %v1298_v40 }
 0x36f   : > { %1363 = vmatpush1.bf16.msra.mxu0 %v1297_v7 }
 0x370   : > { %1364 = vmatprep.subr.bf16.mxu0 %v1296_v24 }
 0x373   : > { %1365 = vmatpush1.bf16.msra.mxu0 %v1295_v19 }
 0x374   : > { %1374 = vmatprep.subr.bf16.mxu0 %v1318_v25 }
 0x377   : > { %1375 = vmatpush2.bf16.msra.mxu0 %v1317_v37  ;;  %v1732_v37 = vstv %s1731_s18  ;;  %s6416_s18 = smov 88  }
 0x378   : > { %1376 = vmatprep.subr.bf16.mxu0 %v1316_v38  ;;  %v1735_v38 = vstv %s1734_s28  ;;  %vm1733_vm6 = vcmp.ge.s32.totalorder %v6336_v60, %v1732_v37 }
 0x379   : > { %vm1736_vm8 = vcmp.lt.s32.totalorder %v6336_v60, %v1735_v38 }
 0x37a   : > { %vm1737_vm9 = vmand %vm1733_vm6, %vm1736_vm8 }
 0x37b   : > { %1377 = vmatpush2.bf16.msra.mxu0 %v1315_v21 }
 0x37c   : > { %1378 = vmatprep.subr.bf16.mxu0 %v1314_v3 }
 0x37f   : > { %1379 = vmatpush2.bf16.msra.mxu0 %v1313_v52 }
 0x380   : > { %1380 = vmatprep.subr.bf16.mxu0 %v1312_v51 }
 0x383   : > { %1381 = vmatpush2.bf16.msra.mxu0 %v1311_v59 }
 0x384   : > { %1630 = vmatprep.subr.bf16.mxu0 %v1591_v62  ;;  %v10363_v62 = vld [vmem:[#allocation8_spill] sm:$0xff] }
 0x386   : > { %1383 = vmatmul.mubr.bf16.vlgmr.msra.gmra.mxu0 %v6245_v42 }
 0x387   : > { %1631 = vmatpush1.bf16.msra.mxu0 %v1590_v29  ;;  %5817 = vmatprep.mubr.msk.bf16.mxu0 %vm1343_vm3, %v6251_v34 }
 0x388   : > { %1632 = vmatprep.subr.bf16.mxu0 %v1589_v17 }
 0x38b   : > { %1633 = vmatpush1.bf16.msra.mxu0 %v1588_v45  ;;  %v6337_v45 = vld [vmem:[%s10282_s8] sm:$0x7] }
 0x38c   : > { %1634 = vmatprep.subr.bf16.mxu0 %v1587_v48  ;;  %vm1738_vm10 = vcmp.ge.s32.totalorder %v6337_v45, 1  ;;  %vm1740_vm11 = vcmp.lt.s32.totalorder %v6337_v45, 17 }
 0x38d   : > { %vm1739_vm12 = vmand %vm1737_vm9, %vm1738_vm10 }
 0x38e   : > { %1393 = vmatmul.mubr.bf16.gmra.mxu0 %v6255_v46  ;;  %vm1741_vm14 = vmand %vm1739_vm12, %vm1740_vm11 }
 0x38f   : > { %1635 = vmatpush1.bf16.msra.mxu0 %v1586_v1  ;;  %5856 = vmatprep.mubr.msk.bf16.mxu0 %vm1343_vm3, %v6259_v35  ;;  %v1742_v58 = vsel %vm1741_vm14, 1, %v10362_v10 }
 0x390   : > { %1636 = vmatprep.subr.bf16.mxu0 %v1585_v30 }
 0x393   : > { %1637 = vmatpush1.bf16.msra.mxu0 %v1584_v61 }
 0x394   : > { %1638 = vmatprep.subr.bf16.mxu0 %v1583_v55  ;;  %v10364_v55 = vld [vmem:[#allocation9_spill] sm:$0xff] }
 0x397   : > { %1639 = vmatpush1.bf16.msra.mxu0 %v1582_v0 }
 0x398   : > { %1640 = vmatprep.subr.bf16.mxu0 %v1581_v23 }
 0x39b   : > { %1641 = vmatpush1.bf16.msra.mxu0 %v1580_v2 }
 0x39c   : > { %1642 = vmatprep.subr.bf16.mxu0 %v1579_v43 }
 0x39f   : > { %1643 = vmatpush1.bf16.msra.mxu0 %v1578_v15 }
 0x3a0   : > { %1644 = vmatprep.subr.bf16.mxu0 %v1577_v26 }
 0x3a3   : > { %1645 = vmatpush1.bf16.msra.mxu0 %v1576_v50 }
 0x3a4   : > { %1654 = vmatprep.subr.bf16.mxu0 %v1599_v9 }
 0x3a7   : > { %1655 = vmatpush2.bf16.msra.mxu0 %v1598_v49  ;;  %v10365_v49 = vld [vmem:[#allocation10_spill] sm:$0xff] }
 0x3a8   : > { %1656 = vmatprep.subr.bf16.mxu0 %v1597_v8 }
 0x3ab   : > { %1657 = vmatpush2.bf16.msra.mxu0 %v1596_v28 }
 0x3ac   : > { %1658 = vmatprep.subr.bf16.mxu0 %v1595_v53 }
 0x3af   : > { %1659 = vmatpush2.bf16.msra.mxu0 %v1594_v4 }
 0x3b0   : > { %1660 = vmatprep.subr.bf16.mxu0 %v1593_v33  ;;  %v1746_v33 = vrot.slane %v1742_v58, %v10367_v22 }
 0x3b2   : > { %vm7583_vm15 = vcmp.eq.s32.totalorder %v1746_v33, 1 }
 0x3b3   : > { %1661 = vmatpush2.bf16.msra.mxu0 %v1592_v44  ;;  %v10368_v44 = vld [vmem:[#allocation7_spill] sm:$0xff] }
 0x3b6   : > { %1663 = vmatmul.mubr.bf16.vlgmr.msra.gmra.mxu0 %v6257_v36  ;;  %v1750_v36 = vrot.slane %v1742_v58, %v10368_v44 }
 0x3b7   : > { %5857 = vmatprep.mubr.msk.bf16.mxu0 %vm1343_vm3, %v6260_v11 }
 0x3b8   : > { %vm7591_vm0 = vcmp.eq.s32.totalorder %v1750_v36, 1 }
 0x3be   : > { %1673 = vmatmul.mubr.bf16.gmra.mxu0 %v6262_v13  ;;  %v6268_v13 = vld [vmem:[%s10277_s3 + $0x8] sm:$0xff]  }
 0x3bf   : > { %2132 = vmatprep.mubr.bf16.mxu0 %v10362_v10 }
 0x3ca   : > { %v1461_v47 = vpop.f32.mrf.mxu1 }
 0x3cc   : > { %v1463_v40 = vpop.f32.mrf.mxu1 }
 0x3ce   : > { %v1465_v24 = vpop.f32.mrf.mxu1 }
 0x3d0   : > { %v1467_v19 = vpop.f32.mrf.mxu1 }
 0x3d2   : > { %v1471_v39 = vpop.f32.mrf.mxu1 }
 0x3d4   : > { %v1473_v59 = vpop.f32.mrf.mxu1 }
 0x3d6   : > { %v1475_v1 = vpop.f32.mrf.mxu1 }
 0x3d8   : > { %v1477_v56 = vpop.f32.mrf.mxu1 }
 0x446   : > { %v1384_v6 = vpop.f32.mrf.mxu0 }
 0x447   : > { %v1462_v21 = vadd.f32 %v1461_v47, %v1384_v6 }
 0x448   : > { %v1386_v54 = vpop.f32.mrf.mxu0 }
 0x449   : > { %v1464_v52 = vadd.f32 %v1463_v40, %v1386_v54 }
 0x44a   : > { %v1388_v12 = vpop.f32.mrf.mxu0 }
 0x44b   : > { %v1466_v18 = vadd.f32 %v1465_v24, %v1388_v12  ;;  %v6267_v12 = vld [vmem:[%s10277_s3] sm:$0xff]  }
 0x44c   : > { %v1390_v20 = vpop.f32.mrf.mxu0 }
 0x44d   : > { %v1468_v46 = vadd.f32 %v1467_v19, %v1390_v20 }
 0x44e   : > { %v1394_v41 = vpop.f32.mrf.mxu0 }
 0x44f   : > { %v1472_v61 = vadd.f32 %v1471_v39, %v1394_v41 }
 0x450   : > { %v1396_v7 = vpop.f32.mrf.mxu0 }
 0x451   : > { %v1474_v43 = vadd.f32 %v1473_v59, %v1396_v7 }
 0x452   : > { %v1398_v63 = vpop.f32.mrf.mxu0 }
 0x453   : > { %v1476_v14 = vadd.f32 %v1475_v1, %v1398_v63 }
 0x454   : > { %v1400_v25 = vpop.f32.mrf.mxu0 }
 0x455   : > { %v1478_v5 = vadd.f32 %v1477_v56, %v1400_v25 }
 0x476   : > { %v1664_v3 = vpop.f32.mrf.mxu0 }
 0x477   : > { %v1683_v51 = vadd.f32 %v1664_v3, %v1462_v21 }
 0x478   : > { %v1666_v42 = vpop.f32.mrf.mxu0 }
 0x479   : > { %v1715_v34 = vadd.f32 %v10363_v62, %v1683_v51  ;;  %v1684_v29 = vadd.f32 %v1666_v42, %v1464_v52 }
 0x47a   : > { %v1668_v17 = vpop.f32.mrf.mxu0 }
 0x47b   : > { %v1716_v48 = vadd.f32 %v10363_v62, %v1684_v29  ;;  %v1685_v35 = vadd.f32 %v1668_v17, %v1466_v18  ;;  %6320 = vtanh.f32 %v1715_v34 }
 0x47c   : > { %v1670_v30 = vpop.f32.mrf.mxu0 }
 0x47d   : > { %v1717_v0 = vadd.f32 %v10364_v55, %v1685_v35  ;;  %v1686_v23 = vadd.f32 %v1670_v30, %v1468_v46  ;;  %6322 = vtanh.f32 %v1716_v48 }
 0x47e   : > { %v1674_v2 = vpop.f32.mrf.mxu0 }
 0x47f   : > { %6324 = vtanh.f32 %v1717_v0  ;;  %v1718_v15 = vadd.f32 %v10364_v55, %v1686_v23  ;;  %v1687_v26 = vadd.f32 %v1674_v2, %v1472_v61 }
 0x480   : > { %v1676_v50 = vpop.f32.mrf.mxu0 }
 0x481   : > { %6326 = vtanh.f32 %v1718_v15  ;;  %v1688_v9 = vadd.f32 %v1676_v50, %v1474_v43  ;;  %v1719_v16 = vadd.f32 %v10365_v49, %v1687_v26 }
 0x482   : > { %v1678_v8 = vpop.f32.mrf.mxu0 }
 0x483   : > { %v1689_v28 = vadd.f32 %v1678_v8, %v1476_v14  ;;  %v1720_v57 = vadd.f32 %v10365_v49, %v1688_v9  ;;  %6328 = vtanh.f32 %v1719_v16 }
 0x484   : > { %v1680_v53 = vpop.f32.mrf.mxu0 }
 0x485   : > { %v1721_v4 = vadd.f32 %v10366_v31, %v1689_v28  ;;  %v1690_v32 = vadd.f32 %v1680_v53, %v1478_v5 }
 0x487   : > { %6330 = vtanh.f32 %v1721_v4  ;;  %v1722_v27 = vadd.f32 %v10366_v31, %v1690_v32 }
 0x488   : > { %6332 = vtanh.f32 %v1720_v57  ;;  %v7581_v11 = vpop.eup %6320 }
 0x489   : > { %6334 = vtanh.f32 %v1722_v27  ;;  %v1753_v47 = vsel %vm7583_vm15, %v7581_v11, 0.0 }
 0x48a   : > { %v7587_v6 = vpop.eup %6322 }
 0x48b   : > { %v1754_v24 = vsel %vm7591_vm0, %v7587_v6, 0.0 }
 0x48c   : > { %v7589_v54 = vpop.eup %6324 }
 0x48d   : > { %v1755_v20 = vsel %vm7583_vm15, %v7589_v54, 0.0  ;;  %v5883_v41 = vpack.c.bf16 %v7589_v54, %v7581_v11  ;;  %v6269_v11 = vld [vmem:[%s10277_s3 + $0x10] sm:$0xff]   ;;  %v6271_v54 = vld [vmem:[%s10277_s3 + $0x40] sm:$0xff]  }
 0x48e   : > { %v7603_v40 = vpop.eup %6326  ;;  %v1761_v7 = vpack.c.bf16 %v1755_v20, %v1753_v47 }
 0x48f   : > { %v1756_v63 = vsel %vm7591_vm0, %v7603_v40, 0.0  ;;  %v5880_v19 = vpack.c.bf16 %v7603_v40, %v7587_v6  ;;  %v6270_v6 = vld [vmem:[%s10277_s3 + $0x38] sm:$0xff]  }
 0x490   : > { %1769 = vrot.lane.b32.xlu1 %v1761_v7, %s6401_s27  ;;  %v1762_v39 = vpack.c.bf16 %v1756_v63, %v1754_v24  ;;  %v7615_v25 = vpop.eup %6328 }
 0x491   : > { %v1757_v60 = vsel %vm7583_vm15, %v7615_v25, 0.0 }
 0x492   : > { %1771 = vrot.lane.b32.xlu0 %v1762_v39, %s6401_s27 }
 0x494   : > { %v7617_v37 = vpop.eup %6330  ;;  %1783 = vrot.lane.b32.xlu1 %v1761_v7, %s6400_s26 }
 0x495   : > { %v7620_v38 = vpop.eup %6332  ;;  %v5877_v21 = vpack.c.bf16 %v7617_v37, %v7615_v25  ;;  %v1759_v51 = vsel %vm7583_vm15, %v7617_v37, 0.0 }
 0x496   : > { %v7624_v3 = vpop.eup %6334  ;;  %1785 = vrot.lane.b32.xlu0 %v1762_v39, %s6400_s26  ;;  %v1763_v42 = vpack.c.bf16 %v1759_v51, %v1757_v60  ;;  %v1758_v18 = vsel %vm7591_vm0, %v7620_v38, 0.0 }
 0x497   : > { %v5874_v52 = vpack.c.bf16 %v7624_v3, %v7620_v38  ;;  %v1760_v59 = vsel %vm7591_vm0, %v7624_v3, 0.0 }
 0x498   : > { %1825 = vrot.lane.b32.xlu1 %v1761_v7, %s10323_s16  ;;  %v1764_v62 = vpack.c.bf16 %v1760_v59, %v1758_v18 }
 0x49a   : > { %1827 = vrot.lane.b32.xlu0 %v1762_v39, %s10323_s16 }
 0x49c   : > { %2049 = vrot.lane.b32.xlu1 %v1761_v7, %s10324_s17 }
 0x49e   : > { %2051 = vrot.lane.b32.xlu0 %v1762_v39, %s10324_s17 }
 0x4a0   : > { %1773 = vrot.lane.b32.xlu1 %v1763_v42, %s6401_s27 }
 0x4a2   : > { %1775 = vrot.lane.b32.xlu0 %v1764_v62, %s6401_s27  ;;  %s6413_s27 = smov 32  }
 0x4a4   : > { %1787 = vrot.lane.b32.xlu1 %v1763_v42, %s6400_s26 }
 0x4a6   : > { %1789 = vrot.lane.b32.xlu0 %v1764_v62, %s6400_s26  ;;  %s10376_s26 = smov 56  }
 0x4a8   : > { %1829 = vrot.lane.b32.xlu1 %v1763_v42, %s10323_s16 }
 0x4aa   : > { %1831 = vrot.lane.b32.xlu0 %v1764_v62, %s10323_s16 }
 0x4ac   : > { %2053 = vrot.lane.b32.xlu1 %v1763_v42, %s10324_s17 }
 0x4ae   : > { %2055 = vrot.lane.b32.xlu0 %v1764_v62, %s10324_s17  ;;  %v6263_v62 = vld [vmem:[%s10277_s3 + $0x18] sm:$0xff]  }
 0x502   : > { %v1770_v34 = vpop.permute.xlu1 %1769 }
 0x504   : > { %v7653_v29 = vpop.permute.xlu0 %1771 }
 0x505   : > { %1835 = vrot.lane.b32.xlu0 %v7653_v29, %s10323_s16  ;;  %v7659_v17 = vsel %vm372_vm7, %v1770_v34, %v7653_v29 }
 0x506   : > { %v1784_v45 = vpop.permute.xlu1 %1783  ;;  %1833 = vrot.lane.b32.xlu1 %v7659_v17, %s10323_s16 }
 0x508   : > { %v7663_v46 = vpop.permute.xlu0 %1785 }
 0x509   : > { %1843 = vrot.lane.b32.xlu0 %v7663_v46, %s10323_s16  ;;  %v7669_v48 = vsel %vm384_vm5, %v1784_v45, %v7663_v46 }
 0x50a   : > { %v7671_v35 = vpop.permute.xlu1 %1825  ;;  %1841 = vrot.lane.b32.xlu1 %v7669_v48, %s10323_s16 }
 0x50c   : > { %v7675_v1 = vpop.permute.xlu0 %1827 }
 0x50d   : > { %2059 = vrot.lane.b32.xlu0 %v7653_v29, %s10324_s17  ;;  %v1849_v18 = vsel %vm420_vm4, %v7671_v35, %v7675_v1  ;;  %v6264_v35 = vld [vmem:[%s10277_s3 + $0x20] sm:$0xff]  }
 0x50e   : > { %v7679_v30 = vpop.permute.xlu1 %2049  ;;  %2057 = vrot.lane.b32.xlu1 %v7659_v17, %s10324_s17 }
 0x510   : > { %v7683_v61 = vpop.permute.xlu0 %2051 }
 0x511   : > { %2067 = vrot.lane.b32.xlu0 %v7663_v46, %s10324_s17  ;;  %v2073_v45 = vsel %vm480_vm13, %v7679_v30, %v7683_v61 }
 0x512   : > { %2065 = vrot.lane.b32.xlu1 %v7669_v48, %s10324_s17  ;;  %v1774_v55 = vpop.permute.xlu1 %1773 }
 0x514   : > { %v7689_v0 = vpop.permute.xlu0 %1775 }
 0x515   : > { %1839 = vrot.lane.b32.xlu0 %v7689_v0, %s10323_s16  ;;  %v7695_v23 = vsel %vm372_vm7, %v1774_v55, %v7689_v0  ;;  %vm5876_vm7 = vmpackc.low %vm7583_vm15, %vm7583_vm15 }
 0x516   : > { %1837 = vrot.lane.b32.xlu1 %v7695_v23, %s10323_s16  ;;  %v1788_v2 = vpop.permute.xlu1 %1787 }
 0x518   : > { %v1790_v43 = vpop.permute.xlu0 %1789 }
 0x519   : > { %1847 = vrot.lane.b32.xlu0 %v1790_v43, %s10323_s16  ;;  %v7701_v15 = vsel %vm384_vm5, %v1788_v2, %v1790_v43  ;;  %vm1867_vm5 = vcmask 785408  }
 0x51a   : > { %1845 = vrot.lane.b32.xlu1 %v7701_v15, %s10323_s16  ;;  %v1830_v56 = vpop.permute.xlu1 %1829 }
 0x51c   : > { %v1832_v26 = vpop.permute.xlu0 %1831 }
 0x51d   : > { %2063 = vrot.lane.b32.xlu0 %v7689_v0, %s10324_s17  ;;  %v1850_v59 = vsel %vm420_vm4, %v1830_v56, %v1832_v26 }
 0x51e   : > { %2061 = vrot.lane.b32.xlu1 %v7695_v23, %s10324_s17  ;;  %v2054_v14 = vpop.permute.xlu1 %2053 }
 0x520   : > { %v7712_v50 = vpop.permute.xlu0 %2055 }
 0x521   : > { %2071 = vrot.lane.b32.xlu0 %v1790_v43, %s10324_s17  ;;  %v2074_v34 = vsel %vm480_vm13, %v2054_v14, %v7712_v50  ;;  %v10374_v14 = vld [vmem:[#allocation12_spill] sm:$0xff] }
 0x522   : > { %2069 = vrot.lane.b32.xlu1 %v7701_v15, %s10324_s17 }
 0x577   : > { %v1836_v9 = vpop.permute.xlu0 %1835 }
 0x578   : > { %v1834_v49 = vpop.permute.xlu1 %1833 }
 0x579   : > { %v1851_v39 = vsel %vm420_vm4, %v1834_v49, %v1836_v9 }
 0x57b   : > { %v1844_v16 = vpop.permute.xlu0 %1843 }
 0x57c   : > { %v1842_v8 = vpop.permute.xlu1 %1841 }
 0x57d   : > { %v1853_v47 = vsel %vm420_vm4, %v1842_v8, %v1844_v16 }
 0x57f   : > { %v7714_v5 = vpop.permute.xlu0 %2059 }
 0x580   : > { %v2058_v28 = vpop.permute.xlu1 %2057 }
 0x581   : > { %v2075_v42 = vsel %vm480_vm13, %v2058_v28, %v7714_v5 }
 0x583   : > { %v7716_v58 = vpop.permute.xlu0 %2067 }
 0x584   : > { %v2066_v57 = vpop.permute.xlu1 %2065 }
 0x585   : > { %v2077_v51 = vsel %vm480_vm13, %v2066_v57, %v7716_v58 }
 0x587   : > { %v1840_v53 = vpop.permute.xlu0 %1839 }
 0x588   : > { %v1838_v31 = vpop.permute.xlu1 %1837 }
 0x589   : > { %v1852_v24 = vsel %vm420_vm4, %v1838_v31, %v1840_v53 }
 0x58b   : > { %v1848_v4 = vpop.permute.xlu0 %1847 }
 0x58c   : > { %v1846_v32 = vpop.permute.xlu1 %1845  ;;  %1881 = vmatprep.subr.bf16.mxu1 %v1848_v4 }
 0x58d   : > { %v1854_v33 = vsel %vm420_vm4, %v1846_v32, %v1848_v4  ;;  %vm5873_vm4 = vmpackc.low %vm7591_vm0, %vm7591_vm0 }
 0x58e   : > { %1882 = vmatpush1.bf16.msra.mxu1 %v1854_v33 }
 0x58f   : > { %1883 = vmatprep.subr.bf16.mxu1 %v1844_v16  ;;  %v7719_v27 = vpop.permute.xlu0 %2063 }
 0x590   : > { %v2062_v36 = vpop.permute.xlu1 %2061 }
 0x591   : > { %v2076_v60 = vsel %vm480_vm13, %v2062_v36, %v7719_v27  ;;  %v10375_v36 = vld [vmem:[#allocation13_spill] sm:$0xff] }
 0x592   : > { %1884 = vmatpush1.bf16.msra.mxu1 %v1853_v47 }
 0x593   : > { %1885 = vmatprep.subr.bf16.mxu1 %v1840_v53  ;;  %v2072_v20 = vpop.permute.xlu0 %2071 }
 0x594   : > { %v2070_v7 = vpop.permute.xlu1 %2069  ;;  %2104 = vmatprep.subr.bf16.mxu0 %v2072_v20 }
 0x595   : > { %v2078_v63 = vsel %vm480_vm13, %v2070_v7, %v2072_v20  ;;  %vm2571_vm13 = vcmask 122880  }
 0x596   : > { %1886 = vmatpush1.bf16.msra.mxu1 %v1852_v24  ;;  %2105 = vmatpush1.bf16.msra.mxu0 %v2078_v63 }
 0x597   : > { %1887 = vmatprep.subr.bf16.mxu1 %v1836_v9  ;;  %2106 = vmatprep.subr.bf16.mxu0 %v7716_v58 }
 0x59a   : > { %1888 = vmatpush1.bf16.msra.mxu1 %v1851_v39  ;;  %2107 = vmatpush1.bf16.msra.mxu0 %v2077_v51 }
 0x59b   : > { %1889 = vmatprep.subr.bf16.mxu1 %v1832_v26  ;;  %2108 = vmatprep.subr.bf16.mxu0 %v7719_v27  ;;  %v10373_v26 = vld [vmem:[#allocation5_spill] sm:$0xff] }
 0x59e   : > { %1890 = vmatpush1.bf16.msra.mxu1 %v1850_v59  ;;  %2109 = vmatpush1.bf16.msra.mxu0 %v2076_v60 }
 0x59f   : > { %1891 = vmatprep.subr.bf16.mxu1 %v7675_v1  ;;  %2110 = vmatprep.subr.bf16.mxu0 %v7714_v5  ;;  %v6266_v1 = vld [vmem:[%s10277_s3 + $0x30] sm:$0xff]  }
 0x5a2   : > { %1892 = vmatpush1.bf16.msra.mxu1 %v1849_v18  ;;  %2111 = vmatpush1.bf16.msra.mxu0 %v2075_v42 }
 0x5a3   : > { %1968 = vmatprep.subr.bf16.mxu1 %v1790_v43  ;;  %2112 = vmatprep.subr.bf16.mxu0 %v7712_v50 }
 0x5a5   : > { %5867 = vmatmul.mubr.msk.bf16.vlgmr.msra.gmra.mxu1 %vm1867_vm5, %v6263_v62 }
 0x5a6   : > { %1969 = vmatpush1.bf16.msra.mxu1 %v7701_v15  ;;  %2113 = vmatpush1.bf16.msra.mxu0 %v2074_v34 }
 0x5a7   : > { %1970 = vmatprep.subr.bf16.mxu1 %v7663_v46  ;;  %2114 = vmatprep.subr.bf16.mxu0 %v7683_v61  ;;  %v6265_v46 = vld [vmem:[%s10277_s3 + $0x28] sm:$0xff]  }
 0x5a8   : > { %1919 = vmatprep.mubr.bf16.mxu1 %v10362_v10 }
 0x5aa   : > { %1971 = vmatpush1.bf16.msra.mxu1 %v7669_v48  ;;  %2115 = vmatpush1.bf16.msra.mxu0 %v2073_v45 }
 0x5ab   : > { %1972 = vmatprep.subr.bf16.mxu1 %v7689_v0 }
 0x5ad   : > { %5868 = vmatmul.mubr.msk.bf16.gmra.mxu1 %vm1867_vm5, %v6264_v35  ;;  %5897 = vmatmul.mubr.msk.bf16.vlgmr.msra.gmra.mxu0 %vm1867_vm5, %v6266_v1 }
 0x5ae   : > { %1973 = vmatpush1.bf16.msra.mxu1 %v7695_v23  ;;  %1929 = vmatprep.mubr.bf16.mxu1 %v10362_v10 }
 0x5af   : > { %1974 = vmatprep.subr.bf16.mxu1 %v7653_v29  ;;  %v6412_v29 = vmov 1966171168  }
 0x5b2   : > { %1975 = vmatpush1.bf16.msra.mxu1 %v7659_v17  ;;  %v2231_v17 = vunpack.c.l.s4 %v6412_v29 }
 0x5b3   : > { %5875 = vmatprep.subr.msk.bf16.mxu1 %vm5873_vm4, %v5874_v52 }
 0x5b4   : > { %v2232_v55 = vunpack.c.0.s8 %v2231_v17 }
 0x5b5   : > { %5869 = vmatmul.mubr.msk.bf16.gmra.mxu1 %vm1867_vm5, %v6265_v46 }
 0x5b6   : > { %5878 = vmatpush1.bf16.msk.msra.mxu1 %vm5876_vm7, %v5877_v21  ;;  %1996 = vmatprep.mubr.bf16.mxu1 %v10362_v10  ;;  %v7837_v56 = vsub.s32 %v2232_v55, %v10373_v26 }
 0x5b7   : > { %5881 = vmatprep.subr.msk.bf16.mxu1 %vm5873_vm4, %v5880_v19 }
 0x5ba   : > { %5884 = vmatpush1.bf16.msk.msra.mxu1 %vm5876_vm7, %v5883_v41 }
 0x5bb   : > { %5903 = vmatprep.subr.bf16.mxu1 %v2072_v20 }
 0x5bd   : > { %5885 = vmatmul.mubr.msk.bf16.vlgmr.msra.gmra.mxu1 %vm1867_vm5, %v6267_v12 }
 0x5be   : > { %5909 = vmatpush1.bf16.msra.mxu1 %v2078_v63  ;;  %2006 = vmatprep.mubr.bf16.mxu1 %v10362_v10 }
 0x5bf   : > { %5904 = vmatprep.subr.bf16.mxu1 %v7716_v58 }
 0x5c2   : > { %5910 = vmatpush1.bf16.msra.mxu1 %v2077_v51 }
 0x5c3   : > { %5905 = vmatprep.subr.bf16.mxu1 %v7719_v27 }
 0x5c5   : > { %5886 = vmatmul.mubr.msk.bf16.gmra.mxu1 %vm1867_vm5, %v6268_v13 }
 0x5c6   : > { %5911 = vmatpush1.bf16.msra.mxu1 %v2076_v60  ;;  %2016 = vmatprep.mubr.bf16.mxu1 %v10362_v10 }
 0x5c7   : > { %5906 = vmatprep.subr.bf16.mxu1 %v7714_v5 }
 0x5ca   : > { %5912 = vmatpush1.bf16.msra.mxu1 %v2075_v42 }
 0x5cb   : > { %5907 = vmatprep.subr.bf16.mxu1 %v7712_v50 }
 0x5cd   : > { %5887 = vmatmul.mubr.msk.bf16.gmra.mxu1 %vm1867_vm5, %v6269_v11 }
 0x5ce   : > { %5913 = vmatpush1.bf16.msra.mxu1 %v2074_v34  ;;  %2142 = vmatprep.mubr.bf16.mxu1 %v10362_v10 }
 0x5cf   : > { %5908 = vmatprep.subr.bf16.mxu1 %v7683_v61 }
 0x5d2   : > { %5914 = vmatpush1.bf16.msra.mxu1 %v2073_v45 }
 0x5d5   : > { %5898 = vmatmul.mubr.msk.bf16.vlgmr.msra.gmra.mxu1 %vm1867_vm5, %v6270_v6 }
 0x5d6   : > { %2152 = vmatprep.mubr.bf16.mxu1 %v10362_v10 }
 0x5dd   : > { %5899 = vmatmul.mubr.msk.bf16.gmra.mxu1 %vm1867_vm5, %v6271_v54 }
 0x665   : > { %v1911_v41 = vpop.f32.mrf.mxu1 }
 0x667   : > { %v7819_v40 = vpop.f32.mrf.mxu1 }
 0x669   : > { %v1915_v19 = vpop.f32.mrf.mxu1 }
 0x66b   : > { %v1917_v25 = vpop.f32.mrf.mxu1 }
 0x66d   : > { %v7821_v37 = vpop.f32.mrf.mxu1  ;;  %v2134_v30 = vpop.f32.mrf.mxu0 }
 0x66f   : > { %v1923_v38 = vpop.f32.mrf.mxu1  ;;  %v7831_v23 = vpop.f32.mrf.mxu0 }
 0x671   : > { %v7823_v21 = vpop.f32.mrf.mxu1  ;;  %v2138_v49 = vpop.f32.mrf.mxu0 }
 0x673   : > { %v1927_v3 = vpop.f32.mrf.mxu1  ;;  %v2140_v31 = vpop.f32.mrf.mxu0 }
 0x675   : > { %v7825_v52 = vpop.f32.mrf.mxu1 }
 0x677   : > { %v1933_v10 = vpop.f32.mrf.mxu1 }
 0x679   : > { %v7827_v48 = vpop.f32.mrf.mxu1 }
 0x67b   : > { %v7829_v61 = vpop.f32.mrf.mxu1 }
 0x67d   : > { %v1998_v0 = vpop.f32.mrf.mxu1 }
 0x67e   : > { %v1999_v2 = vadd.f32 %v1998_v0, %v1911_v41 }
 0x67f   : > { %v7833_v43 = vpop.f32.mrf.mxu1 }
 0x680   : > { %v2163_v15 = vadd.f32 %v2134_v30, %v1999_v2 }
 0x681   : > { %v2002_v50 = vpop.f32.mrf.mxu1 }
 0x682   : > { %v7840_v9 = vadd.f32 %v10374_v14, %v2163_v15  ;;  %v2003_v16 = vadd.f32 %v2002_v50, %v1915_v19 }
 0x683   : > { %v2004_v8 = vpop.f32.mrf.mxu1 }
 0x684   : > { %v2229_v5 = vcombine.high %v7840_v9, %v7840_v9  ;;  %v2236_v28 = vrot.slane %v7840_v9, %v7837_v56  ;;  %v2165_v58 = vadd.f32 %v2138_v49, %v2003_v16  ;;  %v2005_v57 = vadd.f32 %v2004_v8, %v1917_v25  ;;  %v10377_v16 = vld [vmem:[#allocation14_spill] sm:$0xff] }
 0x685   : > { %v2008_v53 = vpop.f32.mrf.mxu1 }
 0x686   : > { %v2166_v4 = vadd.f32 %v2140_v31, %v2005_v57  ;;  %v2252_v33 = vrot.slane %v2236_v28, %v7837_v56  ;;  %v2244_v27 = vcombine.high %v2236_v28, %v2236_v28  ;;  %v7848_v47 = vadd.f32 %v10375_v36, %v2165_v58 }
 0x687   : > { %v2010_v32 = vpop.f32.mrf.mxu1  ;;  %v2243_v7 = vrot.slane %v2229_v5, %v7837_v56  ;;  %v2009_v29 = vadd.f32 %v2008_v53, %v7821_v37 }
 0x688   : > { %v2011_v20 = vadd.f32 %v2010_v32, %v1923_v38  ;;  %v7852_v24 = vadd.f32 %v10375_v36, %v2166_v4  ;;  %v2623_v39 = vrot.slane %v2252_v33, %v10367_v22  ;;  %2572 = vst.msk [vmem:[%s7855_s30] sm:$0x1] %vm2571_vm13, %v2252_v33  ;;  %v2266_v51 = vrot.slane %v2244_v27, %v7837_v56 }
 0x689   : > { %v2012_v63 = vpop.f32.mrf.mxu1  ;;  %v2274_v60 = vcombine.high %v2252_v33, %v2252_v33  ;;  %v7861_v59 = vrot.slane %v2243_v7, %v7837_v56  ;;  %v2245_v42 = vcombine.high %v2243_v7, %v2243_v7  ;;  %v2285_v35 = vrot.slane %v7848_v47, %v7837_v56  ;;  %v10378_v7 = vld [vmem:[#allocation15_spill] sm:$0xff] }
 0x68a   : > { %2812 = vrot.lane.b32.xlu1 %v2623_v39, %s10323_s16  ;;  %v2627_v45 = vrot.slane %v2266_v51, %v10367_v22  ;;  %2573 = vst.msk [vmem:[%s7855_s30 + $0x8] sm:$0x1] %vm2571_vm13, %v2266_v51  ;;  %v2276_v46 = vcombine.high %v2266_v51, %v2266_v51  ;;  %v2278_v30 = vcombine.high %v7848_v47, %v7848_v47 }
 0x68b   : > { %v2014_v34 = vpop.f32.mrf.mxu1  ;;  %2574 = vst.msk [vmem:[%s7855_s30 + $0x10] sm:$0x1] %vm2571_vm13, %v2274_v60  ;;  %2576 = vst.msk [vmem:[%s7855_s30 + $0x20] sm:$0x1] %vm2571_vm13, %v7861_v59  ;;  %v2273_v13 = vrot.slane %v2245_v42, %v7837_v56  ;;  %v7884_v11 = vcombine.high %v7861_v59, %v7861_v59  ;;  %v7893_v41 = vrot.slane %v2285_v35, %v7837_v56 }
 0x68c   : > { %v2015_v1 = vadd.f32 %v2014_v34, %v1927_v3  ;;  %2814 = vrot.lane.b32.xlu0 %v2627_v45, %s10323_s16  ;;  %2575 = vst.msk [vmem:[%s7855_s30 + $0x18] sm:$0x1] %vm2571_vm13, %v2276_v46  ;;  %v2293_v38 = vcombine.high %v2285_v35, %v2285_v35  ;;  %v7924_v50 = vrot.slane %v2274_v60, %v10367_v22 }
 0x68d   : > { %v2018_v12 = vpop.f32.mrf.mxu1  ;;  %2577 = vst.msk [vmem:[%s7855_s30 + $0x28] sm:$0x1] %vm2571_vm13, %v2273_v13  ;;  %2578 = vst.msk [vmem:[%s7855_s30 + $0x30] sm:$0x1] %vm2571_vm13, %v7884_v11  ;;  %v7896_v25 = vcombine.high %v2273_v13, %v2273_v13  ;;  %v7919_v37 = vcombine.high %v7893_v41, %v7893_v41  ;;  %v2292_v49 = vrot.slane %v2278_v30, %v7837_v56 }
 0x68e   : > { %3004 = vrot.lane.b32.xlu1 %v2623_v39, %s10324_s17  ;;  %2580 = vst.msk [vmem:[%s7855_s30 + $0x40] sm:$0x1] %vm2571_vm13, %v7893_v41  ;;  %v2635_v58 = vrot.slane %v2276_v46, %v10367_v22  ;;  %v2019_v33 = vadd.f32 %v2018_v12, %v7825_v52  ;;  %v2643_v60 = vrot.slane %v2273_v13, %v10367_v22  ;;  %v10379_v12 = vld [vmem:[#allocation16_spill] sm:$0xff] }
 0x68f   : > { %v2020_v6 = vpop.f32.mrf.mxu1  ;;  %2579 = vst.msk [vmem:[%s7855_s30 + $0x38] sm:$0x1] %vm2571_vm13, %v7896_v25  ;;  %2582 = vst.msk [vmem:[%s7855_s30 + $0x50] sm:$0x1] %vm2571_vm13, %v7919_v37  ;;  %v7940_v57 = vrot.slane %v2292_v49, %v7837_v56  ;;  %v2294_v32 = vcombine.high %v2292_v49, %v2292_v49  ;;  %v2001_v46 = vadd.f32 %v7833_v43, %v7819_v40  ;;  %v10380_v40 = vld [vmem:[#allocation17_spill] sm:$0xff] }
 0x690   : > { %v2021_v54 = vadd.f32 %v2020_v6, %v1933_v10  ;;  %3006 = vrot.lane.b32.xlu0 %v2627_v45, %s10324_s17  ;;  %v7906_v10 = vrot.slane %v2293_v38, %v7837_v56 }
 0x691   : > { %v2022_v19 = vpop.f32.mrf.mxu1  ;;  %2584 = vst.msk [vmem:[%s7855_s30 + $0x60] sm:$0x1] %vm2571_vm13, %v7940_v57  ;;  %v7969_v42 = vrot.slane %v2294_v32, %v7837_v56  ;;  %v2164_v30 = vadd.f32 %v7831_v23, %v2001_v46  ;;  %v8015_v23 = vcombine.high %v7940_v57, %v7940_v57 }
 0x692   : > { %3196 = vrot.lane.b32.xlu1 %v2623_v39, %s10376_s26  ;;  %2581 = vst.msk [vmem:[%s7855_s30 + $0x48] sm:$0x1] %vm2571_vm13, %v7906_v10  ;;  %v7944_v53 = vcombine.high %v7906_v10, %v7906_v10  ;;  %v2023_v34 = vadd.f32 %v2022_v19, %v7827_v48 }
 0x693   : > { %v2024_v3 = vpop.f32.mrf.mxu1  ;;  %2585 = vst.msk [vmem:[%s7855_s30 + $0x68] sm:$0x1] %vm2571_vm13, %v7969_v42  ;;  %2586 = vst.msk [vmem:[%s7855_s30 + $0x70] sm:$0x1] %vm2571_vm13, %v8015_v23 }
 0x694   : > { %v2025_v17 = vadd.f32 %v2024_v3, %v7829_v61  ;;  %3198 = vrot.lane.b32.xlu0 %v2627_v45, %s10376_s26  ;;  %v2013_v61 = vadd.f32 %v2012_v63, %v7823_v21  ;;  %2583 = vst.msk [vmem:[%s7855_s30 + $0x58] sm:$0x1] %vm2571_vm13, %v7944_v53 }
 0x695   : > { %v2144_v55 = vpop.f32.mrf.mxu1 }
 0x696   : > { %v2167_v0 = vadd.f32 %v2144_v55, %v2009_v29  ;;  %3388 = vrot.lane.b32.xlu1 %v2623_v39, %s6413_s27 }
 0x697   : > { %v2146_v2 = vpop.f32.mrf.mxu1 }
 0x698   : > { %v2168_v15 = vadd.f32 %v2146_v2, %v2011_v20  ;;  %3390 = vrot.lane.b32.xlu0 %v2627_v45, %s6413_s27  ;;  %v7931_v8 = vadd.f32 %v10377_v16, %v2167_v0  ;;  %v2639_v20 = vrot.slane %v7861_v59, %v10367_v22  ;;  %v8009_v0 = vadd.f32 %v10374_v14, %v2164_v30 }
 0x699   : > { %v2148_v26 = vpop.f32.mrf.mxu1 }
 0x69a   : > { %v7934_v5 = vadd.f32 %v10377_v16, %v2168_v15  ;;  %v2169_v21 = vadd.f32 %v2148_v26, %v2013_v61  ;;  %2816 = vrot.lane.b32.xlu1 %v7924_v50, %s10323_s16  ;;  %v3586_v2 = vcombine.low %v7840_v9, %v8009_v0  ;;  %v2334_v14 = vrot.slane %v7931_v8, %v7837_v56 }
 0x69b   : > { %v2150_v28 = vpop.f32.mrf.mxu1  ;;  %v8028_v15 = vcombine.high %v7969_v42, %v7969_v42  ;;  %v4614_v61 = vrot.slane %v8009_v0, %v7837_v56  ;;  %v3587_v26 = vcombine.high %v7840_v9, %v8009_v0 }
 0x69c   : > { %v2170_v27 = vadd.f32 %v2150_v28, %v2015_v1  ;;  %2818 = vrot.lane.b32.xlu0 %v2635_v58, %s10323_s16  ;;  %v7961_v63 = vadd.f32 %v10378_v7, %v2169_v21  ;;  %v8041_v49 = vrot.slane %v3586_v2, %v7837_v56  ;;  %v8044_v16 = vrot.slane %v2334_v14, %v7837_v56 }
 0x69d   : > { %v2154_v36 = vpop.f32.mrf.mxu1  ;;  %2587 = vst.msk [vmem:[%s7855_s30 + $0x78] sm:$0x1] %vm2571_vm13, %v8028_v15  ;;  %v2327_v21 = vcombine.high %v7931_v8, %v7931_v8  ;;  %v2342_v28 = vcombine.high %v2334_v14, %v2334_v14  ;;  %v8050_v32 = vrot.slane %v4614_v61, %v7837_v56 }
 0x69e   : > { %v7964_v39 = vadd.f32 %v10378_v7, %v2170_v27  ;;  %v2171_v52 = vadd.f32 %v2154_v36, %v2019_v33  ;;  %2820 = vrot.lane.b32.xlu1 %v2639_v20, %s10323_s16  ;;  %2588 = vst.msk [vmem:[%s7855_s30 + $0x80] sm:$0x1] %vm2571_vm13, %v8044_v16  ;;  %v8058_v9 = vrot.slane %v8041_v49, %v7837_v56 }
 0x69f   : > { %v2156_v51 = vpop.f32.mrf.mxu1  ;;  %v2341_v33 = vrot.slane %v2327_v21, %v7837_v56  ;;  %v8067_v27 = vrot.slane %v2342_v28, %v7837_v56  ;;  %v4904_v36 = vrot.slane %v8050_v32, %v10367_v22  ;;  %v2376_v46 = vcombine.high %v7961_v63, %v7961_v63 }
 0x6a0   : > { %v2172_v59 = vadd.f32 %v2156_v51, %v2021_v54  ;;  %2822 = vrot.lane.b32.xlu0 %v2643_v60, %s10323_s16  ;;  %v7983_v13 = vadd.f32 %v10379_v12, %v2171_v52  ;;  %v3893_v7 = vrot.slane %v8058_v9, %v10368_v44  ;;  %v4622_v51 = vcombine.high %v4614_v61, %v4614_v61 }
 0x6a1   : > { %v2158_v1 = vpop.f32.mrf.mxu1  ;;  %2589 = vst.msk [vmem:[%s7855_s30 + $0x88] sm:$0x1] %vm2571_vm13, %v8067_v27  ;;  %v2390_v14 = vrot.slane %v2376_v46, %v7837_v56  ;;  %v2647_v61 = vrot.slane %v7884_v11, %v10367_v22  ;;  %v2655_v11 = vrot.slane %v7893_v41, %v10367_v22 }
 0x6a2   : > { %v7986_v48 = vadd.f32 %v10379_v12, %v2172_v59  ;;  %v2173_v6 = vadd.f32 %v2158_v1, %v2023_v34  ;;  %3008 = vrot.lane.b32.xlu1 %v7924_v50, %s10324_s17  ;;  %v8094_v34 = vrot.slane %v2341_v33, %v7837_v56  ;;  %v2343_v1 = vcombine.high %v2341_v33, %v2341_v33 }
 0x6a3   : > { %v2160_v54 = vpop.f32.mrf.mxu1  ;;  %v8158_v28 = vrot.slane %v2390_v14, %v7837_v56  ;;  %v2432_v33 = vrot.slane %v7983_v13, %v7837_v56 }
 0x6a4   : > { %v2174_v19 = vadd.f32 %v2160_v54, %v2025_v17  ;;  %3010 = vrot.lane.b32.xlu0 %v2635_v58, %s10324_s17  ;;  %v7996_v43 = vadd.f32 %v10380_v40, %v2173_v6  ;;  %2592 = vst.msk [vmem:[%s7855_s30 + $0xa0] sm:$0x1] %vm2571_vm13, %v8094_v34  ;;  %v8109_v6 = vrot.slane %v2343_v1, %v7837_v56 }
 0x6a5   : > { %2600 = vst.msk [vmem:[%s7855_s30 + $0xe0] sm:$0x1] %vm2571_vm13, %v8158_v28  ;;  %v2440_v41 = vcombine.high %v2432_v33, %v2432_v33  ;;  %v2425_v1 = vcombine.high %v7983_v13, %v7983_v13  ;;  %v8194_v46 = vrot.slane %v2432_v33, %v7837_v56 }
 0x6a6   : > { %v7999_v29 = vadd.f32 %v10380_v40, %v2174_v19  ;;  %3012 = vrot.lane.b32.xlu1 %v2639_v20, %s10324_s17  ;;  %v8115_v19 = vrot.slane %v4622_v51, %v7837_v56  ;;  %v8119_v40 = vcombine.high %v8094_v34, %v8094_v34  ;;  %2593 = vst.msk [vmem:[%s7855_s30 + $0xa8] sm:$0x1] %vm2571_vm13, %v8109_v6 }
 0x6a7   : > { %v8129_v30 = vcombine.high %v8109_v6, %v8109_v6  ;;  %v2651_v51 = vrot.slane %v7896_v25, %v10367_v22  ;;  %v8201_v25 = vrot.slane %v2440_v41, %v7837_v56  ;;  %2604 = vst.msk [vmem:[%s7855_s30 + $0x100] sm:$0x1] %vm2571_vm13, %v8194_v46  ;;  %v2481_v33 = vrot.slane %v7996_v43, %v7837_v56 }
 0x6a8   : > { %3014 = vrot.lane.b32.xlu0 %v2643_v60, %s10324_s17  ;;  %2594 = vst.msk [vmem:[%s7855_s30 + $0xb0] sm:$0x1] %vm2571_vm13, %v8119_v40  ;;  %v2474_v3 = vcombine.high %v7996_v43, %v7996_v43 }
 0x6a9   : > { %2595 = vst.msk [vmem:[%s7855_s30 + $0xb8] sm:$0x1] %vm2571_vm13, %v8129_v30  ;;  %2605 = vst.msk [vmem:[%s7855_s30 + $0x108] sm:$0x1] %vm2571_vm13, %v8201_v25  ;;  %v8237_v41 = vcombine.high %v8201_v25, %v8201_v25  ;;  %v2489_v17 = vcombine.high %v2481_v33, %v2481_v33  ;;  %v8261_v38 = vrot.slane %v2481_v33, %v7837_v56 }
 0x6aa   : > { %3200 = vrot.lane.b32.xlu1 %v7924_v50, %s10376_s26  ;;  %v4607_v33 = vcombine.high %v8009_v0, %v8009_v0  ;;  %v2488_v35 = vrot.slane %v2474_v3, %v7837_v56  ;;  %v4652_v0 = vcombine.high %v8050_v32, %v8050_v32 }
 0x6ab   : > { %2607 = vst.msk [vmem:[%s7855_s30 + $0x118] sm:$0x1] %vm2571_vm13, %v8237_v41  ;;  %2612 = vst.msk [vmem:[%s7855_s30 + $0x140] sm:$0x1] %vm2571_vm13, %v8261_v38  ;;  %v8294_v45 = vcombine.high %v8261_v38, %v8261_v38 }
 0x6ac   : > { %3202 = vrot.lane.b32.xlu0 %v2635_v58, %s10376_s26  ;;  %v4621_v4 = vrot.slane %v4607_v33, %v7837_v56  ;;  %v2490_v32 = vcombine.high %v2488_v35, %v2488_v35  ;;  %v4912_v33 = vrot.slane %v4652_v0, %v10367_v22 }
 0x6ad   : > { %2614 = vst.msk [vmem:[%s7855_s30 + $0x150] sm:$0x1] %vm2571_vm13, %v8294_v45 }
 0x6ae   : > { %3204 = vrot.lane.b32.xlu1 %v2639_v20, %s10376_s26  ;;  %v8325_v31 = vrot.slane %v4621_v4, %v7837_v56 }
 0x6b0   : > { %3206 = vrot.lane.b32.xlu0 %v2643_v60, %s10376_s26 }
 0x6b2   : > { %3392 = vrot.lane.b32.xlu1 %v7924_v50, %s6413_s27  ;;  %v8061_v50 = vrot.slane %v3587_v26, %v7837_v56  ;;  %v4908_v26 = vrot.slane %v8115_v19, %v10367_v22 }
 0x6b4   : > { %3394 = vrot.lane.b32.xlu0 %v2635_v58, %s6413_s27  ;;  %v2383_v58 = vrot.slane %v7961_v63, %v7837_v56  ;;  %v8084_v52 = vrot.slane %v8061_v50, %v7837_v56 }
 0x6b6   : > { %3396 = vrot.lane.b32.xlu1 %v2639_v20, %s6413_s27  ;;  %v8074_v20 = vcombine.high %v8044_v16, %v8044_v16  ;;  %v2391_v59 = vcombine.high %v2383_v58, %v2383_v58  ;;  %v8103_v12 = vrot.slane %v2383_v58, %v7837_v56  ;;  %v3925_v54 = vrot.slane %v8084_v52, %v10368_v44 }
 0x6b7   : > { %v3921_v3 = vrot.slane %v8084_v52, %v10367_v22  ;;  %v8371_v18 = vcombine.high %v8084_v52, %v8084_v52 }
 0x6b8   : > { %3398 = vrot.lane.b32.xlu0 %v2643_v60, %s6413_s27  ;;  %2590 = vst.msk [vmem:[%s7855_s30 + $0x90] sm:$0x1] %vm2571_vm13, %v8074_v20  ;;  %v8091_v60 = vcombine.high %v8067_v27, %v8067_v27  ;;  %2596 = vst.msk [vmem:[%s7855_s30 + $0xc0] sm:$0x1] %vm2571_vm13, %v8103_v12  ;;  %v8132_v2 = vrot.slane %v2391_v59, %v7837_v56  ;;  %v8152_v21 = vcombine.high %v8103_v12, %v8103_v12 }
 0x6b9   : > { %v8189_v59 = vcombine.high %v8158_v28, %v8158_v28 }
 0x6ba   : > { %5093 = vrot.lane.b32.xlu1 %v4904_v36, %s6414_s22  ;;  %2591 = vst.msk [vmem:[%s7855_s30 + $0x98] sm:$0x1] %vm2571_vm13, %v8091_v60  ;;  %2597 = vst.msk [vmem:[%s7855_s30 + $0xc8] sm:$0x1] %vm2571_vm13, %v8132_v2  ;;  %v8171_v58 = vcombine.high %v8132_v2, %v8132_v2 }
 0x6bb   : > { %2598 = vst.msk [vmem:[%s7855_s30 + $0xd0] sm:$0x1] %vm2571_vm13, %v8152_v21  ;;  %2602 = vst.msk [vmem:[%s7855_s30 + $0xf0] sm:$0x1] %vm2571_vm13, %v8189_v59 }
 0x6bc   : > { %4272 = vrot.lane.b32.xlu0 %v3893_v7, %s6415_s29  ;;  %2599 = vst.msk [vmem:[%s7855_s30 + $0xd8] sm:$0x1] %vm2571_vm13, %v8171_v58 }
 0x6be   : > { %5285 = vrot.lane.b32.xlu1 %v4904_v36, %s6416_s18  ;;  %v2392_v36 = vcombine.high %v2390_v14, %v2390_v14  ;;  %v2659_v14 = vrot.slane %v7906_v10, %v10367_v22  ;;  %v8223_v10 = vcombine.high %v8194_v46, %v8194_v46 }
 0x6c0   : > { %4288 = vrot.lane.b32.xlu0 %v3925_v54, %s6415_s29  ;;  %v8178_v7 = vrot.slane %v2392_v36, %v7837_v56  ;;  %2606 = vst.msk [vmem:[%s7855_s30 + $0x110] sm:$0x1] %vm2571_vm13, %v8223_v10 }
 0x6c2   : > { %2824 = vrot.lane.b32.xlu1 %v2647_v61, %s10323_s16  ;;  %2601 = vst.msk [vmem:[%s7855_s30 + $0xe8] sm:$0x1] %vm2571_vm13, %v8178_v7  ;;  %v8198_v54 = vcombine.high %v8178_v7, %v8178_v7 }
 0x6c4   : > { %5095 = vrot.lane.b32.xlu0 %v4908_v26, %s6414_s22  ;;  %2603 = vst.msk [vmem:[%s7855_s30 + $0xf8] sm:$0x1] %vm2571_vm13, %v8198_v54 }
 0x6c6   : > { %2828 = vrot.lane.b32.xlu1 %v2655_v11, %s10323_s16 }
 0x6c8   : > { %5287 = vrot.lane.b32.xlu0 %v4908_v26, %s6416_s18  ;;  %v2439_v26 = vrot.slane %v2425_v1, %v7837_v56 }
 0x6ca   : > { %3016 = vrot.lane.b32.xlu1 %v2647_v61, %s10324_s17  ;;  %v8232_v36 = vrot.slane %v2439_v26, %v7837_v56  ;;  %v2441_v1 = vcombine.high %v2439_v26, %v2439_v26 }
 0x6cc   : > { %2826 = vrot.lane.b32.xlu0 %v2651_v51, %s10323_s16  ;;  %2608 = vst.msk [vmem:[%s7855_s30 + $0x120] sm:$0x1] %vm2571_vm13, %v8232_v36  ;;  %v8247_v55 = vrot.slane %v2441_v1, %v7837_v56  ;;  %v8255_v26 = vcombine.high %v8232_v36, %v8232_v36  ;;  %v8271_v1 = vrot.slane %v2489_v17, %v7837_v56 }
 0x6cd   : > { %v3889_v17 = vrot.slane %v8058_v9, %v10367_v22 }
 0x6ce   : > { %3020 = vrot.lane.b32.xlu1 %v2655_v11, %s10324_s17  ;;  %2609 = vst.msk [vmem:[%s7855_s30 + $0x128] sm:$0x1] %vm2571_vm13, %v8247_v55  ;;  %2610 = vst.msk [vmem:[%s7855_s30 + $0x130] sm:$0x1] %vm2571_vm13, %v8255_v26 }
 0x6cf   : > { %2613 = vst.msk [vmem:[%s7855_s30 + $0x148] sm:$0x1] %vm2571_vm13, %v8271_v1 }
 0x6d0   : > { %2830 = vrot.lane.b32.xlu0 %v2659_v14, %s10323_s16 }
 0x6d2   : > { %3208 = vrot.lane.b32.xlu1 %v2647_v61, %s10376_s26 }
 0x6d4   : > { %3018 = vrot.lane.b32.xlu0 %v2651_v51, %s10324_s17 }
 0x6d6   : > { %3212 = vrot.lane.b32.xlu1 %v2655_v11, %s10376_s26 }
 0x6d8   : > { %3022 = vrot.lane.b32.xlu0 %v2659_v14, %s10324_s17 }
 0x6da   : > { %3400 = vrot.lane.b32.xlu1 %v2647_v61, %s6413_s27  ;;  %v8268_v61 = vcombine.high %v8247_v55, %v8247_v55 }
 0x6dc   : > { %3210 = vrot.lane.b32.xlu0 %v2651_v51, %s10376_s26  ;;  %2611 = vst.msk [vmem:[%s7855_s30 + $0x138] sm:$0x1] %vm2571_vm13, %v8268_v61 }
 0x6de   : > { %3404 = vrot.lane.b32.xlu1 %v2655_v11, %s6413_s27  ;;  %v3602_v11 = vcombine.high %v8041_v49, %v8041_v49  ;;  %v8306_v49 = vrot.slane %v2488_v35, %v7837_v56  ;;  %v8335_v35 = vcombine.high %v8058_v9, %v8058_v9 }
 0x6e0   : > { %3214 = vrot.lane.b32.xlu0 %v2659_v14, %s10376_s26  ;;  %2616 = vst.msk [vmem:[%s7855_s30 + $0x160] sm:$0x1] %vm2571_vm13, %v8306_v49  ;;  %v8344_v0 = vcombine.high %v8306_v49, %v8306_v49  ;;  %v3909_v9 = vrot.slane %v8335_v35, %v10368_v44 }
 0x6e2   : > { %4270 = vrot.lane.b32.xlu1 %v3889_v17, %s6415_s29  ;;  %v8310_v17 = vcombine.high %v8271_v1, %v8271_v1  ;;  %2618 = vst.msk [vmem:[%s7855_s30 + $0x170] sm:$0x1] %vm2571_vm13, %v8344_v0 }
 0x6e4   : > { %3402 = vrot.lane.b32.xlu0 %v2651_v51, %s6413_s27  ;;  %v8314_v51 = vrot.slane %v3602_v11, %v7837_v56  ;;  %2615 = vst.msk [vmem:[%s7855_s30 + $0x158] sm:$0x1] %vm2571_vm13, %v8310_v17 }
 0x6e6   : > { %4286 = vrot.lane.b32.xlu1 %v3921_v3, %s6415_s29  ;;  %v8328_v3 = vrot.slane %v2490_v32, %v7837_v56  ;;  %v3901_v11 = vrot.slane %v8314_v51, %v10368_v44  ;;  %v4920_v32 = vrot.slane %v8325_v31, %v10367_v22 }
 0x6e8   : > { %3406 = vrot.lane.b32.xlu0 %v2659_v14, %s6413_s27  ;;  %v3603_v14 = vcombine.high %v8061_v50, %v8061_v50  ;;  %2617 = vst.msk [vmem:[%s7855_s30 + $0x168] sm:$0x1] %vm2571_vm13, %v8328_v3  ;;  %v8351_v62 = vcombine.high %v8328_v3, %v8328_v3 }
 0x6ea   : > { %5097 = vrot.lane.b32.xlu1 %v4912_v33, %s6414_s22  ;;  %10381 = vst [vmem:[#allocation24_spill] sm:$0xff] %v8351_v62  ;;  %v8360_v50 = vrot.slane %v3603_v14, %v7837_v56  ;;  %2619 = vst.msk [vmem:[%s7855_s30 + $0x178] sm:$0x1] %vm2571_vm13, %v8351_v62  ;;  %v3941_v14 = vrot.slane %v8371_v18, %v10368_v44  ;;  %v2663_v62 = vrot.slane %v7919_v37, %v10367_v22 }
 0x6ec   : > { %4276 = vrot.lane.b32.xlu0 %v3901_v11, %s6415_s29  ;;  %v3933_v11 = vrot.slane %v8360_v50, %v10368_v44 }
 0x6ee   : > { %5101 = vrot.lane.b32.xlu1 %v4920_v32, %s6414_s22 }
 0x6f0   : > { %4280 = vrot.lane.b32.xlu0 %v3909_v9, %s6415_s29  ;;  %v4654_v9 = vcombine.high %v8115_v19, %v8115_v19 }
 0x6f2   : > { %5289 = vrot.lane.b32.xlu1 %v4912_v33, %s6416_s18  ;;  %v4623_v33 = vcombine.high %v4621_v4, %v4621_v4  ;;  %v4916_v52 = vrot.slane %v4654_v9, %v10367_v22  ;;  %v2671_v4 = vrot.slane %v7940_v57, %v10367_v22 }
 0x6f4   : > { %4292 = vrot.lane.b32.xlu0 %v3933_v11, %s6415_s29 }
 0x6f6   : > { %5293 = vrot.lane.b32.xlu1 %v4920_v32, %s6416_s18  ;;  %v8385_v32 = vrot.slane %v4623_v33, %v7837_v56 }
 0x6f8   : > { %4296 = vrot.lane.b32.xlu0 %v3941_v14, %s6415_s29  ;;  %v4924_v37 = vrot.slane %v8385_v32, %v10367_v22 }
 0x6fa   : > { %2832 = vrot.lane.b32.xlu1 %v2663_v62, %s10323_s16 }
 0x6fc   : > { %v2813_v11 = vpop.permute.xlu1 %2812  ;;  %5099 = vrot.lane.b32.xlu0 %v4916_v52, %s6414_s22 }
 0x6fd   : > { %2956 = vst.msk [vmem:[%s7855_s30 + $0x1] sm:$0x1] %vm2571_vm13, %v2813_v11 }
 0x6fe   : > { %v2815_v19 = vpop.permute.xlu0 %2814  ;;  %2836 = vrot.lane.b32.xlu1 %v2671_v4, %s10323_s16 }
 0x6ff   : > { %2957 = vst.msk [vmem:[%s7855_s30 + $0x9] sm:$0x1] %vm2571_vm13, %v2815_v19 }
 0x700   : > { %v3005_v14 = vpop.permute.xlu1 %3004  ;;  %5103 = vrot.lane.b32.xlu0 %v4924_v37, %s6414_s22 }
 0x701   : > { %3148 = vst.msk [vmem:[%s7855_s30 + $0x2] sm:$0x1] %vm2571_vm13, %v3005_v14 }
 0x702   : > { %v3007_v9 = vpop.permute.xlu0 %3006  ;;  %3024 = vrot.lane.b32.xlu1 %v2663_v62, %s10324_s17 }
 0x703   : > { %3149 = vst.msk [vmem:[%s7855_s30 + $0xa] sm:$0x1] %vm2571_vm13, %v3007_v9 }
 0x704   : > { %v3197_v57 = vpop.permute.xlu1 %3196  ;;  %5291 = vrot.lane.b32.xlu0 %v4916_v52, %s6416_s18  ;;  %v2667_v52 = vrot.slane %v7944_v53, %v10367_v22 }
 0x705   : > { %3340 = vst.msk [vmem:[%s7855_s30 + $0x3] sm:$0x1] %vm2571_vm13, %v3197_v57 }
 0x706   : > { %v3199_v33 = vpop.permute.xlu0 %3198  ;;  %3028 = vrot.lane.b32.xlu1 %v2671_v4, %s10324_s17 }
 0x707   : > { %3341 = vst.msk [vmem:[%s7855_s30 + $0xb] sm:$0x1] %vm2571_vm13, %v3199_v33 }
 0x708   : > { %v3389_v11 = vpop.permute.xlu1 %3388  ;;  %5295 = vrot.lane.b32.xlu0 %v4924_v37, %s6416_s18  ;;  %v2675_v37 = vrot.slane %v7969_v42, %v10367_v22 }
 0x709   : > { %3532 = vst.msk [vmem:[%s7855_s30 + $0x4] sm:$0x1] %vm2571_vm13, %v3389_v11 }
 0x70a   : > { %v3391_v19 = vpop.permute.xlu0 %3390  ;;  %3216 = vrot.lane.b32.xlu1 %v2663_v62, %s10376_s26 }
 0x70b   : > { %3533 = vst.msk [vmem:[%s7855_s30 + $0xc] sm:$0x1] %vm2571_vm13, %v3391_v19 }
 0x70c   : > { %v2817_v14 = vpop.permute.xlu1 %2816  ;;  %2834 = vrot.lane.b32.xlu0 %v2667_v52, %s10323_s16 }
 0x70d   : > { %2958 = vst.msk [vmem:[%s7855_s30 + $0x11] sm:$0x1] %vm2571_vm13, %v2817_v14 }
 0x70e   : > { %v2819_v9 = vpop.permute.xlu0 %2818  ;;  %3220 = vrot.lane.b32.xlu1 %v2671_v4, %s10376_s26 }
 0x70f   : > { %2959 = vst.msk [vmem:[%s7855_s30 + $0x19] sm:$0x1] %vm2571_vm13, %v2819_v9 }
 0x710   : > { %v2821_v57 = vpop.permute.xlu1 %2820  ;;  %2838 = vrot.lane.b32.xlu0 %v2675_v37, %s10323_s16 }
 0x711   : > { %2960 = vst.msk [vmem:[%s7855_s30 + $0x21] sm:$0x1] %vm2571_vm13, %v2821_v57 }
 0x712   : > { %v2823_v53 = vpop.permute.xlu0 %2822  ;;  %3408 = vrot.lane.b32.xlu1 %v2663_v62, %s6413_s27  ;;  %v3897_v62 = vrot.slane %v8314_v51, %v10367_v22 }
 0x713   : > { %2961 = vst.msk [vmem:[%s7855_s30 + $0x29] sm:$0x1] %vm2571_vm13, %v2823_v53  ;;  %v3929_v53 = vrot.slane %v8360_v50, %v10367_v22 }
 0x714   : > { %v3009_v33 = vpop.permute.xlu1 %3008  ;;  %3026 = vrot.lane.b32.xlu0 %v2667_v52, %s10324_s17 }
 0x715   : > { %3150 = vst.msk [vmem:[%s7855_s30 + $0x12] sm:$0x1] %vm2571_vm13, %v3009_v33 }
 0x716   : > { %v3011_v42 = vpop.permute.xlu0 %3010  ;;  %3412 = vrot.lane.b32.xlu1 %v2671_v4, %s6413_s27  ;;  %v3905_v4 = vrot.slane %v8335_v35, %v10367_v22 }
 0x717   : > { %3151 = vst.msk [vmem:[%s7855_s30 + $0x1a] sm:$0x1] %vm2571_vm13, %v3011_v42  ;;  %v3937_v42 = vrot.slane %v8371_v18, %v10367_v22 }
 0x718   : > { %v3013_v11 = vpop.permute.xlu1 %3012  ;;  %3030 = vrot.lane.b32.xlu0 %v2675_v37, %s10324_s17 }
 0x719   : > { %3152 = vst.msk [vmem:[%s7855_s30 + $0x22] sm:$0x1] %vm2571_vm13, %v3013_v11  ;;  %v4653_v11 = vcombine.high %v8325_v31, %v8325_v31 }
 0x71a   : > { %v3015_v19 = vpop.permute.xlu0 %3014  ;;  %4274 = vrot.lane.b32.xlu1 %v3897_v62, %s6415_s29  ;;  %v4663_v62 = vrot.slane %v7852_v24, %v7837_v56 }
 0x71b   : > { %3153 = vst.msk [vmem:[%s7855_s30 + $0x2a] sm:$0x1] %vm2571_vm13, %v3015_v19  ;;  %v4928_v31 = vrot.slane %v4653_v11, %v10367_v22  ;;  %v10383_v11 = vcombine.high %v7848_v47, %v7852_v24 }
 0x71c   : > { %v3201_v14 = vpop.permute.xlu1 %3200  ;;  %3218 = vrot.lane.b32.xlu0 %v2667_v52, %s10376_s26 }
 0x71d   : > { %3342 = vst.msk [vmem:[%s7855_s30 + $0x13] sm:$0x1] %vm2571_vm13, %v3201_v14  ;;  %v8473_v14 = vcombine.high %v8314_v51, %v8314_v51 }
 0x71e   : > { %v3203_v9 = vpop.permute.xlu0 %3202  ;;  %4278 = vrot.lane.b32.xlu1 %v3905_v4, %s6415_s29 }
 0x71f   : > { %3343 = vst.msk [vmem:[%s7855_s30 + $0x1b] sm:$0x1] %vm2571_vm13, %v3203_v9  ;;  %v3917_v51 = vrot.slane %v8473_v14, %v10368_v44  ;;  %v8489_v9 = vcombine.high %v8360_v50, %v8360_v50 }
 0x720   : > { %v3205_v57 = vpop.permute.xlu1 %3204  ;;  %3222 = vrot.lane.b32.xlu0 %v2675_v37, %s10376_s26 }
 0x721   : > { %3344 = vst.msk [vmem:[%s7855_s30 + $0x23] sm:$0x1] %vm2571_vm13, %v3205_v57  ;;  %v3949_v50 = vrot.slane %v8489_v9, %v10368_v44 }
 0x722   : > { %v3207_v33 = vpop.permute.xlu0 %3206  ;;  %4290 = vrot.lane.b32.xlu1 %v3929_v53, %s6415_s29 }
 0x723   : > { %3345 = vst.msk [vmem:[%s7855_s30 + $0x2b] sm:$0x1] %vm2571_vm13, %v3207_v33 }
 0x724   : > { %v3393_v35 = vpop.permute.xlu1 %3392  ;;  %3410 = vrot.lane.b32.xlu0 %v2667_v52, %s6413_s27  ;;  %v8480_v52 = vrot.slane %v4663_v62, %v7837_v56 }
 0x725   : > { %3534 = vst.msk [vmem:[%s7855_s30 + $0x14] sm:$0x1] %vm2571_vm13, %v3393_v35 }
 0x726   : > { %v3395_v19 = vpop.permute.xlu0 %3394  ;;  %4294 = vrot.lane.b32.xlu1 %v3937_v42, %s6415_s29  ;;  %v4936_v33 = vrot.slane %v8480_v52, %v10367_v22 }
 0x727   : > { %3535 = vst.msk [vmem:[%s7855_s30 + $0x1c] sm:$0x1] %vm2571_vm13, %v3395_v19  ;;  %v8517_v19 = vrot.slane %v10383_v11, %v7837_v56  ;;  %v4671_v11 = vcombine.high %v4663_v62, %v4663_v62 }
 0x728   : > { %v3397_v18 = vpop.permute.xlu1 %3396  ;;  %3414 = vrot.lane.b32.xlu0 %v2675_v37, %s6413_s27  ;;  %v10382_v37 = vcombine.low %v7848_v47, %v7852_v24 }
 0x729   : > { %3536 = vst.msk [vmem:[%s7855_s30 + $0x24] sm:$0x1] %vm2571_vm13, %v3397_v18 }
 0x72a   : > { %v3399_v4 = vpop.permute.xlu0 %3398  ;;  %5105 = vrot.lane.b32.xlu1 %v4928_v31, %s6414_s22  ;;  %v8495_v57 = vrot.slane %v10382_v37, %v7837_v56  ;;  %v8529_v37 = vrot.slane %v8517_v19, %v7837_v56 }
 0x72b   : > { %3537 = vst.msk [vmem:[%s7855_s30 + $0x2c] sm:$0x1] %vm2571_vm13, %v3399_v4 }
 0x72c   : > { %v5094_v53 = vpop.permute.xlu1 %5093  ;;  %4284 = vrot.lane.b32.xlu0 %v3917_v51, %s6415_s29  ;;  %v8511_v42 = vrot.slane %v8495_v57, %v7837_v56 }
 0x72d   : > { %5237 = vst.msk [vmem:[%s7855_s30 + $0x6] sm:$0x1] %vm2571_vm13, %v5094_v53 }
 0x72e   : > { %v8504_v35 = vpop.permute.xlu0 %4272  ;;  %5109 = vrot.lane.b32.xlu1 %v4936_v33, %s6414_s22  ;;  %v3957_v51 = vrot.slane %v8511_v42, %v10368_v44 }
 0x730   : > { %v5286_v18 = vpop.permute.xlu1 %5285  ;;  %4300 = vrot.lane.b32.xlu0 %v3949_v50, %s6415_s29  ;;  %v4655_v50 = vcombine.high %v8385_v32, %v8385_v32  ;;  %v8549_v32 = vrot.slane %v4671_v11, %v7837_v56 }
 0x731   : > { %5429 = vst.msk [vmem:[%s7855_s30 + $0x7] sm:$0x1] %vm2571_vm13, %v5286_v18 }
 0x732   : > { %v8522_v4 = vpop.permute.xlu0 %4288  ;;  %5297 = vrot.lane.b32.xlu1 %v4928_v31, %s6416_s18  ;;  %v3989_v31 = vrot.slane %v8529_v37, %v10368_v44 }
 0x734   : > { %v2825_v47 = vpop.permute.xlu1 %2824  ;;  %4304 = vrot.lane.b32.xlu0 %v3957_v51, %s6415_s29  ;;  %v2679_v51 = vrot.slane %v8015_v23, %v10367_v22 }
 0x735   : > { %2962 = vst.msk [vmem:[%s7855_s30 + $0x31] sm:$0x1] %vm2571_vm13, %v2825_v47  ;;  %v4932_v47 = vrot.slane %v4655_v50, %v10367_v22 }
 0x736   : > { %v5096_v53 = vpop.permute.xlu0 %5095  ;;  %5301 = vrot.lane.b32.xlu1 %v4936_v33, %s6416_s18 }
 0x737   : > { %5238 = vst.msk [vmem:[%s7855_s30 + $0xe] sm:$0x1] %vm2571_vm13, %v5096_v53  ;;  %v4940_v53 = vrot.slane %v8549_v32, %v10367_v22 }
 0x738   : > { %v2829_v18 = vpop.permute.xlu1 %2828  ;;  %4320 = vrot.lane.b32.xlu0 %v3989_v31, %s6415_s29 }
 0x739   : > { %2964 = vst.msk [vmem:[%s7855_s30 + $0x41] sm:$0x1] %vm2571_vm13, %v2829_v18 }
 0x73a   : > { %v5288_v33 = vpop.permute.xlu0 %5287  ;;  %2840 = vrot.lane.b32.xlu1 %v2679_v51, %s10323_s16 }
 0x73b   : > { %5430 = vst.msk [vmem:[%s7855_s30 + $0xf] sm:$0x1] %vm2571_vm13, %v5288_v33 }
 0x73c   : > { %v3017_v62 = vpop.permute.xlu1 %3016  ;;  %5107 = vrot.lane.b32.xlu0 %v4932_v47, %s6414_s22 }
 0x73d   : > { %3154 = vst.msk [vmem:[%s7855_s30 + $0x32] sm:$0x1] %vm2571_vm13, %v3017_v62  ;;  %v3913_v62 = vrot.slane %v8473_v14, %v10367_v22 }
 0x73e   : > { %v2827_v23 = vpop.permute.xlu0 %2826  ;;  %3032 = vrot.lane.b32.xlu1 %v2679_v51, %s10324_s17 }
 0x73f   : > { %2963 = vst.msk [vmem:[%s7855_s30 + $0x39] sm:$0x1] %vm2571_vm13, %v2827_v23 }
 0x740   : > { %v3021_v31 = vpop.permute.xlu1 %3020  ;;  %5111 = vrot.lane.b32.xlu0 %v4940_v53, %s6414_s22 }
 0x741   : > { %3156 = vst.msk [vmem:[%s7855_s30 + $0x42] sm:$0x1] %vm2571_vm13, %v3021_v31  ;;  %v4656_v31 = vcombine.high %v7852_v24, %v7852_v24 }
 0x742   : > { %v2831_v50 = vpop.permute.xlu0 %2830  ;;  %3224 = vrot.lane.b32.xlu1 %v2679_v51, %s10376_s26 }
 0x743   : > { %2965 = vst.msk [vmem:[%s7855_s30 + $0x49] sm:$0x1] %vm2571_vm13, %v2831_v50  ;;  %v3953_v50 = vrot.slane %v8511_v42, %v10367_v22 }
 0x744   : > { %v3209_v11 = vpop.permute.xlu1 %3208  ;;  %5299 = vrot.lane.b32.xlu0 %v4932_v47, %s6416_s18  ;;  %v2683_v47 = vrot.slane %v8028_v15, %v10367_v22 }
 0x745   : > { %3346 = vst.msk [vmem:[%s7855_s30 + $0x33] sm:$0x1] %vm2571_vm13, %v3209_v11  ;;  %v3652_v11 = vcombine.high %v8495_v57, %v8495_v57 }
 0x746   : > { %v3019_v18 = vpop.permute.xlu0 %3018  ;;  %3416 = vrot.lane.b32.xlu1 %v2679_v51, %s6413_s27 }
 0x747   : > { %3155 = vst.msk [vmem:[%s7855_s30 + $0x3a] sm:$0x1] %vm2571_vm13, %v3019_v18  ;;  %v3985_v18 = vrot.slane %v8529_v37, %v10367_v22 }
 0x748   : > { %v3213_v33 = vpop.permute.xlu1 %3212  ;;  %5303 = vrot.lane.b32.xlu0 %v4940_v53, %s6416_s18  ;;  %v3945_v53 = vrot.slane %v8489_v9, %v10367_v22 }
 0x749   : > { %3348 = vst.msk [vmem:[%s7855_s30 + $0x43] sm:$0x1] %vm2571_vm13, %v3213_v33  ;;  %v4701_v33 = vcombine.high %v8480_v52, %v8480_v52 }
 0x74a   : > { %v3023_v23 = vpop.permute.xlu0 %3022  ;;  %4282 = vrot.lane.b32.xlu1 %v3913_v62, %s6415_s29  ;;  %v4670_v62 = vrot.slane %v4656_v31, %v7837_v56 }
 0x74b   : > { %3157 = vst.msk [vmem:[%s7855_s30 + $0x4a] sm:$0x1] %vm2571_vm13, %v3023_v23  ;;  %v4944_v52 = vrot.slane %v4701_v33, %v10367_v22 }
 0x74c   : > { %v3401_v51 = vpop.permute.xlu1 %3400  ;;  %2842 = vrot.lane.b32.xlu0 %v2683_v47, %s10323_s16 }
 0x74d   : > { %3538 = vst.msk [vmem:[%s7855_s30 + $0x34] sm:$0x1] %vm2571_vm13, %v3401_v51  ;;  %v8615_v51 = vrot.slane %v3652_v11, %v7837_v56 }
 0x74e   : > { %v3211_v14 = vpop.permute.xlu0 %3210  ;;  %4298 = vrot.lane.b32.xlu1 %v3945_v53, %s6415_s29 }
 0x74f   : > { %3347 = vst.msk [vmem:[%s7855_s30 + $0x3b] sm:$0x1] %vm2571_vm13, %v3211_v14  ;;  %v8622_v14 = vrot.slane %v4670_v62, %v7837_v56 }
 0x750   : > { %v3405_v15 = vpop.permute.xlu1 %3404  ;;  %3034 = vrot.lane.b32.xlu0 %v2683_v47, %s10324_s17 }
 0x751   : > { %3540 = vst.msk [vmem:[%s7855_s30 + $0x44] sm:$0x1] %vm2571_vm13, %v3405_v15  ;;  %v3965_v15 = vrot.slane %v8615_v51, %v10368_v44 }
 0x752   : > { %v3215_v9 = vpop.permute.xlu0 %3214  ;;  %4302 = vrot.lane.b32.xlu1 %v3953_v50, %s6415_s29  ;;  %v3653_v50 = vcombine.high %v8517_v19, %v8517_v19 }
 0x753   : > { %3349 = vst.msk [vmem:[%s7855_s30 + $0x4b] sm:$0x1] %vm2571_vm13, %v3215_v9 }
 0x754   : > { %v4271_v24 = vpop.permute.xlu1 %4270  ;;  %3226 = vrot.lane.b32.xlu0 %v2683_v47, %s10376_s26 }
 0x755   : > { %v4463_v23 = vsel %vm4462_vm1, %v4271_v24, %v8504_v35  ;;  %v3681_v24 = vrot.slane %v3653_v50, %v7837_v56 }
 0x756   : > { %4559 = vst.msk [vmem:[%s7855_s30 + $0x5] sm:$0x1] %vm2571_vm13, %v4463_v23  ;;  %v3403_v57 = vpop.permute.xlu0 %3402  ;;  %4318 = vrot.lane.b32.xlu1 %v3985_v18, %s6415_s29  ;;  %v3683_v23 = vcombine.high %v8529_v37, %v8529_v37  ;;  %v3961_v37 = vrot.slane %v8615_v51, %v10367_v22 }
 0x757   : > { %3539 = vst.msk [vmem:[%s7855_s30 + $0x3c] sm:$0x1] %vm2571_vm13, %v3403_v57  ;;  %v3997_v33 = vrot.slane %v3681_v24, %v10368_v44 }
 0x758   : > { %v4287_v53 = vpop.permute.xlu1 %4286  ;;  %3418 = vrot.lane.b32.xlu0 %v2683_v47, %s6413_s27  ;;  %v3682_v47 = vcombine.high %v8511_v42, %v8511_v42 }
 0x759   : > { %v4467_v35 = vsel %vm4462_vm1, %v4287_v53, %v8522_v4  ;;  %v4952_v4 = vrot.slane %v8622_v14, %v10367_v22 }
 0x75a   : > { %4563 = vst.msk [vmem:[%s7855_s30 + $0x25] sm:$0x1] %vm2571_vm13, %v4467_v35  ;;  %v3407_v31 = vpop.permute.xlu0 %3406  ;;  %5113 = vrot.lane.b32.xlu1 %v4944_v52, %s6414_s22  ;;  %v3973_v42 = vrot.slane %v3682_v47, %v10368_v44  ;;  %v4005_v35 = vrot.slane %v3683_v23, %v10368_v44 }
 0x75b   : > { %3541 = vst.msk [vmem:[%s7855_s30 + $0x4c] sm:$0x1] %vm2571_vm13, %v3407_v31  ;;  %v4672_v31 = vcombine.high %v4670_v62, %v4670_v62 }
 0x75c   : > { %v5098_v9 = vpop.permute.xlu1 %5097  ;;  %4308 = vrot.lane.b32.xlu0 %v3965_v15, %s6415_s29 }
 0x75d   : > { %5239 = vst.msk [vmem:[%s7855_s30 + $0x16] sm:$0x1] %vm2571_vm13, %v5098_v9 }
 0x75e   : > { %v8642_v11 = vpop.permute.xlu0 %4276  ;;  %5117 = vrot.lane.b32.xlu1 %v4952_v4, %s6414_s22 }
 0x760   : > { %v5102_v19 = vpop.permute.xlu1 %5101  ;;  %4312 = vrot.lane.b32.xlu0 %v3973_v42, %s6415_s29 }
 0x761   : > { %5241 = vst.msk [vmem:[%s7855_s30 + $0x26] sm:$0x1] %vm2571_vm13, %v5102_v19 }
 0x762   : > { %v8650_v18 = vpop.permute.xlu0 %4280  ;;  %5305 = vrot.lane.b32.xlu1 %v4944_v52, %s6416_s18  ;;  %v4703_v52 = vcombine.high %v8549_v32, %v8549_v32  ;;  %v4700_v32 = vrot.slane %v4672_v31, %v7837_v56  ;;  %v4702_v31 = vcombine.high %v8622_v14, %v8622_v14 }
 0x764   : > { %v5290_v57 = vpop.permute.xlu1 %5289  ;;  %4324 = vrot.lane.b32.xlu0 %v3997_v33, %s6415_s29  ;;  %v4948_v9 = vrot.slane %v4703_v52, %v10367_v22  ;;  %v4956_v19 = vrot.slane %v4700_v32, %v10367_v22  ;;  %v4001_v52 = vrot.slane %v3683_v23, %v10367_v22  ;;  %v4960_v23 = vrot.slane %v4702_v31, %v10367_v22 }
 0x765   : > { %5431 = vst.msk [vmem:[%s7855_s30 + $0x17] sm:$0x1] %vm2571_vm13, %v5290_v57  ;;  %v3993_v57 = vrot.slane %v3681_v24, %v10367_v22 }
 0x766   : > { %v8659_v53 = vpop.permute.xlu0 %4292  ;;  %5309 = vrot.lane.b32.xlu1 %v4952_v4, %s6416_s18  ;;  %v3969_v4 = vrot.slane %v3682_v47, %v10367_v22 }
 0x768   : > { %v5294_v15 = vpop.permute.xlu1 %5293  ;;  %4328 = vrot.lane.b32.xlu0 %v4005_v35, %s6415_s29 }
 0x769   : > { %5433 = vst.msk [vmem:[%s7855_s30 + $0x27] sm:$0x1] %vm2571_vm13, %v5294_v15 }
 0x76a   : > { %v8670_v50 = vpop.permute.xlu0 %4296  ;;  %4306 = vrot.lane.b32.xlu1 %v3961_v37, %s6415_s29  ;;  %v3684_v37 = vcombine.high %v8615_v51, %v8615_v51 }
 0x76c   : > { %v2833_v62 = vpop.permute.xlu1 %2832  ;;  %5115 = vrot.lane.b32.xlu0 %v4948_v9, %s6414_s22 }
 0x76d   : > { %2966 = vst.msk [vmem:[%s7855_s30 + $0x51] sm:$0x1] %vm2571_vm13, %v2833_v62 }
 0x76e   : > { %v5100_v42 = vpop.permute.xlu0 %5099  ;;  %4310 = vrot.lane.b32.xlu1 %v3969_v4, %s6415_s29  ;;  %v3685_v4 = vcombine.high %v3681_v24, %v3681_v24  ;;  %v3977_v24 = vrot.slane %v3684_v37, %v10367_v22 }
 0x76f   : > { %5240 = vst.msk [vmem:[%s7855_s30 + $0x1e] sm:$0x1] %vm2571_vm13, %v5100_v42 }
 0x770   : > { %v2837_v33 = vpop.permute.xlu1 %2836  ;;  %5119 = vrot.lane.b32.xlu0 %v4956_v19, %s6414_s22 }
 0x771   : > { %2968 = vst.msk [vmem:[%s7855_s30 + $0x61] sm:$0x1] %vm2571_vm13, %v2837_v33  ;;  %v4704_v33 = vcombine.high %v4700_v32, %v4700_v32 }
 0x772   : > { %v5104_v47 = vpop.permute.xlu0 %5103  ;;  %4322 = vrot.lane.b32.xlu1 %v3993_v57, %s6415_s29 }
 0x773   : > { %5242 = vst.msk [vmem:[%s7855_s30 + $0x2e] sm:$0x1] %vm2571_vm13, %v5104_v47 }
 0x774   : > { %v3025_v35 = vpop.permute.xlu1 %3024  ;;  %5307 = vrot.lane.b32.xlu0 %v4948_v9, %s6416_s18  ;;  %v3981_v9 = vrot.slane %v3684_v37, %v10368_v44  ;;  %v2687_v37 = vrot.slane %v8044_v16, %v10367_v22 }
 0x775   : > { %3158 = vst.msk [vmem:[%s7855_s30 + $0x52] sm:$0x1] %vm2571_vm13, %v3025_v35  ;;  %v4964_v35 = vrot.slane %v4704_v33, %v10367_v22  ;;  %v2695_v33 = vrot.slane %v8074_v20, %v10367_v22  ;;  %v2703_v20 = vrot.slane %v8094_v34, %v10367_v22 }
 0x776   : > { %v5292_v15 = vpop.permute.xlu0 %5291  ;;  %4326 = vrot.lane.b32.xlu1 %v4001_v52, %s6415_s29  ;;  %v4009_v52 = vrot.slane %v3685_v4, %v10367_v22 }
 0x777   : > { %5432 = vst.msk [vmem:[%s7855_s30 + $0x1f] sm:$0x1] %vm2571_vm13, %v5292_v15 }
 0x778   : > { %v3029_v62 = vpop.permute.xlu1 %3028  ;;  %5311 = vrot.lane.b32.xlu0 %v4956_v19, %s6416_s18  ;;  %v4013_v19 = vrot.slane %v3685_v4, %v10368_v44 }
 0x779   : > { %3160 = vst.msk [vmem:[%s7855_s30 + $0x62] sm:$0x1] %vm2571_vm13, %v3029_v62 }
 0x77a   : > { %v5296_v14 = vpop.permute.xlu0 %5295  ;;  %5121 = vrot.lane.b32.xlu1 %v4960_v23, %s6414_s22 }
 0x77b   : > { %5434 = vst.msk [vmem:[%s7855_s30 + $0x2f] sm:$0x1] %vm2571_vm13, %v5296_v14 }
 0x77c   : > { %v3217_v51 = vpop.permute.xlu1 %3216  ;;  %4316 = vrot.lane.b32.xlu0 %v3981_v9, %s6415_s29 }
 0x77d   : > { %3350 = vst.msk [vmem:[%s7855_s30 + $0x53] sm:$0x1] %vm2571_vm13, %v3217_v51 }
 0x77e   : > { %v2835_v42 = vpop.permute.xlu0 %2834  ;;  %5313 = vrot.lane.b32.xlu1 %v4960_v23, %s6416_s18  ;;  %v2691_v23 = vrot.slane %v8067_v27, %v10367_v22 }
 0x77f   : > { %2967 = vst.msk [vmem:[%s7855_s30 + $0x59] sm:$0x1] %vm2571_vm13, %v2835_v42 }
 0x780   : > { %v3221_v57 = vpop.permute.xlu1 %3220  ;;  %4332 = vrot.lane.b32.xlu0 %v4013_v19, %s6415_s29 }
 0x781   : > { %3352 = vst.msk [vmem:[%s7855_s30 + $0x63] sm:$0x1] %vm2571_vm13, %v3221_v57 }
 0x782   : > { %v2839_v47 = vpop.permute.xlu0 %2838  ;;  %4314 = vrot.lane.b32.xlu1 %v3977_v24, %s6415_s29  ;;  %v2699_v24 = vrot.slane %v8091_v60, %v10367_v22 }
 0x783   : > { %2969 = vst.msk [vmem:[%s7855_s30 + $0x69] sm:$0x1] %vm2571_vm13, %v2839_v47 }
 0x784   : > { %v3409_v32 = vpop.permute.xlu1 %3408  ;;  %5123 = vrot.lane.b32.xlu0 %v4964_v35, %s6414_s22 }
 0x785   : > { %3542 = vst.msk [vmem:[%s7855_s30 + $0x54] sm:$0x1] %vm2571_vm13, %v3409_v32 }
 0x786   : > { %v3027_v31 = vpop.permute.xlu0 %3026  ;;  %4330 = vrot.lane.b32.xlu1 %v4009_v52, %s6415_s29 }
 0x787   : > { %3159 = vst.msk [vmem:[%s7855_s30 + $0x5a] sm:$0x1] %vm2571_vm13, %v3027_v31 }
 0x788   : > { %v3413_v15 = vpop.permute.xlu1 %3412  ;;  %5315 = vrot.lane.b32.xlu0 %v4964_v35, %s6416_s18  ;;  %v2707_v35 = vrot.slane %v8109_v6, %v10367_v22 }
 0x789   : > { %3544 = vst.msk [vmem:[%s7855_s30 + $0x64] sm:$0x1] %vm2571_vm13, %v3413_v15 }
 0x78a   : > { %v3031_v62 = vpop.permute.xlu0 %3030  ;;  %2844 = vrot.lane.b32.xlu1 %v2687_v37, %s10323_s16 }
 0x78b   : > { %3161 = vst.msk [vmem:[%s7855_s30 + $0x6a] sm:$0x1] %vm2571_vm13, %v3031_v62  ;;  %v4712_v62 = vrot.slane %v7934_v5, %v7837_v56 }
 0x78c   : > { %v4275_v14 = vpop.permute.xlu1 %4274  ;;  %2846 = vrot.lane.b32.xlu0 %v2691_v23, %s10323_s16 }
 0x78d   : > { %v4464_v9 = vsel %vm4462_vm1, %v4275_v14, %v8642_v11  ;;  %v10384_v14 = vcombine.low %v7931_v8, %v7934_v5 }
 0x78e   : > { %4560 = vst.msk [vmem:[%s7855_s30 + $0xd] sm:$0x1] %vm2571_vm13, %v4464_v9  ;;  %v3219_v16 = vpop.permute.xlu0 %3218  ;;  %3036 = vrot.lane.b32.xlu1 %v2687_v37, %s10324_s17 }
 0x78f   : > { %3351 = vst.msk [vmem:[%s7855_s30 + $0x5b] sm:$0x1] %vm2571_vm13, %v3219_v16  ;;  %v8814_v9 = vrot.slane %v10384_v14, %v7837_v56 }
 0x790   : > { %v4279_v4 = vpop.permute.xlu1 %4278  ;;  %3038 = vrot.lane.b32.xlu0 %v2691_v23, %s10324_s17 }
 0x791   : > { %v4465_v27 = vsel %vm4462_vm1, %v4279_v4, %v8650_v18 }
 0x792   : > { %4561 = vst.msk [vmem:[%s7855_s30 + $0x15] sm:$0x1] %vm2571_vm13, %v4465_v27  ;;  %v3223_v51 = vpop.permute.xlu0 %3222  ;;  %3228 = vrot.lane.b32.xlu1 %v2687_v37, %s10376_s26  ;;  %v8821_v27 = vrot.slane %v4712_v62, %v7837_v56 }
 0x793   : > { %3353 = vst.msk [vmem:[%s7855_s30 + $0x6b] sm:$0x1] %vm2571_vm13, %v3223_v51  ;;  %v10385_v51 = vcombine.high %v7931_v8, %v7934_v5 }
 0x794   : > { %v4291_v11 = vpop.permute.xlu1 %4290  ;;  %3230 = vrot.lane.b32.xlu0 %v2691_v23, %s10376_s26 }
 0x795   : > { %v4468_v42 = vsel %vm4462_vm1, %v4291_v11, %v8659_v53  ;;  %v8829_v11 = vrot.slane %v10385_v51, %v7837_v56 }
 0x796   : > { %4564 = vst.msk [vmem:[%s7855_s30 + $0x2d] sm:$0x1] %vm2571_vm13, %v4468_v42  ;;  %v3411_v19 = vpop.permute.xlu0 %3410  ;;  %3420 = vrot.lane.b32.xlu1 %v2687_v37, %s6413_s27 }
 0x797   : > { %3543 = vst.msk [vmem:[%s7855_s30 + $0x5c] sm:$0x1] %vm2571_vm13, %v3411_v19  ;;  %v8834_v19 = vrot.slane %v8814_v9, %v7837_v56 }
 0x798   : > { %v4295_v18 = vpop.permute.xlu1 %4294  ;;  %3422 = vrot.lane.b32.xlu0 %v2691_v23, %s6413_s27 }
 0x799   : > { %v4469_v57 = vsel %vm4462_vm1, %v4295_v18, %v8670_v50 }
 0x79a   : > { %4565 = vst.msk [vmem:[%s7855_s30 + $0x35] sm:$0x1] %vm2571_vm13, %v4469_v57  ;;  %v3415_v53 = vpop.permute.xlu0 %3414  ;;  %2848 = vrot.lane.b32.xlu1 %v2695_v33, %s10323_s16  ;;  %v4021_v57 = vrot.slane %v8834_v19, %v10368_v44 }
 0x79b   : > { %3545 = vst.msk [vmem:[%s7855_s30 + $0x6c] sm:$0x1] %vm2571_vm13, %v3415_v53  ;;  %v8848_v53 = vrot.slane %v8829_v11, %v7837_v56 }
 0x79c   : > { %v5106_v47 = vpop.permute.xlu1 %5105  ;;  %2850 = vrot.lane.b32.xlu0 %v2699_v24, %s10323_s16 }
 0x79d   : > { %5243 = vst.msk [vmem:[%s7855_s30 + $0x36] sm:$0x1] %vm2571_vm13, %v5106_v47 }
 0x79e   : > { %v4285_v50 = vpop.permute.xlu0 %4284  ;;  %2852 = vrot.lane.b32.xlu1 %v2703_v20, %s10323_s16 }
 0x7a0   : > { %v5110_v32 = vpop.permute.xlu1 %5109  ;;  %2854 = vrot.lane.b32.xlu0 %v2707_v35, %s10323_s16 }
 0x7a1   : > { %5245 = vst.msk [vmem:[%s7855_s30 + $0x46] sm:$0x1] %vm2571_vm13, %v5110_v32  ;;  %v4053_v32 = vrot.slane %v8848_v53, %v10368_v44 }
 0x7a2   : > { %v4301_v60 = vpop.permute.xlu0 %4300  ;;  %3040 = vrot.lane.b32.xlu1 %v2695_v33, %s10324_s17 }
 0x7a4   : > { %v5298_v34 = vpop.permute.xlu1 %5297  ;;  %3042 = vrot.lane.b32.xlu0 %v2699_v24, %s10324_s17 }
 0x7a5   : > { %5435 = vst.msk [vmem:[%s7855_s30 + $0x37] sm:$0x1] %vm2571_vm13, %v5298_v34 }
 0x7a6   : > { %v4305_v52 = vpop.permute.xlu0 %4304  ;;  %3044 = vrot.lane.b32.xlu1 %v2703_v20, %s10324_s17 }
 0x7a8   : > { %v5302_v6 = vpop.permute.xlu1 %5301  ;;  %3046 = vrot.lane.b32.xlu0 %v2707_v35, %s10324_s17 }
 0x7a9   : > { %5437 = vst.msk [vmem:[%s7855_s30 + $0x47] sm:$0x1] %vm2571_vm13, %v5302_v6 }
 0x7aa   : > { %v8796_v31 = vpop.permute.xlu0 %4320  ;;  %3232 = vrot.lane.b32.xlu1 %v2695_v33, %s10376_s26 }
 0x7ac   : > { %v2841_v15 = vpop.permute.xlu1 %2840  ;;  %3234 = vrot.lane.b32.xlu0 %v2699_v24, %s10376_s26 }
 0x7ad   : > { %2970 = vst.msk [vmem:[%s7855_s30 + $0x71] sm:$0x1] %vm2571_vm13, %v2841_v15 }
 0x7ae   : > { %v5108_v37 = vpop.permute.xlu0 %5107  ;;  %3236 = vrot.lane.b32.xlu1 %v2703_v20, %s10376_s26 }
 0x7af   : > { %5244 = vst.msk [vmem:[%s7855_s30 + $0x3e] sm:$0x1] %vm2571_vm13, %v5108_v37 }
 0x7b0   : > { %v3033_v23 = vpop.permute.xlu1 %3032  ;;  %3238 = vrot.lane.b32.xlu0 %v2707_v35, %s10376_s26 }
 0x7b1   : > { %3162 = vst.msk [vmem:[%s7855_s30 + $0x72] sm:$0x1] %vm2571_vm13, %v3033_v23 }
 0x7b2   : > { %v5112_v16 = vpop.permute.xlu0 %5111  ;;  %3424 = vrot.lane.b32.xlu1 %v2695_v33, %s6413_s27  ;;  %v4968_v33 = vrot.slane %v8821_v27, %v10367_v22 }
 0x7b3   : > { %5246 = vst.msk [vmem:[%s7855_s30 + $0x4e] sm:$0x1] %vm2571_vm13, %v5112_v16 }
 0x7b4   : > { %v3225_v4 = vpop.permute.xlu1 %3224  ;;  %3426 = vrot.lane.b32.xlu0 %v2699_v24, %s6413_s27  ;;  %v4720_v24 = vcombine.high %v4712_v62, %v4712_v62 }
 0x7b5   : > { %3354 = vst.msk [vmem:[%s7855_s30 + $0x73] sm:$0x1] %vm2571_vm13, %v3225_v4 }
 0x7b6   : > { %v5300_v42 = vpop.permute.xlu0 %5299  ;;  %3428 = vrot.lane.b32.xlu1 %v2703_v20, %s6413_s27  ;;  %v8860_v34 = vrot.slane %v4720_v24, %v7837_v56 }
 0x7b7   : > { %5436 = vst.msk [vmem:[%s7855_s30 + $0x3f] sm:$0x1] %vm2571_vm13, %v5300_v42 }
 0x7b8   : > { %v3417_v18 = vpop.permute.xlu1 %3416  ;;  %3430 = vrot.lane.b32.xlu0 %v2707_v35, %s6413_s27  ;;  %v4972_v62 = vrot.slane %v8860_v34, %v10367_v22 }
 0x7b9   : > { %3546 = vst.msk [vmem:[%s7855_s30 + $0x74] sm:$0x1] %vm2571_vm13, %v3417_v18 }
 0x7ba   : > { %v5304_v8 = vpop.permute.xlu0 %5303  ;;  %5125 = vrot.lane.b32.xlu1 %v4968_v33, %s6414_s22 }
 0x7bb   : > { %5438 = vst.msk [vmem:[%s7855_s30 + $0x4f] sm:$0x1] %vm2571_vm13, %v5304_v8 }
 0x7bc   : > { %v4283_v47 = vpop.permute.xlu1 %4282  ;;  %4336 = vrot.lane.b32.xlu0 %v4021_v57, %s6415_s29 }
 0x7bd   : > { %v4466_v20 = vsel %vm4462_vm1, %v4283_v47, %v4285_v50  ;;  %v2711_v50 = vrot.slane %v8119_v40, %v10367_v22  ;;  %v2719_v40 = vrot.slane %v8103_v12, %v10367_v22 }
 0x7be   : > { %4562 = vst.msk [vmem:[%s7855_s30 + $0x1d] sm:$0x1] %vm2571_vm13, %v4466_v20  ;;  %v2843_v35 = vpop.permute.xlu0 %2842  ;;  %5317 = vrot.lane.b32.xlu1 %v4968_v33, %s6416_s18 }
 0x7bf   : > { %2971 = vst.msk [vmem:[%s7855_s30 + $0x79] sm:$0x1] %vm2571_vm13, %v2843_v35  ;;  %v4705_v35 = vcombine.high %v7934_v5, %v7934_v5 }
 0x7c0   : > { %v4299_v6 = vpop.permute.xlu1 %4298  ;;  %4352 = vrot.lane.b32.xlu0 %v4053_v32, %s6415_s29 }
 0x7c1   : > { %v4470_v15 = vsel %vm4462_vm1, %v4299_v6, %v4301_v60  ;;  %v4017_v6 = vrot.slane %v8834_v19, %v10367_v22 }
 0x7c2   : > { %4566 = vst.msk [vmem:[%s7855_s30 + $0x3d] sm:$0x1] %vm2571_vm13, %v4470_v15  ;;  %v3035_v37 = vpop.permute.xlu0 %3034  ;;  %2856 = vrot.lane.b32.xlu1 %v2711_v50, %s10323_s16 }
 0x7c3   : > { %3163 = vst.msk [vmem:[%s7855_s30 + $0x7a] sm:$0x1] %vm2571_vm13, %v3035_v37  ;;  %v3702_v37 = vcombine.high %v8814_v9, %v8814_v9 }
 0x7c4   : > { %v4303_v23 = vpop.permute.xlu1 %4302  ;;  %5127 = vrot.lane.b32.xlu0 %v4972_v62, %s6414_s22 }
 0x7c5   : > { %v4471_v60 = vsel %vm4462_vm1, %v4303_v23, %v4305_v52  ;;  %v2715_v52 = vrot.slane %v8129_v30, %v10367_v22  ;;  %v4750_v23 = vcombine.high %v8821_v27, %v8821_v27 }
 0x7c6   : > { %4567 = vst.msk [vmem:[%s7855_s30 + $0x45] sm:$0x1] %vm2571_vm13, %v4471_v60  ;;  %v3227_v14 = vpop.permute.xlu0 %3226  ;;  %2860 = vrot.lane.b32.xlu1 %v2719_v40, %s10323_s16 }
 0x7c7   : > { %3355 = vst.msk [vmem:[%s7855_s30 + $0x7b] sm:$0x1] %vm2571_vm13, %v3227_v14  ;;  %v8943_v14 = vrot.slane %v3702_v37, %v7837_v56  ;;  %v4976_v27 = vrot.slane %v4750_v23, %v10367_v22  ;;  %v2735_v23 = vrot.slane %v8158_v28, %v10367_v22 }
 0x7c8   : > { %v4319_v16 = vpop.permute.xlu1 %4318  ;;  %5319 = vrot.lane.b32.xlu0 %v4972_v62, %s6416_s18  ;;  %v4049_v62 = vrot.slane %v8848_v53, %v10367_v22 }
 0x7c9   : > { %v4475_v4 = vsel %vm4462_vm1, %v4319_v16, %v8796_v31  ;;  %v2723_v31 = vrot.slane %v8132_v2, %v10367_v22 }
 0x7ca   : > { %4571 = vst.msk [vmem:[%s7855_s30 + $0x65] sm:$0x1] %vm2571_vm13, %v4475_v4  ;;  %v3419_v12 = vpop.permute.xlu0 %3418  ;;  %3048 = vrot.lane.b32.xlu1 %v2711_v50, %s10324_s17 }
 0x7cb   : > { %3547 = vst.msk [vmem:[%s7855_s30 + $0x7c] sm:$0x1] %vm2571_vm13, %v3419_v12 }
 0x7cc   : > { %v5114_v51 = vpop.permute.xlu1 %5113  ;;  %2858 = vrot.lane.b32.xlu0 %v2715_v52, %s10323_s16 }
 0x7cd   : > { %5247 = vst.msk [vmem:[%s7855_s30 + $0x56] sm:$0x1] %vm2571_vm13, %v5114_v51  ;;  %v4029_v51 = vrot.slane %v8943_v14, %v10368_v44 }
 0x7ce   : > { %v4309_v42 = vpop.permute.xlu0 %4308  ;;  %3052 = vrot.lane.b32.xlu1 %v2719_v40, %s10324_s17 }
 0x7d0   : > { %v5118_v18 = vpop.permute.xlu1 %5117  ;;  %2862 = vrot.lane.b32.xlu0 %v2723_v31, %s10323_s16 }
 0x7d1   : > { %5249 = vst.msk [vmem:[%s7855_s30 + $0x66] sm:$0x1] %vm2571_vm13, %v5118_v18 }
 0x7d2   : > { %v4313_v30 = vpop.permute.xlu0 %4312  ;;  %3240 = vrot.lane.b32.xlu1 %v2711_v50, %s10376_s26 }
 0x7d4   : > { %v5306_v33 = vpop.permute.xlu1 %5305  ;;  %3050 = vrot.lane.b32.xlu0 %v2715_v52, %s10324_s17 }
 0x7d5   : > { %5439 = vst.msk [vmem:[%s7855_s30 + $0x57] sm:$0x1] %vm2571_vm13, %v5306_v33 }
 0x7d6   : > { %v4325_v8 = vpop.permute.xlu0 %4324  ;;  %3244 = vrot.lane.b32.xlu1 %v2719_v40, %s10376_s26 }
 0x7d8   : > { %v5310_v57 = vpop.permute.xlu1 %5309  ;;  %3054 = vrot.lane.b32.xlu0 %v2723_v31, %s10324_s17 }
 0x7d9   : > { %5441 = vst.msk [vmem:[%s7855_s30 + $0x67] sm:$0x1] %vm2571_vm13, %v5310_v57 }
 0x7da   : > { %v4329_v2 = vpop.permute.xlu0 %4328  ;;  %3432 = vrot.lane.b32.xlu1 %v2711_v50, %s6413_s27 }
 0x7dc   : > { %v4307_v24 = vpop.permute.xlu1 %4306  ;;  %3242 = vrot.lane.b32.xlu0 %v2715_v52, %s10376_s26 }
 0x7dd   : > { %v4472_v47 = vsel %vm4462_vm1, %v4307_v24, %v4309_v42  ;;  %v8960_v42 = vcombine.high %v8834_v19, %v8834_v19  ;;  %v8985_v24 = vcombine.high %v8848_v53, %v8848_v53 }
 0x7de   : > { %4568 = vst.msk [vmem:[%s7855_s30 + $0x4d] sm:$0x1] %vm2571_vm13, %v4472_v47  ;;  %v5116_v20 = vpop.permute.xlu0 %5115  ;;  %3436 = vrot.lane.b32.xlu1 %v2719_v40, %s6413_s27  ;;  %v4719_v40 = vrot.slane %v4705_v35, %v7837_v56 }
 0x7df   : > { %5248 = vst.msk [vmem:[%s7855_s30 + $0x5e] sm:$0x1] %vm2571_vm13, %v5116_v20  ;;  %v4037_v19 = vrot.slane %v8960_v42, %v10368_v44 }
 0x7e0   : > { %v4311_v32 = vpop.permute.xlu1 %4310  ;;  %3246 = vrot.lane.b32.xlu0 %v2723_v31, %s10376_s26  ;;  %v8950_v4 = vrot.slane %v4719_v40, %v7837_v56  ;;  %v4721_v53 = vcombine.high %v4719_v40, %v4719_v40 }
 0x7e1   : > { %v4473_v50 = vsel %vm4462_vm1, %v4311_v32, %v4313_v30  ;;  %v4069_v32 = vrot.slane %v8985_v24, %v10368_v44 }
 0x7e2   : > { %4569 = vst.msk [vmem:[%s7855_s30 + $0x55] sm:$0x1] %vm2571_vm13, %v4473_v50  ;;  %v5120_v15 = vpop.permute.xlu0 %5119  ;;  %4334 = vrot.lane.b32.xlu1 %v4017_v6, %s6415_s29  ;;  %v4984_v30 = vrot.slane %v8950_v4, %v10367_v22  ;;  %v4752_v6 = vcombine.high %v8860_v34, %v8860_v34 }
 0x7e3   : > { %5250 = vst.msk [vmem:[%s7855_s30 + $0x6e] sm:$0x1] %vm2571_vm13, %v5120_v15  ;;  %v2727_v15 = vrot.slane %v8152_v21, %v10367_v22 }
 0x7e4   : > { %v4323_v5 = vpop.permute.xlu1 %4322  ;;  %3434 = vrot.lane.b32.xlu0 %v2715_v52, %s6413_s27  ;;  %v4980_v34 = vrot.slane %v4752_v6, %v10367_v22 }
 0x7e5   : > { %v4476_v60 = vsel %vm4462_vm1, %v4323_v5, %v4325_v8 }
 0x7e6   : > { %4572 = vst.msk [vmem:[%s7855_s30 + $0x6d] sm:$0x1] %vm2571_vm13, %v4476_v60  ;;  %v5308_v9 = vpop.permute.xlu0 %5307  ;;  %4350 = vrot.lane.b32.xlu1 %v4049_v62, %s6415_s29  ;;  %v9007_v62 = vrot.slane %v4721_v53, %v7837_v56 }
 0x7e7   : > { %5440 = vst.msk [vmem:[%s7855_s30 + $0x5f] sm:$0x1] %vm2571_vm13, %v5308_v9 }
 0x7e8   : > { %v4327_v16 = vpop.permute.xlu1 %4326  ;;  %3438 = vrot.lane.b32.xlu0 %v2723_v31, %s6413_s27  ;;  %v3703_v31 = vcombine.high %v8829_v11, %v8829_v11  ;;  %v4988_v60 = vrot.slane %v9007_v62, %v10367_v22 }
 0x7e9   : > { %v4477_v12 = vsel %vm4462_vm1, %v4327_v16, %v4329_v2 }
 0x7ea   : > { %4573 = vst.msk [vmem:[%s7855_s30 + $0x75] sm:$0x1] %vm2571_vm13, %v4477_v12  ;;  %v5312_v52 = vpop.permute.xlu0 %5311  ;;  %5129 = vrot.lane.b32.xlu1 %v4976_v27, %s6414_s22  ;;  %v8975_v8 = vrot.slane %v3703_v31, %v7837_v56 }
 0x7eb   : > { %5442 = vst.msk [vmem:[%s7855_s30 + $0x6f] sm:$0x1] %vm2571_vm13, %v5312_v52 }
 0x7ec   : > { %v5122_v18 = vpop.permute.xlu1 %5121  ;;  %4340 = vrot.lane.b32.xlu0 %v4029_v51, %s6415_s29  ;;  %v4061_v2 = vrot.slane %v8975_v8, %v10368_v44  ;;  %v2731_v51 = vrot.slane %v8171_v58, %v10367_v22  ;;  %v4057_v6 = vrot.slane %v8975_v8, %v10367_v22 }
 0x7ed   : > { %5251 = vst.msk [vmem:[%s7855_s30 + $0x76] sm:$0x1] %vm2571_vm13, %v5122_v18 }
 0x7ee   : > { %v4317_v33 = vpop.permute.xlu0 %4316  ;;  %5133 = vrot.lane.b32.xlu1 %v4984_v30, %s6414_s22 }
 0x7f0   : > { %v5314_v11 = vpop.permute.xlu1 %5313  ;;  %4344 = vrot.lane.b32.xlu0 %v4037_v19, %s6415_s29 }
 0x7f1   : > { %5443 = vst.msk [vmem:[%s7855_s30 + $0x77] sm:$0x1] %vm2571_vm13, %v5314_v11 }
 0x7f2   : > { %v4333_v57 = vpop.permute.xlu0 %4332  ;;  %5321 = vrot.lane.b32.xlu1 %v4976_v27, %s6416_s18 }
 0x7f4   : > { %4356 = vrot.lane.b32.xlu0 %v4061_v2, %s6415_s29  ;;  %v4315_v47 = vpop.permute.xlu1 %4314 }
 0x7f5   : > { %v4474_v20 = vsel %vm4462_vm1, %v4315_v47, %v4317_v33 }
 0x7f6   : > { %4570 = vst.msk [vmem:[%s7855_s30 + $0x5d] sm:$0x1] %vm2571_vm13, %v4474_v20  ;;  %v5124_v35 = vpop.permute.xlu0 %5123  ;;  %5325 = vrot.lane.b32.xlu1 %v4984_v30, %s6416_s18  ;;  %v2739_v30 = vrot.slane %v8178_v7, %v10367_v22  ;;  %v4033_v20 = vrot.slane %v8960_v42, %v10367_v22  ;;  %v4761_v42 = vrot.slane %v7964_v39, %v7837_v56 }
 0x7f7   : > { %5252 = vst.msk [vmem:[%s7855_s30 + $0x7e] sm:$0x1] %vm2571_vm13, %v5124_v35 }
 0x7f8   : > { %4360 = vrot.lane.b32.xlu0 %v4069_v32, %s6415_s29  ;;  %v4331_v50 = vpop.permute.xlu1 %4330 }
 0x7f9   : > { %v4478_v37 = vsel %vm4462_vm1, %v4331_v50, %v4333_v57  ;;  %v4025_v57 = vrot.slane %v8943_v14, %v10367_v22 }
 0x7fa   : > { %4574 = vst.msk [vmem:[%s7855_s30 + $0x7d] sm:$0x1] %vm2571_vm13, %v4478_v37  ;;  %v5316_v5 = vpop.permute.xlu0 %5315  ;;  %2864 = vrot.lane.b32.xlu1 %v2727_v15, %s10323_s16  ;;  %v4751_v37 = vcombine.high %v8950_v4, %v8950_v4  ;;  %v9104_v4 = vrot.slane %v4761_v42, %v7837_v56 }
 0x7fb   : > { %5444 = vst.msk [vmem:[%s7855_s30 + $0x7f] sm:$0x1] %vm2571_vm13, %v5316_v5 }
 0x7fc   : > { %5131 = vrot.lane.b32.xlu0 %v4980_v34, %s6414_s22  ;;  %v2845_v21 = vpop.permute.xlu1 %2844 }
 0x7fd   : > { %2972 = vst.msk [vmem:[%s7855_s30 + $0x81] sm:$0x1] %vm2571_vm13, %v2845_v21 }
 0x7fe   : > { %v2847_v40 = vpop.permute.xlu0 %2846  ;;  %2868 = vrot.lane.b32.xlu1 %v2735_v23, %s10323_s16 }
 0x7ff   : > { %2973 = vst.msk [vmem:[%s7855_s30 + $0x89] sm:$0x1] %vm2571_vm13, %v2847_v40 }
 0x800   : > { %5135 = vrot.lane.b32.xlu0 %v4988_v60, %s6414_s22  ;;  %v3037_v9 = vpop.permute.xlu1 %3036 }
 0x801   : > { %3164 = vst.msk [vmem:[%s7855_s30 + $0x82] sm:$0x1] %vm2571_vm13, %v3037_v9  ;;  %v9119_v9 = vcombine.high %v8975_v8, %v8975_v8 }
 0x802   : > { %v3039_v16 = vpop.permute.xlu0 %3038  ;;  %3056 = vrot.lane.b32.xlu1 %v2727_v15, %s10324_s17 }
 0x803   : > { %3165 = vst.msk [vmem:[%s7855_s30 + $0x8a] sm:$0x1] %vm2571_vm13, %v3039_v16  ;;  %v4077_v8 = vrot.slane %v9119_v9, %v10368_v44 }
 0x804   : > { %5323 = vrot.lane.b32.xlu0 %v4980_v34, %s6416_s18  ;;  %v3229_v28 = vpop.permute.xlu1 %3228  ;;  %v9097_v34 = vcombine.high %v8943_v14, %v8943_v14 }
 0x805   : > { %3356 = vst.msk [vmem:[%s7855_s30 + $0x83] sm:$0x1] %vm2571_vm13, %v3229_v28  ;;  %v5000_v28 = vrot.slane %v9104_v4, %v10367_v22 }
 0x806   : > { %v3231_v27 = vpop.permute.xlu0 %3230  ;;  %3060 = vrot.lane.b32.xlu1 %v2735_v23, %s10324_s17 }
 0x807   : > { %3357 = vst.msk [vmem:[%s7855_s30 + $0x8b] sm:$0x1] %vm2571_vm13, %v3231_v27  ;;  %v10387_v27 = vcombine.high %v7961_v63, %v7964_v39 }
 0x808   : > { %5327 = vrot.lane.b32.xlu0 %v4988_v60, %s6416_s18  ;;  %v3421_v12 = vpop.permute.xlu1 %3420  ;;  %v4045_v60 = vrot.slane %v9097_v34, %v10368_v44 }
 0x809   : > { %3548 = vst.msk [vmem:[%s7855_s30 + $0x84] sm:$0x1] %vm2571_vm13, %v3421_v12  ;;  %v9132_v12 = vrot.slane %v10387_v27, %v7837_v56  ;;  %v4041_v27 = vrot.slane %v9097_v34, %v10367_v22 }
 0x80a   : > { %v3423_v52 = vpop.permute.xlu0 %3422  ;;  %3248 = vrot.lane.b32.xlu1 %v2727_v15, %s10376_s26 }
 0x80b   : > { %3549 = vst.msk [vmem:[%s7855_s30 + $0x8c] sm:$0x1] %vm2571_vm13, %v3423_v52 }
 0x80c   : > { %2866 = vrot.lane.b32.xlu0 %v2731_v51, %s10323_s16  ;;  %v2849_v31 = vpop.permute.xlu1 %2848 }
 0x80d   : > { %2974 = vst.msk [vmem:[%s7855_s30 + $0x91] sm:$0x1] %vm2571_vm13, %v2849_v31 }
 0x80e   : > { %v2851_v18 = vpop.permute.xlu0 %2850  ;;  %3252 = vrot.lane.b32.xlu1 %v2735_v23, %s10376_s26 }
 0x80f   : > { %2975 = vst.msk [vmem:[%s7855_s30 + $0x99] sm:$0x1] %vm2571_vm13, %v2851_v18 }
 0x810   : > { %2870 = vrot.lane.b32.xlu0 %v2739_v30, %s10323_s16  ;;  %v2853_v58 = vpop.permute.xlu1 %2852 }
 0x811   : > { %2976 = vst.msk [vmem:[%s7855_s30 + $0xa1] sm:$0x1] %vm2571_vm13, %v2853_v58 }
 0x812   : > { %v2855_v33 = vpop.permute.xlu0 %2854  ;;  %3440 = vrot.lane.b32.xlu1 %v2727_v15, %s6413_s27  ;;  %v4065_v15 = vrot.slane %v8985_v24, %v10367_v22  ;;  %v4992_v24 = vrot.slane %v4751_v37, %v10367_v22 }
 0x813   : > { %2977 = vst.msk [vmem:[%s7855_s30 + $0xa9] sm:$0x1] %vm2571_vm13, %v2855_v33 }
 0x814   : > { %3058 = vrot.lane.b32.xlu0 %v2731_v51, %s10324_s17  ;;  %v3041_v19 = vpop.permute.xlu1 %3040 }
 0x815   : > { %3166 = vst.msk [vmem:[%s7855_s30 + $0x92] sm:$0x1] %vm2571_vm13, %v3041_v19 }
 0x816   : > { %v3043_v7 = vpop.permute.xlu0 %3042  ;;  %3444 = vrot.lane.b32.xlu1 %v2735_v23, %s6413_s27  ;;  %v10386_v23 = vcombine.low %v7961_v63, %v7964_v39 }
 0x817   : > { %3167 = vst.msk [vmem:[%s7855_s30 + $0x9a] sm:$0x1] %vm2571_vm13, %v3043_v7  ;;  %v4753_v7 = vcombine.high %v9007_v62, %v9007_v62 }
 0x818   : > { %3062 = vrot.lane.b32.xlu0 %v2739_v30, %s10324_s17  ;;  %v3045_v11 = vpop.permute.xlu1 %3044  ;;  %v9112_v40 = vrot.slane %v10386_v23, %v7837_v56  ;;  %v2755_v23 = vrot.slane %v8201_v25, %v10367_v22 }
 0x819   : > { %3168 = vst.msk [vmem:[%s7855_s30 + $0xa2] sm:$0x1] %vm2571_vm13, %v3045_v11  ;;  %v4769_v11 = vcombine.high %v4761_v42, %v4761_v42 }
 0x81a   : > { %v3047_v2 = vpop.permute.xlu0 %3046  ;;  %4338 = vrot.lane.b32.xlu1 %v4025_v57, %s6415_s29 }
 0x81b   : > { %3169 = vst.msk [vmem:[%s7855_s30 + $0xaa] sm:$0x1] %vm2571_vm13, %v3047_v2  ;;  %v2743_v2 = vrot.slane %v8189_v59, %v10367_v22  ;;  %v9173_v62 = vrot.slane %v4769_v11, %v7837_v56  ;;  %v2751_v59 = vrot.slane %v8194_v46, %v10367_v22  ;;  %v4799_v11 = vcombine.high %v9104_v4, %v9104_v4 }
 0x81c   : > { %3250 = vrot.lane.b32.xlu0 %v2731_v51, %s10376_s26  ;;  %v3233_v47 = vpop.permute.xlu1 %3232 }
 0x81d   : > { %3358 = vst.msk [vmem:[%s7855_s30 + $0x93] sm:$0x1] %vm2571_vm13, %v3233_v47 }
 0x81e   : > { %v3235_v35 = vpop.permute.xlu0 %3234  ;;  %4342 = vrot.lane.b32.xlu1 %v4033_v20, %s6415_s29  ;;  %v4996_v20 = vrot.slane %v4753_v7, %v10367_v22 }
 0x81f   : > { %3359 = vst.msk [vmem:[%s7855_s30 + $0x9b] sm:$0x1] %vm2571_vm13, %v3235_v35 }
 0x820   : > { %3254 = vrot.lane.b32.xlu0 %v2739_v30, %s10376_s26  ;;  %v3237_v32 = vpop.permute.xlu1 %3236 }
 0x821   : > { %3360 = vst.msk [vmem:[%s7855_s30 + $0xa3] sm:$0x1] %vm2571_vm13, %v3237_v32 }
 0x822   : > { %v3239_v53 = vpop.permute.xlu0 %3238  ;;  %4354 = vrot.lane.b32.xlu1 %v4057_v6, %s6415_s29  ;;  %v5004_v6 = vrot.slane %v9173_v62, %v10367_v22 }
 0x823   : > { %3361 = vst.msk [vmem:[%s7855_s30 + $0xab] sm:$0x1] %vm2571_vm13, %v3239_v53 }
 0x824   : > { %3442 = vrot.lane.b32.xlu0 %v2731_v51, %s6413_s27  ;;  %v3425_v50 = vpop.permute.xlu1 %3424  ;;  %v9141_v51 = vrot.slane %v9112_v40, %v7837_v56 }
 0x825   : > { %3550 = vst.msk [vmem:[%s7855_s30 + $0x94] sm:$0x1] %vm2571_vm13, %v3425_v50 }
 0x826   : > { %v3427_v5 = vpop.permute.xlu0 %3426  ;;  %4358 = vrot.lane.b32.xlu1 %v4065_v15, %s6415_s29  ;;  %v4085_v18 = vrot.slane %v9141_v51, %v10368_v44 }
 0x827   : > { %3551 = vst.msk [vmem:[%s7855_s30 + $0x9c] sm:$0x1] %vm2571_vm13, %v3427_v5  ;;  %v2747_v5 = vrot.slane %v8198_v54, %v10367_v22 }
 0x828   : > { %3446 = vrot.lane.b32.xlu0 %v2739_v30, %s6413_s27  ;;  %v3429_v21 = vpop.permute.xlu1 %3428  ;;  %v9153_v30 = vrot.slane %v9132_v12, %v7837_v56 }
 0x829   : > { %3552 = vst.msk [vmem:[%s7855_s30 + $0xa4] sm:$0x1] %vm2571_vm13, %v3429_v21 }
 0x82a   : > { %v3431_v14 = vpop.permute.xlu0 %3430  ;;  %5137 = vrot.lane.b32.xlu1 %v4992_v24, %s6414_s22  ;;  %v4117_v19 = vrot.slane %v9153_v30, %v10368_v44 }
 0x82b   : > { %3553 = vst.msk [vmem:[%s7855_s30 + $0xac] sm:$0x1] %vm2571_vm13, %v3431_v14 }
 0x82c   : > { %4348 = vrot.lane.b32.xlu0 %v4045_v60, %s6415_s29  ;;  %v5126_v16 = vpop.permute.xlu1 %5125 }
 0x82d   : > { %5253 = vst.msk [vmem:[%s7855_s30 + $0x86] sm:$0x1] %vm2571_vm13, %v5126_v16 }
 0x82e   : > { %v9134_v52 = vpop.permute.xlu0 %4336  ;;  %5141 = vrot.lane.b32.xlu1 %v5000_v28, %s6414_s22 }
 0x830   : > { %4364 = vrot.lane.b32.xlu0 %v4077_v8, %s6415_s29  ;;  %v5318_v31 = vpop.permute.xlu1 %5317 }
 0x831   : > { %5445 = vst.msk [vmem:[%s7855_s30 + $0x87] sm:$0x1] %vm2571_vm13, %v5318_v31 }
 0x832   : > { %v9146_v63 = vpop.permute.xlu0 %4352  ;;  %5329 = vrot.lane.b32.xlu1 %v4992_v24, %s6416_s18 }
 0x834   : > { %4368 = vrot.lane.b32.xlu0 %v4085_v18, %s6415_s29  ;;  %v2857_v58 = vpop.permute.xlu1 %2856  ;;  %v4073_v18 = vrot.slane %v9119_v9, %v10367_v22  ;;  %v3752_v9 = vcombine.high %v9112_v40, %v9112_v40 }
 0x835   : > { %2978 = vst.msk [vmem:[%s7855_s30 + $0xb1] sm:$0x1] %vm2571_vm13, %v2857_v58 }
 0x836   : > { %v5128_v33 = vpop.permute.xlu0 %5127  ;;  %5333 = vrot.lane.b32.xlu1 %v5000_v28, %s6416_s18  ;;  %v9271_v40 = vrot.slane %v3752_v9, %v7837_v56 }
 0x837   : > { %5254 = vst.msk [vmem:[%s7855_s30 + $0x8e] sm:$0x1] %vm2571_vm13, %v5128_v33  ;;  %v4081_v33 = vrot.slane %v9141_v51, %v10367_v22 }
 0x838   : > { %4384 = vrot.lane.b32.xlu0 %v4117_v19, %s6415_s29  ;;  %v2861_v57 = vpop.permute.xlu1 %2860 }
 0x839   : > { %2980 = vst.msk [vmem:[%s7855_s30 + $0xc1] sm:$0x1] %vm2571_vm13, %v2861_v57 }
 0x83a   : > { %v5320_v47 = vpop.permute.xlu0 %5319  ;;  %2872 = vrot.lane.b32.xlu1 %v2743_v2, %s10323_s16 }
 0x83b   : > { %5446 = vst.msk [vmem:[%s7855_s30 + $0x8f] sm:$0x1] %vm2571_vm13, %v5320_v47 }
 0x83c   : > { %5139 = vrot.lane.b32.xlu0 %v4996_v20, %s6414_s22  ;;  %v3049_v35 = vpop.permute.xlu1 %3048 }
 0x83d   : > { %3170 = vst.msk [vmem:[%s7855_s30 + $0xb2] sm:$0x1] %vm2571_vm13, %v3049_v35 }
 0x83e   : > { %v2859_v32 = vpop.permute.xlu0 %2858  ;;  %2876 = vrot.lane.b32.xlu1 %v2751_v59, %s10323_s16 }
 0x83f   : > { %2979 = vst.msk [vmem:[%s7855_s30 + $0xb9] sm:$0x1] %vm2571_vm13, %v2859_v32  ;;  %v9287_v32 = vcombine.high %v9141_v51, %v9141_v51 }
 0x840   : > { %5143 = vrot.lane.b32.xlu0 %v5004_v6, %s6414_s22  ;;  %v3053_v53 = vpop.permute.xlu1 %3052 }
 0x841   : > { %3172 = vst.msk [vmem:[%s7855_s30 + $0xc2] sm:$0x1] %vm2571_vm13, %v3053_v53  ;;  %v4101_v51 = vrot.slane %v9287_v32, %v10368_v44 }
 0x842   : > { %v2863_v42 = vpop.permute.xlu0 %2862  ;;  %3064 = vrot.lane.b32.xlu1 %v2743_v2, %s10324_s17 }
 0x843   : > { %2981 = vst.msk [vmem:[%s7855_s30 + $0xc9] sm:$0x1] %vm2571_vm13, %v2863_v42 }
 0x844   : > { %5331 = vrot.lane.b32.xlu0 %v4996_v20, %s6416_s18  ;;  %v3241_v46 = vpop.permute.xlu1 %3240  ;;  %v5008_v20 = vrot.slane %v4799_v11, %v10367_v22  ;;  %v2771_v11 = vrot.slane %v8247_v55, %v10367_v22 }
 0x845   : > { %3362 = vst.msk [vmem:[%s7855_s30 + $0xb3] sm:$0x1] %vm2571_vm13, %v3241_v46 }
 0x846   : > { %v3051_v50 = vpop.permute.xlu0 %3050  ;;  %3068 = vrot.lane.b32.xlu1 %v2751_v59, %s10324_s17 }
 0x847   : > { %3171 = vst.msk [vmem:[%s7855_s30 + $0xba] sm:$0x1] %vm2571_vm13, %v3051_v50 }
 0x848   : > { %5335 = vrot.lane.b32.xlu0 %v5004_v6, %s6416_s18  ;;  %v3245_v15 = vpop.permute.xlu1 %3244  ;;  %v3753_v6 = vcombine.high %v9132_v12, %v9132_v12 }
 0x849   : > { %3364 = vst.msk [vmem:[%s7855_s30 + $0xc3] sm:$0x1] %vm2571_vm13, %v3245_v15 }
 0x84a   : > { %v3055_v37 = vpop.permute.xlu0 %3054  ;;  %3256 = vrot.lane.b32.xlu1 %v2743_v2, %s10376_s26  ;;  %v9300_v50 = vrot.slane %v3753_v6, %v7837_v56 }
 0x84b   : > { %3173 = vst.msk [vmem:[%s7855_s30 + $0xca] sm:$0x1] %vm2571_vm13, %v3055_v37 }
 0x84c   : > { %2874 = vrot.lane.b32.xlu0 %v2747_v5, %s10323_s16  ;;  %v3433_v21 = vpop.permute.xlu1 %3432  ;;  %v4125_v37 = vrot.slane %v9300_v50, %v10368_v44 }
 0x84d   : > { %3554 = vst.msk [vmem:[%s7855_s30 + $0xb4] sm:$0x1] %vm2571_vm13, %v3433_v21 }
 0x84e   : > { %v3243_v24 = vpop.permute.xlu0 %3242  ;;  %3260 = vrot.lane.b32.xlu1 %v2751_v59, %s10376_s26 }
 0x84f   : > { %3363 = vst.msk [vmem:[%s7855_s30 + $0xbb] sm:$0x1] %vm2571_vm13, %v3243_v24 }
 0x850   : > { %2878 = vrot.lane.b32.xlu0 %v2755_v23, %s10323_s16  ;;  %v3437_v54 = vpop.permute.xlu1 %3436 }
 0x851   : > { %3556 = vst.msk [vmem:[%s7855_s30 + $0xc4] sm:$0x1] %vm2571_vm13, %v3437_v54  ;;  %v4801_v54 = vcombine.high %v9173_v62, %v9173_v62 }
 0x852   : > { %v3247_v14 = vpop.permute.xlu0 %3246  ;;  %3448 = vrot.lane.b32.xlu1 %v2743_v2, %s6413_s27 }
 0x853   : > { %3365 = vst.msk [vmem:[%s7855_s30 + $0xcb] sm:$0x1] %vm2571_vm13, %v3247_v14 }
 0x854   : > { %3066 = vrot.lane.b32.xlu0 %v2747_v5, %s10324_s17  ;;  %v4335_v60 = vpop.permute.xlu1 %4334 }
 0x855   : > { %v4479_v25 = vsel %vm4462_vm1, %v4335_v60, %v9134_v52  ;;  %v2759_v60 = vrot.slane %v8223_v10, %v10367_v22  ;;  %v2767_v10 = vrot.slane %v8232_v36, %v10367_v22 }
 0x856   : > { %4575 = vst.msk [vmem:[%s7855_s30 + $0x85] sm:$0x1] %vm2571_vm13, %v4479_v25  ;;  %v3435_v16 = vpop.permute.xlu0 %3434  ;;  %3452 = vrot.lane.b32.xlu1 %v2751_v59, %s6413_s27  ;;  %v4093_v59 = vrot.slane %v9271_v40, %v10368_v44 }
 0x857   : > { %3555 = vst.msk [vmem:[%s7855_s30 + $0xbc] sm:$0x1] %vm2571_vm13, %v3435_v16  ;;  %v5012_v16 = vrot.slane %v4801_v54, %v10367_v22 }
 0x858   : > { %3070 = vrot.lane.b32.xlu0 %v2755_v23, %s10324_s17  ;;  %v4351_v28 = vpop.permute.xlu1 %4350 }
 0x859   : > { %v4483_v8 = vsel %vm4462_vm1, %v4351_v28, %v9146_v63  ;;  %v4754_v63 = vcombine.high %v7964_v39, %v7964_v39  ;;  %v4113_v39 = vrot.slane %v9153_v30, %v10367_v22 }
 0x85a   : > { %4579 = vst.msk [vmem:[%s7855_s30 + $0xa5] sm:$0x1] %vm2571_vm13, %v4483_v8  ;;  %v3439_v52 = vpop.permute.xlu0 %3438  ;;  %4346 = vrot.lane.b32.xlu1 %v4041_v27, %s6415_s29 }
 0x85b   : > { %3557 = vst.msk [vmem:[%s7855_s30 + $0xcc] sm:$0x1] %vm2571_vm13, %v3439_v52  ;;  %v4768_v57 = vrot.slane %v4754_v63, %v7837_v56 }
 0x85c   : > { %3258 = vrot.lane.b32.xlu0 %v2747_v5, %s10376_s26  ;;  %v5130_v31 = vpop.permute.xlu1 %5129 }
 0x85d   : > { %5255 = vst.msk [vmem:[%s7855_s30 + $0x96] sm:$0x1] %vm2571_vm13, %v5130_v31  ;;  %v9276_v4 = vrot.slane %v4768_v57, %v7837_v56 }
 0x85e   : > { %v9244_v34 = vpop.permute.xlu0 %4340  ;;  %4362 = vrot.lane.b32.xlu1 %v4073_v18, %s6415_s29 }
 0x85f   : > { %v5016_v42 = vrot.slane %v9276_v4, %v10367_v22 }
 0x860   : > { %3262 = vrot.lane.b32.xlu0 %v2755_v23, %s10376_s26  ;;  %v5134_v58 = vpop.permute.xlu1 %5133 }
 0x861   : > { %5257 = vst.msk [vmem:[%s7855_s30 + $0xa6] sm:$0x1] %vm2571_vm13, %v5134_v58 }
 0x862   : > { %v9254_v19 = vpop.permute.xlu0 %4344  ;;  %4366 = vrot.lane.b32.xlu1 %v4081_v33, %s6415_s29  ;;  %v2763_v33 = vrot.slane %v8237_v41, %v10367_v22 }
 0x864   : > { %3450 = vrot.lane.b32.xlu0 %v2747_v5, %s6413_s27  ;;  %v5322_v7 = vpop.permute.xlu1 %5321  ;;  %v9312_v5 = vcombine.high %v9153_v30, %v9153_v30  ;;  %v4770_v30 = vcombine.high %v4768_v57, %v4768_v57 }
 0x865   : > { %5447 = vst.msk [vmem:[%s7855_s30 + $0x97] sm:$0x1] %vm2571_vm13, %v5322_v7 }
 0x866   : > { %v9267_v2 = vpop.permute.xlu0 %4356  ;;  %4382 = vrot.lane.b32.xlu1 %v4113_v39, %s6415_s29  ;;  %v9334_v62 = vrot.slane %v4770_v30, %v7837_v56 }
 0x868   : > { %3454 = vrot.lane.b32.xlu0 %v2755_v23, %s6413_s27  ;;  %v5326_v47 = vpop.permute.xlu1 %5325  ;;  %v4133_v23 = vrot.slane %v9312_v5, %v10368_v44  ;;  %v5020_v8 = vrot.slane %v9334_v62, %v10367_v22 }
 0x869   : > { %5449 = vst.msk [vmem:[%s7855_s30 + $0xa7] sm:$0x1] %vm2571_vm13, %v5326_v47 }
 0x86a   : > { %v9280_v35 = vpop.permute.xlu0 %4360  ;;  %5145 = vrot.lane.b32.xlu1 %v5008_v20, %s6414_s22 }
 0x86c   : > { %4372 = vrot.lane.b32.xlu0 %v4093_v59, %s6415_s29  ;;  %v2865_v53 = vpop.permute.xlu1 %2864  ;;  %v4089_v59 = vrot.slane %v9271_v40, %v10367_v22 }
 0x86d   : > { %2982 = vst.msk [vmem:[%s7855_s30 + $0xd1] sm:$0x1] %vm2571_vm13, %v2865_v53 }
 0x86e   : > { %v5132_v46 = vpop.permute.xlu0 %5131  ;;  %5149 = vrot.lane.b32.xlu1 %v5016_v42, %s6414_s22 }
 0x86f   : > { %5256 = vst.msk [vmem:[%s7855_s30 + $0x9e] sm:$0x1] %vm2571_vm13, %v5132_v46 }
 0x870   : > { %4376 = vrot.lane.b32.xlu0 %v4101_v51, %s6415_s29  ;;  %v2869_v12 = vpop.permute.xlu1 %2868  ;;  %v4121_v51 = vrot.slane %v9300_v50, %v10367_v22 }
 0x871   : > { %2984 = vst.msk [vmem:[%s7855_s30 + $0xe1] sm:$0x1] %vm2571_vm13, %v2869_v12 }
 0x872   : > { %v5136_v15 = vpop.permute.xlu0 %5135  ;;  %5337 = vrot.lane.b32.xlu1 %v5008_v20, %s6416_s18 }
 0x873   : > { %5258 = vst.msk [vmem:[%s7855_s30 + $0xae] sm:$0x1] %vm2571_vm13, %v5136_v15 }
 0x874   : > { %4388 = vrot.lane.b32.xlu0 %v4125_v37, %s6415_s29  ;;  %v3057_v21 = vpop.permute.xlu1 %3056  ;;  %v4129_v37 = vrot.slane %v9312_v5, %v10367_v22 }
 0x875   : > { %3174 = vst.msk [vmem:[%s7855_s30 + $0xd2] sm:$0x1] %vm2571_vm13, %v3057_v21  ;;  %v4800_v21 = vcombine.high %v9276_v4, %v9276_v4  ;;  %v10388_v4 = vcombine.low %v7983_v13, %v7986_v48 }
 0x876   : > { %v5324_v24 = vpop.permute.xlu0 %5323  ;;  %5341 = vrot.lane.b32.xlu1 %v5016_v42, %s6416_s18  ;;  %v4097_v42 = vrot.slane %v9287_v32, %v10367_v22  ;;  %v4810_v32 = vrot.slane %v7986_v48, %v7837_v56 }
 0x877   : > { %5448 = vst.msk [vmem:[%s7855_s30 + $0x9f] sm:$0x1] %vm2571_vm13, %v5324_v24  ;;  %v5024_v30 = vrot.slane %v4800_v21, %v10367_v22 }
 0x878   : > { %4392 = vrot.lane.b32.xlu0 %v4133_v23, %s6415_s29  ;;  %v3061_v14 = vpop.permute.xlu1 %3060  ;;  %v9434_v23 = vcombine.high %v9271_v40, %v9271_v40  ;;  %v9439_v5 = vrot.slane %v4810_v32, %v7837_v56 }
 0x879   : > { %3176 = vst.msk [vmem:[%s7855_s30 + $0xe2] sm:$0x1] %vm2571_vm13, %v3061_v14  ;;  %v9447_v14 = vrot.slane %v10388_v4, %v7837_v56 }
 0x87a   : > { %v5328_v25 = vpop.permute.xlu0 %5327  ;;  %2880 = vrot.lane.b32.xlu1 %v2759_v60, %s10323_s16  ;;  %v4109_v40 = vrot.slane %v9434_v23, %v10368_v44 }
 0x87b   : > { %5450 = vst.msk [vmem:[%s7855_s30 + $0xaf] sm:$0x1] %vm2571_vm13, %v5328_v25  ;;  %v9456_v25 = vcombine.high %v9300_v50, %v9300_v50 }
 0x87c   : > { %5147 = vrot.lane.b32.xlu0 %v5012_v16, %s6414_s22  ;;  %v3249_v28 = vpop.permute.xlu1 %3248 }
 0x87d   : > { %3366 = vst.msk [vmem:[%s7855_s30 + $0xd3] sm:$0x1] %vm2571_vm13, %v3249_v28  ;;  %v5032_v28 = vrot.slane %v9439_v5, %v10367_v22  ;;  %v4141_v50 = vrot.slane %v9456_v25, %v10368_v44 }
 0x87e   : > { %v2867_v27 = vpop.permute.xlu0 %2866  ;;  %2884 = vrot.lane.b32.xlu1 %v2767_v10, %s10323_s16 }
 0x87f   : > { %2983 = vst.msk [vmem:[%s7855_s30 + $0xd9] sm:$0x1] %vm2571_vm13, %v2867_v27 }
 0x880   : > { %5151 = vrot.lane.b32.xlu0 %v5020_v8, %s6414_s22  ;;  %v3253_v52 = vpop.permute.xlu1 %3252 }
 0x881   : > { %3368 = vst.msk [vmem:[%s7855_s30 + $0xe3] sm:$0x1] %vm2571_vm13, %v3253_v52  ;;  %v9474_v52 = vrot.slane %v9447_v14, %v7837_v56 }
 0x882   : > { %v2871_v31 = vpop.permute.xlu0 %2870  ;;  %3072 = vrot.lane.b32.xlu1 %v2759_v60, %s10324_s17 }
 0x883   : > { %2985 = vst.msk [vmem:[%s7855_s30 + $0xe9] sm:$0x1] %vm2571_vm13, %v2871_v31 }
 0x884   : > { %5339 = vrot.lane.b32.xlu0 %v5012_v16, %s6416_s18  ;;  %v3441_v36 = vpop.permute.xlu1 %3440 }
 0x885   : > { %3558 = vst.msk [vmem:[%s7855_s30 + $0xd4] sm:$0x1] %vm2571_vm13, %v3441_v36  ;;  %v4149_v36 = vrot.slane %v9474_v52, %v10368_v44 }
 0x886   : > { %v3059_v18 = vpop.permute.xlu0 %3058  ;;  %3076 = vrot.lane.b32.xlu1 %v2767_v10, %s10324_s17 }
 0x887   : > { %3175 = vst.msk [vmem:[%s7855_s30 + $0xda] sm:$0x1] %vm2571_vm13, %v3059_v18 }
 0x888   : > { %5343 = vrot.lane.b32.xlu0 %v5020_v8, %s6416_s18  ;;  %v3445_v63 = vpop.permute.xlu1 %3444 }
 0x889   : > { %3560 = vst.msk [vmem:[%s7855_s30 + $0xe4] sm:$0x1] %vm2571_vm13, %v3445_v63 }
 0x88a   : > { %v3063_v58 = vpop.permute.xlu0 %3062  ;;  %3264 = vrot.lane.b32.xlu1 %v2759_v60, %s10376_s26 }
 0x88b   : > { %3177 = vst.msk [vmem:[%s7855_s30 + $0xea] sm:$0x1] %vm2571_vm13, %v3063_v58 }
 0x88c   : > { %2882 = vrot.lane.b32.xlu0 %v2763_v33, %s10323_s16  ;;  %v4339_v9 = vpop.permute.xlu1 %4338 }
 0x88d   : > { %v4480_v7 = vsel %vm4462_vm1, %v4339_v9, %v9244_v34  ;;  %v4802_v9 = vcombine.high %v9334_v62, %v9334_v62 }
 0x88e   : > { %4576 = vst.msk [vmem:[%s7855_s30 + $0x8d] sm:$0x1] %vm2571_vm13, %v4480_v7  ;;  %v3251_v39 = vpop.permute.xlu0 %3250  ;;  %3268 = vrot.lane.b32.xlu1 %v2767_v10, %s10376_s26  ;;  %v4818_v7 = vcombine.high %v4810_v32, %v4810_v32  ;;  %v2787_v32 = vrot.slane %v8271_v1, %v10367_v22 }
 0x88f   : > { %3367 = vst.msk [vmem:[%s7855_s30 + $0xdb] sm:$0x1] %vm2571_vm13, %v3251_v39 }
 0x890   : > { %2886 = vrot.lane.b32.xlu0 %v2771_v11, %s10323_s16  ;;  %v4343_v41 = vpop.permute.xlu1 %4342  ;;  %v9508_v62 = vrot.slane %v4818_v7, %v7837_v56 }
 0x891   : > { %v4481_v57 = vsel %vm4462_vm1, %v4343_v41, %v9254_v19 }
 0x892   : > { %4577 = vst.msk [vmem:[%s7855_s30 + $0x95] sm:$0x1] %vm2571_vm13, %v4481_v57  ;;  %v3255_v34 = vpop.permute.xlu0 %3254  ;;  %3456 = vrot.lane.b32.xlu1 %v2759_v60, %s6413_s27  ;;  %v5028_v57 = vrot.slane %v4802_v9, %v10367_v22  ;;  %v9626_v9 = vcombine.high %v9474_v52, %v9474_v52 }
 0x893   : > { %3369 = vst.msk [vmem:[%s7855_s30 + $0xeb] sm:$0x1] %vm2571_vm13, %v3255_v34 }
 0x894   : > { %3074 = vrot.lane.b32.xlu0 %v2763_v33, %s10324_s17  ;;  %v4355_v55 = vpop.permute.xlu1 %4354 }
 0x895   : > { %v4484_v47 = vsel %vm4462_vm1, %v4355_v55, %v9267_v2 }
 0x896   : > { %4580 = vst.msk [vmem:[%s7855_s30 + $0xad] sm:$0x1] %vm2571_vm13, %v4484_v47  ;;  %v3443_v20 = vpop.permute.xlu0 %3442  ;;  %3460 = vrot.lane.b32.xlu1 %v2767_v10, %s6413_s27  ;;  %v10389_v10 = vcombine.high %v7983_v13, %v7986_v48  ;;  %v5036_v47 = vrot.slane %v9508_v62, %v10367_v22 }
 0x897   : > { %3559 = vst.msk [vmem:[%s7855_s30 + $0xdc] sm:$0x1] %vm2571_vm13, %v3443_v20 }
 0x898   : > { %3078 = vrot.lane.b32.xlu0 %v2771_v11, %s10324_s17  ;;  %v4359_v19 = vpop.permute.xlu1 %4358  ;;  %v9467_v27 = vrot.slane %v10389_v10, %v7837_v56 }
 0x899   : > { %v4485_v6 = vsel %vm4462_vm1, %v4359_v19, %v9280_v35 }
 0x89a   : > { %4581 = vst.msk [vmem:[%s7855_s30 + $0xb5] sm:$0x1] %vm2571_vm13, %v4485_v6  ;;  %v3447_v2 = vpop.permute.xlu0 %3446  ;;  %4370 = vrot.lane.b32.xlu1 %v4089_v59, %s6415_s29  ;;  %v9486_v18 = vrot.slane %v9467_v27, %v7837_v56  ;;  %v3803_v7 = vcombine.high %v9467_v27, %v9467_v27 }
 0x89b   : > { %3561 = vst.msk [vmem:[%s7855_s30 + $0xec] sm:$0x1] %vm2571_vm13, %v3447_v2 }
 0x89c   : > { %3266 = vrot.lane.b32.xlu0 %v2763_v33, %s10376_s26  ;;  %v5138_v53 = vpop.permute.xlu1 %5137 }
 0x89d   : > { %5259 = vst.msk [vmem:[%s7855_s30 + $0xb6] sm:$0x1] %vm2571_vm13, %v5138_v53  ;;  %v2779_v53 = vrot.slane %v8268_v61, %v10367_v22 }
 0x89e   : > { %v9409_v46 = vpop.permute.xlu0 %4348  ;;  %4374 = vrot.lane.b32.xlu1 %v4097_v42, %s6415_s29 }
 0x8a0   : > { %3270 = vrot.lane.b32.xlu0 %v2771_v11, %s10376_s26  ;;  %v5142_v35 = vpop.permute.xlu1 %5141 }
 0x8a1   : > { %5261 = vst.msk [vmem:[%s7855_s30 + $0xc6] sm:$0x1] %vm2571_vm13, %v5142_v35 }
 0x8a2   : > { %v9417_v12 = vpop.permute.xlu0 %4364  ;;  %4386 = vrot.lane.b32.xlu1 %v4121_v51, %s6415_s29 }
 0x8a4   : > { %3458 = vrot.lane.b32.xlu0 %v2763_v33, %s6413_s27  ;;  %v5330_v15 = vpop.permute.xlu1 %5329  ;;  %v4181_v33 = vrot.slane %v9486_v18, %v10368_v44 }
 0x8a5   : > { %5451 = vst.msk [vmem:[%s7855_s30 + $0xb7] sm:$0x1] %vm2571_vm13, %v5330_v15 }
 0x8a6   : > { %v9429_v24 = vpop.permute.xlu0 %4368  ;;  %4390 = vrot.lane.b32.xlu1 %v4129_v37, %s6415_s29 }
 0x8a8   : > { %3462 = vrot.lane.b32.xlu0 %v2771_v11, %s6413_s27  ;;  %v5334_v54 = vpop.permute.xlu1 %5333  ;;  %v2775_v11 = vrot.slane %v8255_v26, %v10367_v22  ;;  %v2783_v26 = vrot.slane %v8261_v38, %v10367_v22 }
 0x8a9   : > { %5453 = vst.msk [vmem:[%s7855_s30 + $0xc7] sm:$0x1] %vm2571_vm13, %v5334_v54  ;;  %v4105_v54 = vrot.slane %v9434_v23, %v10367_v22 }
 0x8aa   : > { %v9449_v60 = vpop.permute.xlu0 %4384  ;;  %5153 = vrot.lane.b32.xlu1 %v5024_v30, %s6414_s22 }
 0x8ac   : > { %4380 = vrot.lane.b32.xlu0 %v4109_v40, %s6415_s29  ;;  %v2873_v16 = vpop.permute.xlu1 %2872  ;;  %v4137_v40 = vrot.slane %v9456_v25, %v10367_v22  ;;  %v3802_v25 = vcombine.high %v9447_v14, %v9447_v14 }
 0x8ad   : > { %2986 = vst.msk [vmem:[%s7855_s30 + $0xf1] sm:$0x1] %vm2571_vm13, %v2873_v16 }
 0x8ae   : > { %v5140_v8 = vpop.permute.xlu0 %5139  ;;  %5157 = vrot.lane.b32.xlu1 %v5032_v28, %s6414_s22  ;;  %v9610_v14 = vrot.slane %v3802_v25, %v7837_v56 }
 0x8af   : > { %5260 = vst.msk [vmem:[%s7855_s30 + $0xbe] sm:$0x1] %vm2571_vm13, %v5140_v8 }
 0x8b0   : > { %4396 = vrot.lane.b32.xlu0 %v4141_v50, %s6415_s29  ;;  %v2877_v31 = vpop.permute.xlu1 %2876  ;;  %v4848_v50 = vcombine.high %v9439_v5, %v9439_v5 }
 0x8b1   : > { %2988 = vst.msk [vmem:[%s7855_s30 + $0x101] sm:$0x1] %vm2571_vm13, %v2877_v31 }
 0x8b2   : > { %v5144_v13 = vpop.permute.xlu0 %5143  ;;  %5345 = vrot.lane.b32.xlu1 %v5024_v30, %s6416_s18 }
 0x8b3   : > { %5262 = vst.msk [vmem:[%s7855_s30 + $0xce] sm:$0x1] %vm2571_vm13, %v5144_v13 }
 0x8b4   : > { %4400 = vrot.lane.b32.xlu0 %v4149_v36, %s6415_s29  ;;  %v3065_v63 = vpop.permute.xlu1 %3064 }
 0x8b5   : > { %3178 = vst.msk [vmem:[%s7855_s30 + $0xf2] sm:$0x1] %vm2571_vm13, %v3065_v63  ;;  %v5040_v63 = vrot.slane %v4848_v50, %v10367_v22 }
 0x8b6   : > { %v5332_v58 = vpop.permute.xlu0 %5331  ;;  %5349 = vrot.lane.b32.xlu1 %v5032_v28, %s6416_s18  ;;  %v4145_v28 = vrot.slane %v9474_v52, %v10367_v22  ;;  %v4165_v52 = vrot.slane %v9626_v9, %v10368_v44 }
 0x8b7   : > { %5452 = vst.msk [vmem:[%s7855_s30 + $0xbf] sm:$0x1] %vm2571_vm13, %v5332_v58 }
 0x8b8   : > { %4416 = vrot.lane.b32.xlu0 %v4181_v33, %s6415_s29  ;;  %v3069_v39 = vpop.permute.xlu1 %3068  ;;  %v4157_v33 = vrot.slane %v9610_v14, %v10368_v44 }
 0x8b9   : > { %3180 = vst.msk [vmem:[%s7855_s30 + $0x102] sm:$0x1] %vm2571_vm13, %v3069_v39 }
 0x8ba   : > { %v5336_v41 = vpop.permute.xlu0 %5335  ;;  %2888 = vrot.lane.b32.xlu1 %v2775_v11, %s10323_s16 }
 0x8bb   : > { %5454 = vst.msk [vmem:[%s7855_s30 + $0xcf] sm:$0x1] %vm2571_vm13, %v5336_v41 }
 0x8bc   : > { %5155 = vrot.lane.b32.xlu0 %v5028_v57, %s6414_s22  ;;  %v3257_v34 = vpop.permute.xlu1 %3256 }
 0x8bd   : > { %3370 = vst.msk [vmem:[%s7855_s30 + $0xf3] sm:$0x1] %vm2571_vm13, %v3257_v34 }
 0x8be   : > { %v2875_v55 = vpop.permute.xlu0 %2874  ;;  %2892 = vrot.lane.b32.xlu1 %v2783_v26, %s10323_s16 }
 0x8bf   : > { %2987 = vst.msk [vmem:[%s7855_s30 + $0xf9] sm:$0x1] %vm2571_vm13, %v2875_v55  ;;  %v9651_v55 = vcombine.high %v9486_v18, %v9486_v18 }
 0x8c0   : > { %5159 = vrot.lane.b32.xlu0 %v5036_v47, %s6414_s22  ;;  %v3261_v20 = vpop.permute.xlu1 %3260 }
 0x8c1   : > { %3372 = vst.msk [vmem:[%s7855_s30 + $0x103] sm:$0x1] %vm2571_vm13, %v3261_v20 }
 0x8c2   : > { %v2879_v19 = vpop.permute.xlu0 %2878  ;;  %3080 = vrot.lane.b32.xlu1 %v2775_v11, %s10324_s17 }
 0x8c3   : > { %2989 = vst.msk [vmem:[%s7855_s30 + $0x109] sm:$0x1] %vm2571_vm13, %v2879_v19  ;;  %v4197_v19 = vrot.slane %v9651_v55, %v10368_v44 }
 0x8c4   : > { %5347 = vrot.lane.b32.xlu0 %v5028_v57, %s6416_s18  ;;  %v3449_v38 = vpop.permute.xlu1 %3448  ;;  %v9639_v57 = vrot.slane %v3803_v7, %v7837_v56  ;;  %v9773_v7 = vcombine.high %v9610_v14, %v9610_v14 }
 0x8c5   : > { %3562 = vst.msk [vmem:[%s7855_s30 + $0xf4] sm:$0x1] %vm2571_vm13, %v3449_v38  ;;  %v4850_v38 = vcombine.high %v9508_v62, %v9508_v62 }
 0x8c6   : > { %v3067_v59 = vpop.permute.xlu0 %3066  ;;  %3084 = vrot.lane.b32.xlu1 %v2783_v26, %s10324_s17 }
 0x8c7   : > { %3179 = vst.msk [vmem:[%s7855_s30 + $0xfa] sm:$0x1] %vm2571_vm13, %v3067_v59 }
 0x8c8   : > { %5351 = vrot.lane.b32.xlu0 %v5036_v47, %s6416_s18  ;;  %v3453_v6 = vpop.permute.xlu1 %3452 }
 0x8c9   : > { %3564 = vst.msk [vmem:[%s7855_s30 + $0x104] sm:$0x1] %vm2571_vm13, %v3453_v6  ;;  %v2791_v6 = vrot.slane %v8294_v45, %v10367_v22  ;;  %v2799_v45 = vrot.slane %v8306_v49, %v10367_v22 }
 0x8ca   : > { %v3071_v2 = vpop.permute.xlu0 %3070  ;;  %3272 = vrot.lane.b32.xlu1 %v2775_v11, %s10376_s26 }
 0x8cb   : > { %3181 = vst.msk [vmem:[%s7855_s30 + $0x10a] sm:$0x1] %vm2571_vm13, %v3071_v2 }
 0x8cc   : > { %2890 = vrot.lane.b32.xlu0 %v2779_v53, %s10323_s16  ;;  %v4347_v42 = vpop.permute.xlu1 %4346 }
 0x8cd   : > { %v4482_v35 = vsel %vm4462_vm1, %v4347_v42, %v9409_v46 }
 0x8ce   : > { %4578 = vst.msk [vmem:[%s7855_s30 + $0x9d] sm:$0x1] %vm2571_vm13, %v4482_v35  ;;  %v3259_v51 = vpop.permute.xlu0 %3258  ;;  %3276 = vrot.lane.b32.xlu1 %v2783_v26, %s10376_s26 }
 0x8cf   : > { %3371 = vst.msk [vmem:[%s7855_s30 + $0xfb] sm:$0x1] %vm2571_vm13, %v3259_v51 }
 0x8d0   : > { %2894 = vrot.lane.b32.xlu0 %v2787_v32, %s10323_s16  ;;  %v4363_v61 = vpop.permute.xlu1 %4362 }
 0x8d1   : > { %v4486_v15 = vsel %vm4462_vm1, %v4363_v61, %v9417_v12 }
 0x8d2   : > { %4582 = vst.msk [vmem:[%s7855_s30 + $0xbd] sm:$0x1] %vm2571_vm13, %v4486_v15  ;;  %v3263_v46 = vpop.permute.xlu0 %3262  ;;  %3464 = vrot.lane.b32.xlu1 %v2775_v11, %s6413_s27 }
 0x8d3   : > { %3373 = vst.msk [vmem:[%s7855_s30 + $0x10b] sm:$0x1] %vm2571_vm13, %v3263_v46 }
 0x8d4   : > { %3082 = vrot.lane.b32.xlu0 %v2779_v53, %s10324_s17  ;;  %v4367_v1 = vpop.permute.xlu1 %4366 }
 0x8d5   : > { %v4487_v37 = vsel %vm4462_vm1, %v4367_v1, %v9429_v24 }
 0x8d6   : > { %4583 = vst.msk [vmem:[%s7855_s30 + $0xc5] sm:$0x1] %vm2571_vm13, %v4487_v37  ;;  %v3451_v21 = vpop.permute.xlu0 %3450  ;;  %3468 = vrot.lane.b32.xlu1 %v2783_v26, %s6413_s27  ;;  %v4189_v26 = vrot.slane %v9639_v57, %v10368_v44  ;;  %v2795_v37 = vrot.slane %v8310_v17, %v10367_v22 }
 0x8d7   : > { %3563 = vst.msk [vmem:[%s7855_s30 + $0xfc] sm:$0x1] %vm2571_vm13, %v3451_v21 }
 0x8d8   : > { %3086 = vrot.lane.b32.xlu0 %v2787_v32, %s10324_s17  ;;  %v4383_v12 = vpop.permute.xlu1 %4382 }
 0x8d9   : > { %v4491_v30 = vsel %vm4462_vm1, %v4383_v12, %v9449_v60  ;;  %v4803_v60 = vcombine.high %v7986_v48, %v7986_v48  ;;  %v4177_v48 = vrot.slane %v9486_v18, %v10367_v22 }
 0x8da   : > { %4587 = vst.msk [vmem:[%s7855_s30 + $0xe5] sm:$0x1] %vm2571_vm13, %v4491_v30  ;;  %v3455_v24 = vpop.permute.xlu0 %3454  ;;  %4378 = vrot.lane.b32.xlu1 %v4105_v54, %s6415_s29  ;;  %v2803_v30 = vrot.slane %v8328_v3, %v10367_v22 }
 0x8db   : > { %3565 = vst.msk [vmem:[%s7855_s30 + $0x10c] sm:$0x1] %vm2571_vm13, %v3455_v24  ;;  %v4817_v31 = vrot.slane %v4803_v60, %v7837_v56 }
 0x8dc   : > { %3274 = vrot.lane.b32.xlu0 %v2779_v53, %s10376_s26  ;;  %v5146_v4 = vpop.permute.xlu1 %5145 }
 0x8dd   : > { %5263 = vst.msk [vmem:[%s7855_s30 + $0xd6] sm:$0x1] %vm2571_vm13, %v5146_v4  ;;  %v9615_v5 = vrot.slane %v4817_v31, %v7837_v56  ;;  %v4819_v18 = vcombine.high %v4817_v31, %v4817_v31  ;;  %v4185_v31 = vrot.slane %v9639_v57, %v10367_v22 }
 0x8de   : > { %v9583_v23 = vpop.permute.xlu0 %4372  ;;  %4394 = vrot.lane.b32.xlu1 %v4137_v40, %s6415_s29 }
 0x8df   : > { %v5048_v11 = vrot.slane %v9615_v5, %v10367_v22  ;;  %v9673_v62 = vrot.slane %v4819_v18, %v7837_v56 }
 0x8e0   : > { %3278 = vrot.lane.b32.xlu0 %v2787_v32, %s10376_s26  ;;  %v5150_v16 = vpop.permute.xlu1 %5149 }
 0x8e1   : > { %5265 = vst.msk [vmem:[%s7855_s30 + $0xe6] sm:$0x1] %vm2571_vm13, %v5150_v16  ;;  %v5052_v51 = vrot.slane %v9673_v62, %v10367_v22  ;;  %v4153_v16 = vrot.slane %v9610_v14, %v10367_v22  ;;  %v4173_v14 = vrot.slane %v9773_v7, %v10368_v44 }
 0x8e2   : > { %v9593_v10 = vpop.permute.xlu0 %4376  ;;  %4398 = vrot.lane.b32.xlu1 %v4145_v28, %s6415_s29 }
 0x8e4   : > { %3466 = vrot.lane.b32.xlu0 %v2779_v53, %s6413_s27  ;;  %v5338_v8 = vpop.permute.xlu1 %5337  ;;  %v5044_v53 = vrot.slane %v4850_v38, %v10367_v22 }
 0x8e5   : > { %5455 = vst.msk [vmem:[%s7855_s30 + $0xd7] sm:$0x1] %vm2571_vm13, %v5338_v8  ;;  %v4161_v8 = vrot.slane %v9626_v9, %v10367_v22 }
 0x8e6   : > { %v9606_v13 = vpop.permute.xlu0 %4388  ;;  %4414 = vrot.lane.b32.xlu1 %v4177_v48, %s6415_s29 }
 0x8e8   : > { %3470 = vrot.lane.b32.xlu0 %v2787_v32, %s6413_s27  ;;  %v5342_v36 = vpop.permute.xlu1 %5341 }
 0x8e9   : > { %5457 = vst.msk [vmem:[%s7855_s30 + $0xe7] sm:$0x1] %vm2571_vm13, %v5342_v36  ;;  %v4859_v36 = vrot.slane %v7999_v29, %v7837_v56 }
 0x8ea   : > { %v9619_v58 = vpop.permute.xlu0 %4392  ;;  %5161 = vrot.lane.b32.xlu1 %v5040_v63, %s6414_s22 }
 0x8ec   : > { %4404 = vrot.lane.b32.xlu0 %v4157_v33, %s6415_s29  ;;  %v2881_v39 = vpop.permute.xlu1 %2880  ;;  %v4849_v33 = vcombine.high %v9615_v5, %v9615_v5  ;;  %v10390_v5 = vcombine.low %v7996_v43, %v7999_v29 }
 0x8ed   : > { %2990 = vst.msk [vmem:[%s7855_s30 + $0x111] sm:$0x1] %vm2571_vm13, %v2881_v39 }
 0x8ee   : > { %v5148_v41 = vpop.permute.xlu0 %5147  ;;  %5165 = vrot.lane.b32.xlu1 %v5048_v11, %s6414_s22 }
 0x8ef   : > { %5264 = vst.msk [vmem:[%s7855_s30 + $0xde] sm:$0x1] %vm2571_vm13, %v5148_v41  ;;  %v9778_v41 = vrot.slane %v4859_v36, %v7837_v56 }
 0x8f0   : > { %4408 = vrot.lane.b32.xlu0 %v4165_v52, %s6415_s29  ;;  %v2885_v27 = vpop.permute.xlu1 %2884  ;;  %v9786_v52 = vrot.slane %v10390_v5, %v7837_v56 }
 0x8f1   : > { %2992 = vst.msk [vmem:[%s7855_s30 + $0x121] sm:$0x1] %vm2571_vm13, %v2885_v27 }
 0x8f2   : > { %v5152_v34 = vpop.permute.xlu0 %5151  ;;  %5353 = vrot.lane.b32.xlu1 %v5040_v63, %s6416_s18  ;;  %v9813_v38 = vrot.slane %v9786_v52, %v7837_v56 }
 0x8f3   : > { %5266 = vst.msk [vmem:[%s7855_s30 + $0xee] sm:$0x1] %vm2571_vm13, %v5152_v34  ;;  %v9795_v34 = vcombine.high %v9639_v57, %v9639_v57 }
 0x8f4   : > { %4420 = vrot.lane.b32.xlu0 %v4189_v26, %s6415_s29  ;;  %v3073_v47 = vpop.permute.xlu1 %3072  ;;  %v3882_v5 = vcombine.high %v9813_v38, %v9813_v38 }
 0x8f5   : > { %3182 = vst.msk [vmem:[%s7855_s30 + $0x112] sm:$0x1] %vm2571_vm13, %v3073_v47  ;;  %v10391_v47 = vcombine.high %v7996_v43, %v7999_v29  ;;  %v4205_v57 = vrot.slane %v9795_v34, %v10368_v44 }
 0x8f6   : > { %v5340_v20 = vpop.permute.xlu0 %5339  ;;  %5357 = vrot.lane.b32.xlu1 %v5048_v11, %s6416_s18  ;;  %v5056_v11 = vrot.slane %v4849_v33, %v10367_v22 }
 0x8f7   : > { %5456 = vst.msk [vmem:[%s7855_s30 + $0xdf] sm:$0x1] %vm2571_vm13, %v5340_v20  ;;  %v9806_v20 = vrot.slane %v10391_v47, %v7837_v56 }
 0x8f8   : > { %4424 = vrot.lane.b32.xlu0 %v4197_v19, %s6415_s29  ;;  %v3077_v59 = vpop.permute.xlu1 %3076 }
 0x8f9   : > { %3184 = vst.msk [vmem:[%s7855_s30 + $0x122] sm:$0x1] %vm2571_vm13, %v3077_v59  ;;  %v4213_v59 = vrot.slane %v9813_v38, %v10368_v44 }
 0x8fa   : > { %v5344_v2 = vpop.permute.xlu0 %5343  ;;  %2896 = vrot.lane.b32.xlu1 %v2791_v6, %s10323_s16 }
 0x8fb   : > { %5458 = vst.msk [vmem:[%s7855_s30 + $0xef] sm:$0x1] %vm2571_vm13, %v5344_v2 }
 0x8fc   : > { %5163 = vrot.lane.b32.xlu0 %v5044_v53, %s6414_s22  ;;  %v3265_v42 = vpop.permute.xlu1 %3264 }
 0x8fd   : > { %3374 = vst.msk [vmem:[%s7855_s30 + $0x113] sm:$0x1] %vm2571_vm13, %v3265_v42 }
 0x8fe   : > { %v2883_v35 = vpop.permute.xlu0 %2882  ;;  %2900 = vrot.lane.b32.xlu1 %v2799_v45, %s10323_s16 }
 0x8ff   : > { %2991 = vst.msk [vmem:[%s7855_s30 + $0x119] sm:$0x1] %vm2571_vm13, %v2883_v35  ;;  %v4867_v35 = vcombine.high %v4859_v36, %v4859_v36 }
 0x900   : > { %5167 = vrot.lane.b32.xlu0 %v5052_v51, %s6414_s22  ;;  %v3269_v32 = vpop.permute.xlu1 %3268 }
 0x901   : > { %3376 = vst.msk [vmem:[%s7855_s30 + $0x123] sm:$0x1] %vm2571_vm13, %v3269_v32  ;;  %v2807_v32 = vrot.slane %v8344_v0, %v10367_v22 }
 0x902   : > { %v2887_v61 = vpop.permute.xlu0 %2886  ;;  %3088 = vrot.lane.b32.xlu1 %v2791_v6, %s10324_s17 }
 0x903   : > { %2993 = vst.msk [vmem:[%s7855_s30 + $0x129] sm:$0x1] %vm2571_vm13, %v2887_v61 }
 0x904   : > { %5355 = vrot.lane.b32.xlu0 %v5044_v53, %s6416_s18  ;;  %v3457_v49 = vpop.permute.xlu1 %3456 }
 0x905   : > { %3566 = vst.msk [vmem:[%s7855_s30 + $0x114] sm:$0x1] %vm2571_vm13, %v3457_v49 }
 0x906   : > { %v3075_v15 = vpop.permute.xlu0 %3074  ;;  %3092 = vrot.lane.b32.xlu1 %v2799_v45, %s10324_s17 }
 0x907   : > { %3183 = vst.msk [vmem:[%s7855_s30 + $0x11a] sm:$0x1] %vm2571_vm13, %v3075_v15 }
 0x908   : > { %5359 = vrot.lane.b32.xlu0 %v5052_v51, %s6416_s18  ;;  %v3461_v46 = vpop.permute.xlu1 %3460 }
 0x909   : > { %3568 = vst.msk [vmem:[%s7855_s30 + $0x124] sm:$0x1] %vm2571_vm13, %v3461_v46 }
 0x90a   : > { %v3079_v1 = vpop.permute.xlu0 %3078  ;;  %3280 = vrot.lane.b32.xlu1 %v2791_v6, %s10376_s26 }
 0x90b   : > { %3185 = vst.msk [vmem:[%s7855_s30 + $0x12a] sm:$0x1] %vm2571_vm13, %v3079_v1 }
 0x90c   : > { %2898 = vrot.lane.b32.xlu0 %v2795_v37, %s10323_s16  ;;  %v4371_v21 = vpop.permute.xlu1 %4370 }
 0x90d   : > { %v4488_v12 = vsel %vm4462_vm1, %v4371_v21, %v9583_v23 }
 0x90e   : > { %4584 = vst.msk [vmem:[%s7855_s30 + $0xcd] sm:$0x1] %vm2571_vm13, %v4488_v12  ;;  %v3267_v54 = vpop.permute.xlu0 %3266  ;;  %3284 = vrot.lane.b32.xlu1 %v2799_v45, %s10376_s26 }
 0x90f   : > { %3375 = vst.msk [vmem:[%s7855_s30 + $0x11b] sm:$0x1] %vm2571_vm13, %v3267_v54 }
 0x910   : > { %2902 = vrot.lane.b32.xlu0 %v2803_v30, %s10323_s16  ;;  %v4375_v17 = vpop.permute.xlu1 %4374 }
 0x911   : > { %v4489_v24 = vsel %vm4462_vm1, %v4375_v17, %v9593_v10 }
 0x912   : > { %4585 = vst.msk [vmem:[%s7855_s30 + $0xd5] sm:$0x1] %vm2571_vm13, %v4489_v24  ;;  %v3271_v4 = vpop.permute.xlu0 %3270  ;;  %3472 = vrot.lane.b32.xlu1 %v2791_v6, %s6413_s27  ;;  %v9825_v6 = vrot.slane %v9806_v20, %v7837_v56  ;;  %v10392_v24 = vld [vmem:[#allocation24_spill] sm:$0xff] }
 0x913   : > { %3377 = vst.msk [vmem:[%s7855_s30 + $0x12b] sm:$0x1] %vm2571_vm13, %v3271_v4  ;;  %v2811_v4 = vrot.slane %v10392_v24, %v10367_v22 }
 0x914   : > { %3090 = vrot.lane.b32.xlu0 %v2795_v37, %s10324_s17  ;;  %v4387_v3 = vpop.permute.xlu1 %4386  ;;  %v4245_v42 = vrot.slane %v9825_v6, %v10368_v44 }
 0x915   : > { %v4492_v40 = vsel %vm4462_vm1, %v4387_v3, %v9606_v13 }
 0x916   : > { %4588 = vst.msk [vmem:[%s7855_s30 + $0xed] sm:$0x1] %vm2571_vm13, %v4492_v40  ;;  %v3459_v23 = vpop.permute.xlu0 %3458  ;;  %3476 = vrot.lane.b32.xlu1 %v2799_v45, %s6413_s27  ;;  %v4851_v45 = vcombine.high %v9673_v62, %v9673_v62  ;;  %v9847_v62 = vrot.slane %v4867_v35, %v7837_v56  ;;  %v4201_v40 = vrot.slane %v9795_v34, %v10367_v22 }
 0x917   : > { %3567 = vst.msk [vmem:[%s7855_s30 + $0x11c] sm:$0x1] %vm2571_vm13, %v3459_v23 }
 0x918   : > { %3094 = vrot.lane.b32.xlu0 %v2803_v30, %s10324_s17  ;;  %v4391_v60 = vpop.permute.xlu1 %4390  ;;  %v5060_v49 = vrot.slane %v4851_v45, %v10367_v22  ;;  %v5068_v46 = vrot.slane %v9847_v62, %v10367_v22 }
 0x919   : > { %v4493_v28 = vsel %vm4462_vm1, %v4391_v60, %v9619_v58  ;;  %v4193_v58 = vrot.slane %v9651_v55, %v10367_v22  ;;  %v5064_v55 = vrot.slane %v9778_v41, %v10367_v22 }
 0x91a   : > { %4589 = vst.msk [vmem:[%s7855_s30 + $0xf5] sm:$0x1] %vm2571_vm13, %v4493_v28  ;;  %v3463_v10 = vpop.permute.xlu0 %3462  ;;  %4402 = vrot.lane.b32.xlu1 %v4153_v16, %s6415_s29  ;;  %v4852_v16 = vcombine.high %v7999_v29, %v7999_v29 }
 0x91b   : > { %3569 = vst.msk [vmem:[%s7855_s30 + $0x12c] sm:$0x1] %vm2571_vm13, %v3463_v10  ;;  %v4209_v10 = vrot.slane %v9813_v38, %v10367_v22 }
 0x91c   : > { %3282 = vrot.lane.b32.xlu0 %v2795_v37, %s10376_s26  ;;  %v5154_v25 = vpop.permute.xlu1 %5153 }
 0x91d   : > { %5267 = vst.msk [vmem:[%s7855_s30 + $0xf6] sm:$0x1] %vm2571_vm13, %v5154_v25 }
 0x91e   : > { %v9748_v48 = vpop.permute.xlu0 %4380  ;;  %4406 = vrot.lane.b32.xlu1 %v4161_v8, %s6415_s29 }
 0x920   : > { %3286 = vrot.lane.b32.xlu0 %v2803_v30, %s10376_s26  ;;  %v5158_v50 = vpop.permute.xlu1 %5157 }
 0x921   : > { %5269 = vst.msk [vmem:[%s7855_s30 + $0x106] sm:$0x1] %vm2571_vm13, %v5158_v50  ;;  %v4241_v50 = vrot.slane %v9825_v6, %v10367_v22 }
 0x922   : > { %v9756_v13 = vpop.permute.xlu0 %4396  ;;  %4418 = vrot.lane.b32.xlu1 %v4185_v31, %s6415_s29  ;;  %v4897_v31 = vcombine.high %v9778_v41, %v9778_v41 }
 0x924   : > { %3474 = vrot.lane.b32.xlu0 %v2795_v37, %s6413_s27  ;;  %v5346_v63 = vpop.permute.xlu1 %5345 }
 0x925   : > { %5459 = vst.msk [vmem:[%s7855_s30 + $0xf7] sm:$0x1] %vm2571_vm13, %v5346_v63 }
 0x926   : > { %v9768_v9 = vpop.permute.xlu0 %4400  ;;  %4422 = vrot.lane.b32.xlu1 %v4193_v58, %s6415_s29 }
 0x928   : > { %3478 = vrot.lane.b32.xlu0 %v2803_v30, %s6413_s27  ;;  %v5350_v39 = vpop.permute.xlu1 %5349  ;;  %v4169_v30 = vrot.slane %v9773_v7, %v10367_v22  ;;  %v5072_v7 = vrot.slane %v4897_v31, %v10367_v22 }
 0x929   : > { %5461 = vst.msk [vmem:[%s7855_s30 + $0x107] sm:$0x1] %vm2571_vm13, %v5350_v39 }
 0x92a   : > { %v9788_v27 = vpop.permute.xlu0 %4416  ;;  %5169 = vrot.lane.b32.xlu1 %v5056_v11, %s6414_s22 }
 0x92c   : > { %4412 = vrot.lane.b32.xlu0 %v4173_v14, %s6415_s29  ;;  %v2889_v26 = vpop.permute.xlu1 %2888 }
 0x92d   : > { %2994 = vst.msk [vmem:[%s7855_s30 + $0x131] sm:$0x1] %vm2571_vm13, %v2889_v26  ;;  %v4229_v26 = vrot.slane %v3882_v5, %v10368_v44 }
 0x92e   : > { %v5156_v19 = vpop.permute.xlu0 %5155  ;;  %5173 = vrot.lane.b32.xlu1 %v5064_v55, %s6414_s22 }
 0x92f   : > { %5268 = vst.msk [vmem:[%s7855_s30 + $0xfe] sm:$0x1] %vm2571_vm13, %v5156_v19 }
 0x930   : > { %4428 = vrot.lane.b32.xlu0 %v4205_v57, %s6415_s29  ;;  %v2893_v18 = vpop.permute.xlu1 %2892  ;;  %v3883_v57 = vcombine.high %v9825_v6, %v9825_v6 }
 0x931   : > { %2996 = vst.msk [vmem:[%s7855_s30 + $0x141] sm:$0x1] %vm2571_vm13, %v2893_v18 }
 0x932   : > { %v5160_v43 = vpop.permute.xlu0 %5159  ;;  %5361 = vrot.lane.b32.xlu1 %v5056_v11, %s6416_s18 }
 0x933   : > { %5270 = vst.msk [vmem:[%s7855_s30 + $0x10e] sm:$0x1] %vm2571_vm13, %v5160_v43  ;;  %v4261_v43 = vrot.slane %v3883_v57, %v10368_v44 }
 0x934   : > { %4432 = vrot.lane.b32.xlu0 %v4213_v59, %s6415_s29  ;;  %v3081_v2 = vpop.permute.xlu1 %3080  ;;  %v4899_v59 = vcombine.high %v9847_v62, %v9847_v62 }
 0x935   : > { %3186 = vst.msk [vmem:[%s7855_s30 + $0x132] sm:$0x1] %vm2571_vm13, %v3081_v2 }
 0x936   : > { %v5348_v53 = vpop.permute.xlu0 %5347  ;;  %5365 = vrot.lane.b32.xlu1 %v5064_v55, %s6416_s18  ;;  %v5076_v45 = vrot.slane %v4899_v59, %v10367_v22 }
 0x937   : > { %5460 = vst.msk [vmem:[%s7855_s30 + $0xff] sm:$0x1] %vm2571_vm13, %v5348_v53 }
 0x938   : > { %4448 = vrot.lane.b32.xlu0 %v4245_v42, %s6415_s29  ;;  %v3085_v51 = vpop.permute.xlu1 %3084 }
 0x939   : > { %3188 = vst.msk [vmem:[%s7855_s30 + $0x142] sm:$0x1] %vm2571_vm13, %v3085_v51 }
 0x93a   : > { %v5352_v61 = vpop.permute.xlu0 %5351  ;;  %2904 = vrot.lane.b32.xlu1 %v2807_v32, %s10323_s16 }
 0x93b   : > { %5462 = vst.msk [vmem:[%s7855_s30 + $0x10f] sm:$0x1] %vm2571_vm13, %v5352_v61 }
 0x93c   : > { %5171 = vrot.lane.b32.xlu0 %v5060_v49, %s6414_s22  ;;  %v3273_v15 = vpop.permute.xlu1 %3272 }
 0x93d   : > { %3378 = vst.msk [vmem:[%s7855_s30 + $0x133] sm:$0x1] %vm2571_vm13, %v3273_v15 }
 0x93e   : > { %v2891_v0 = vpop.permute.xlu0 %2890  ;;  %3096 = vrot.lane.b32.xlu1 %v2807_v32, %s10324_s17 }
 0x93f   : > { %2995 = vst.msk [vmem:[%s7855_s30 + $0x139] sm:$0x1] %vm2571_vm13, %v2891_v0 }
 0x940   : > { %5175 = vrot.lane.b32.xlu0 %v5068_v46, %s6414_s22  ;;  %v3277_v1 = vpop.permute.xlu1 %3276 }
 0x941   : > { %3380 = vst.msk [vmem:[%s7855_s30 + $0x143] sm:$0x1] %vm2571_vm13, %v3277_v1 }
 0x942   : > { %v2895_v37 = vpop.permute.xlu0 %2894  ;;  %3288 = vrot.lane.b32.xlu1 %v2807_v32, %s10376_s26 }
 0x943   : > { %2997 = vst.msk [vmem:[%s7855_s30 + $0x149] sm:$0x1] %vm2571_vm13, %v2895_v37 }
 0x944   : > { %5363 = vrot.lane.b32.xlu0 %v5060_v49, %s6416_s18  ;;  %v3465_v21 = vpop.permute.xlu1 %3464 }
 0x945   : > { %3570 = vst.msk [vmem:[%s7855_s30 + $0x134] sm:$0x1] %vm2571_vm13, %v3465_v21 }
 0x946   : > { %v3083_v12 = vpop.permute.xlu0 %3082  ;;  %3480 = vrot.lane.b32.xlu1 %v2807_v32, %s6413_s27  ;;  %v4225_v32 = vrot.slane %v3882_v5, %v10367_v22 }
 0x947   : > { %3187 = vst.msk [vmem:[%s7855_s30 + $0x13a] sm:$0x1] %vm2571_vm13, %v3083_v12 }
 0x948   : > { %5367 = vrot.lane.b32.xlu0 %v5068_v46, %s6416_s18  ;;  %v3469_v54 = vpop.permute.xlu1 %3468  ;;  %v4257_v46 = vrot.slane %v3883_v57, %v10367_v22 }
 0x949   : > { %3572 = vst.msk [vmem:[%s7855_s30 + $0x144] sm:$0x1] %vm2571_vm13, %v3469_v54 }
 0x94a   : > { %v3087_v17 = vpop.permute.xlu0 %3086  ;;  %4410 = vrot.lane.b32.xlu1 %v4169_v30, %s6415_s29 }
 0x94b   : > { %3189 = vst.msk [vmem:[%s7855_s30 + $0x14a] sm:$0x1] %vm2571_vm13, %v3087_v17 }
 0x94c   : > { %2906 = vrot.lane.b32.xlu0 %v2811_v4, %s10323_s16  ;;  %v4379_v3 = vpop.permute.xlu1 %4378  ;;  %s5916_s16 = smul.u32 (%p6513_p5), 96, %s6380_s12 }
 0x94d   : > { %v4490_v23 = vsel %vm4462_vm1, %v4379_v3, %v9748_v48  ;;  %v3852_v48 = vcombine.high %v9786_v52, %v9786_v52  ;;  %v3853_v52 = vcombine.high %v9806_v20, %v9806_v20 }
 0x94e   : > { %4586 = vst.msk [vmem:[%s7855_s30 + $0xdd] sm:$0x1] %vm2571_vm13, %v4490_v23  ;;  %v3275_v60 = vpop.permute.xlu0 %3274  ;;  %4426 = vrot.lane.b32.xlu1 %v4201_v40, %s6415_s29  ;;  %s5485_s20 = sadd.s32 (%p6513_p5), %s6376_s11, %s5916_s16 }
 0x94f   : > { %3379 = vst.msk [vmem:[%s7855_s30 + $0x13b] sm:$0x1] %vm2571_vm13, %v3275_v60  ;;  %v9917_v58 = vrot.slane %v3852_v48, %v7837_v56  ;;  %v3881_v55 = vrot.slane %v3853_v52, %v7837_v56 }
 0x950   : > { %3098 = vrot.lane.b32.xlu0 %v2811_v4, %s10324_s17  ;;  %v4395_v28 = vpop.permute.xlu1 %4394  ;;  %s5900_s17 = sshll.u32 (%p6513_p5), %s5485_s20, 3 }
 0x951   : > { %v4494_v25 = vsel %vm4462_vm1, %v4395_v28, %v9756_v13  ;;  %v4866_v13 = vrot.slane %v4852_v16, %v7837_v56  ;;  %v4221_v41 = vrot.slane %v9917_v58, %v10368_v44  ;;  %v4253_v19 = vrot.slane %v3881_v55, %v10368_v44  ;;  %s10167_s12 = scalar_lea.vmem (%p6513_p5), %s10283_s9, %s5900_s17 }
 0x952   : > { %4590 = vst.msk [vmem:[%s7855_s30 + $0xfd] sm:$0x1] %vm2571_vm13, %v4494_v25  ;;  %v3279_v8 = vpop.permute.xlu0 %3278  ;;  %4430 = vrot.lane.b32.xlu1 %v4209_v10, %s6415_s29  ;;  %v4217_v53 = vrot.slane %v9917_v58, %v10367_v22  ;;  %v3884_v21 = vcombine.high %v9917_v58, %v9917_v58  ;;  %v3885_v24 = vcombine.high %v3881_v55, %v3881_v55 }
 0x953   : > { %3381 = vst.msk [vmem:[%s7855_s30 + $0x14b] sm:$0x1] %vm2571_vm13, %v3279_v8  ;;  %v9924_v39 = vrot.slane %v4866_v13, %v7837_v56  ;;  %v4868_v2 = vcombine.high %v4866_v13, %v4866_v13 }
 0x954   : > { %3290 = vrot.lane.b32.xlu0 %v2811_v4, %s10376_s26  ;;  %v4399_v29 = vpop.permute.xlu1 %4398  ;;  %v4237_v17 = vrot.slane %v3884_v21, %v10368_v44  ;;  %v4233_v3 = vrot.slane %v3884_v21, %v10367_v22  ;;  %v4269_v23 = vrot.slane %v3885_v24, %v10368_v44  ;;  %v4265_v28 = vrot.slane %v3885_v24, %v10367_v22 }
 0x955   : > { %v4495_v36 = vsel %vm4462_vm1, %v4399_v29, %v9768_v9  ;;  %v5080_v14 = vrot.slane %v9924_v39, %v10367_v22  ;;  %v4896_v35 = vrot.slane %v4868_v2, %v7837_v56  ;;  %v4249_v56 = vrot.slane %v3881_v55, %v10367_v22 }
 0x956   : > { %4591 = vst.msk [vmem:[%s7855_s30 + $0x105] sm:$0x1] %vm2571_vm13, %v4495_v36  ;;  %v3467_v63 = vpop.permute.xlu0 %3466  ;;  %4446 = vrot.lane.b32.xlu1 %v4241_v50, %s6415_s29  ;;  %v4898_v1 = vcombine.high %v9924_v39, %v9924_v39 }
 0x957   : > { %3571 = vst.msk [vmem:[%s7855_s30 + $0x13c] sm:$0x1] %vm2571_vm13, %v3467_v63  ;;  %v5084_v49 = vrot.slane %v4896_v35, %v10367_v22  ;;  %v4900_v60 = vcombine.high %v4896_v35, %v4896_v35 }
 0x958   : > { %3482 = vrot.lane.b32.xlu0 %v2811_v4, %s6413_s27  ;;  %v4415_v33 = vpop.permute.xlu1 %4414  ;;  %v5088_v54 = vrot.slane %v4898_v1, %v10367_v22 }
 0x959   : > { %v4499_v9 = vsel %vm4462_vm1, %v4415_v33, %v9788_v27  ;;  %v5092_v25 = vrot.slane %v4900_v60, %v10367_v22 }
 0x95a   : > { %4595 = vst.msk [vmem:[%s7855_s30 + $0x125] sm:$0x1] %vm2571_vm13, %v4499_v9  ;;  %v3471_v11 = vpop.permute.xlu0 %3470  ;;  %5177 = vrot.lane.b32.xlu1 %v5072_v7, %s6414_s22 }
 0x95b   : > { %3573 = vst.msk [vmem:[%s7855_s30 + $0x14c] sm:$0x1] %vm2571_vm13, %v3471_v11 }
 0x95c   : > { %4436 = vrot.lane.b32.xlu0 %v4221_v41, %s6415_s29  ;;  %v5162_v27 = vpop.permute.xlu1 %5161 }
 0x95d   : > { %5271 = vst.msk [vmem:[%s7855_s30 + $0x116] sm:$0x1] %vm2571_vm13, %v5162_v27 }
 0x95e   : > { %v9944_v34 = vpop.permute.xlu0 %4404  ;;  %5181 = vrot.lane.b32.xlu1 %v5080_v14, %s6414_s22 }
 0x960   : > { %4440 = vrot.lane.b32.xlu0 %v4229_v26, %s6415_s29  ;;  %v5166_v47 = vpop.permute.xlu1 %5165 }
 0x961   : > { %5273 = vst.msk [vmem:[%s7855_s30 + $0x126] sm:$0x1] %vm2571_vm13, %v5166_v47 }
 0x962   : > { %v9952_v20 = vpop.permute.xlu0 %4408  ;;  %5369 = vrot.lane.b32.xlu1 %v5072_v7, %s6416_s18 }
 0x964   : > { %4452 = vrot.lane.b32.xlu0 %v4253_v19, %s6415_s29  ;;  %v5354_v38 = vpop.permute.xlu1 %5353 }
 0x965   : > { %5463 = vst.msk [vmem:[%s7855_s30 + $0x117] sm:$0x1] %vm2571_vm13, %v5354_v38 }
 0x966   : > { %v9961_v18 = vpop.permute.xlu0 %4420  ;;  %5373 = vrot.lane.b32.xlu1 %v5080_v14, %s6416_s18 }
 0x968   : > { %4456 = vrot.lane.b32.xlu0 %v4261_v43, %s6415_s29  ;;  %v5358_v6 = vpop.permute.xlu1 %5357 }
 0x969   : > { %5465 = vst.msk [vmem:[%s7855_s30 + $0x127] sm:$0x1] %vm2571_vm13, %v5358_v6 }
 0x96a   : > { %v9972_v42 = vpop.permute.xlu0 %4424  ;;  %4434 = vrot.lane.b32.xlu1 %v4217_v53, %s6415_s29 }
 0x96c   : > { %5179 = vrot.lane.b32.xlu0 %v5076_v45, %s6414_s22  ;;  %v2897_v51 = vpop.permute.xlu1 %2896 }
 0x96d   : > { %2998 = vst.msk [vmem:[%s7855_s30 + $0x151] sm:$0x1] %vm2571_vm13, %v2897_v51 }
 0x96e   : > { %v5164_v61 = vpop.permute.xlu0 %5163  ;;  %4438 = vrot.lane.b32.xlu1 %v4225_v32, %s6415_s29 }
 0x96f   : > { %5272 = vst.msk [vmem:[%s7855_s30 + $0x11e] sm:$0x1] %vm2571_vm13, %v5164_v61 }
 0x970   : > { %5183 = vrot.lane.b32.xlu0 %v5084_v49, %s6414_s22  ;;  %v2901_v62 = vpop.permute.xlu1 %2900 }
 0x971   : > { %3000 = vst.msk [vmem:[%s7855_s30 + $0x161] sm:$0x1] %vm2571_vm13, %v2901_v62 }
 0x972   : > { %v5168_v15 = vpop.permute.xlu0 %5167  ;;  %4450 = vrot.lane.b32.xlu1 %v4249_v56, %s6415_s29 }
 0x973   : > { %5274 = vst.msk [vmem:[%s7855_s30 + $0x12e] sm:$0x1] %vm2571_vm13, %v5168_v15 }
 0x974   : > { %5371 = vrot.lane.b32.xlu0 %v5076_v45, %s6416_s18  ;;  %v3089_v0 = vpop.permute.xlu1 %3088 }
 0x975   : > { %3190 = vst.msk [vmem:[%s7855_s30 + $0x152] sm:$0x1] %vm2571_vm13, %v3089_v0 }
 0x976   : > { %v5356_v37 = vpop.permute.xlu0 %5355  ;;  %4454 = vrot.lane.b32.xlu1 %v4257_v46, %s6415_s29 }
 0x977   : > { %5464 = vst.msk [vmem:[%s7855_s30 + $0x11f] sm:$0x1] %vm2571_vm13, %v5356_v37 }
 0x978   : > { %5375 = vrot.lane.b32.xlu0 %v5084_v49, %s6416_s18  ;;  %v3093_v12 = vpop.permute.xlu1 %3092 }
 0x979   : > { %3192 = vst.msk [vmem:[%s7855_s30 + $0x162] sm:$0x1] %vm2571_vm13, %v3093_v12 }
 0x97a   : > { %v5360_v30 = vpop.permute.xlu0 %5359  ;;  %5185 = vrot.lane.b32.xlu1 %v5088_v54, %s6414_s22 }
 0x97b   : > { %5466 = vst.msk [vmem:[%s7855_s30 + $0x12f] sm:$0x1] %vm2571_vm13, %v5360_v30 }
 0x97c   : > { %4444 = vrot.lane.b32.xlu0 %v4237_v17, %s6415_s29  ;;  %v3281_v4 = vpop.permute.xlu1 %3280 }
 0x97d   : > { %3382 = vst.msk [vmem:[%s7855_s30 + $0x153] sm:$0x1] %vm2571_vm13, %v3281_v4 }
 0x97e   : > { %v2899_v40 = vpop.permute.xlu0 %2898  ;;  %4442 = vrot.lane.b32.xlu1 %v4233_v3, %s6415_s29 }
 0x97f   : > { %2999 = vst.msk [vmem:[%s7855_s30 + $0x159] sm:$0x1] %vm2571_vm13, %v2899_v40 }
 0x980   : > { %4460 = vrot.lane.b32.xlu0 %v4269_v23, %s6415_s29  ;;  %v3285_v16 = vpop.permute.xlu1 %3284 }
 0x981   : > { %3384 = vst.msk [vmem:[%s7855_s30 + $0x163] sm:$0x1] %vm2571_vm13, %v3285_v16 }
 0x982   : > { %v2903_v10 = vpop.permute.xlu0 %2902  ;;  %4458 = vrot.lane.b32.xlu1 %v4265_v28, %s6415_s29 }
 0x983   : > { %3001 = vst.msk [vmem:[%s7855_s30 + $0x169] sm:$0x1] %vm2571_vm13, %v2903_v10 }
 0x984   : > { %5187 = vrot.lane.b32.xlu0 %v5092_v25, %s6414_s22  ;;  %v3473_v44 = vpop.permute.xlu1 %3472 }
 0x985   : > { %3574 = vst.msk [vmem:[%s7855_s30 + $0x154] sm:$0x1] %vm2571_vm13, %v3473_v44 }
 0x986   : > { %v3091_v8 = vpop.permute.xlu0 %3090  ;;  %5377 = vrot.lane.b32.xlu1 %v5088_v54, %s6416_s18 }
 0x987   : > { %3191 = vst.msk [vmem:[%s7855_s30 + $0x15a] sm:$0x1] %vm2571_vm13, %v3091_v8 }
 0x988   : > { %5379 = vrot.lane.b32.xlu0 %v5092_v25, %s6416_s18  ;;  %v3477_v48 = vpop.permute.xlu1 %3476 }
 0x989   : > { %3576 = vst.msk [vmem:[%s7855_s30 + $0x164] sm:$0x1] %vm2571_vm13, %v3477_v48 }
 0x98a   : > { %v3095_v22 = vpop.permute.xlu0 %3094 }
 0x98b   : > { %3193 = vst.msk [vmem:[%s7855_s30 + $0x16a] sm:$0x1] %vm2571_vm13, %v3095_v22 }
 0x98c   : > { %v4403_v29 = vpop.permute.xlu1 %4402 }
 0x98d   : > { %v4496_v50 = vsel %vm4462_vm1, %v4403_v29, %v9944_v34 }
 0x98e   : > { %4592 = vst.msk [vmem:[%s7855_s30 + $0x10d] sm:$0x1] %vm2571_vm13, %v4496_v50  ;;  %v3283_v31 = vpop.permute.xlu0 %3282 }
 0x98f   : > { %3383 = vst.msk [vmem:[%s7855_s30 + $0x15b] sm:$0x1] %vm2571_vm13, %v3283_v31 }
 0x990   : > { %v4407_v13 = vpop.permute.xlu1 %4406 }
 0x991   : > { %v4497_v36 = vsel %vm4462_vm1, %v4407_v13, %v9952_v20 }
 0x992   : > { %4593 = vst.msk [vmem:[%s7855_s30 + $0x115] sm:$0x1] %vm2571_vm13, %v4497_v36  ;;  %v3287_v63 = vpop.permute.xlu0 %3286 }
 0x993   : > { %3385 = vst.msk [vmem:[%s7855_s30 + $0x16b] sm:$0x1] %vm2571_vm13, %v3287_v63 }
 0x994   : > { %v4419_v58 = vpop.permute.xlu1 %4418 }
 0x995   : > { %v4500_v33 = vsel %vm4462_vm1, %v4419_v58, %v9961_v18  ;;  %v5610_v58 = vld [vmem:[%s7855_s30] sm:$0xff] (%p6513_p5) }
 0x996   : > { %4596 = vst.msk [vmem:[%s7855_s30 + $0x12d] sm:$0x1] %vm2571_vm13, %v4500_v33  ;;  %v3475_v7 = vpop.permute.xlu0 %3474  ;;  %v5612_v33 = vld [vmem:[%s7855_s30 + $0x8] sm:$0xff] (%p6513_p5)  ;;  %5611 = vst [vmem:[%s10167_s12] sm:$0xff] (%p6513_p5), %v5610_v58 }
 0x997   : > { %3575 = vst.msk [vmem:[%s7855_s30 + $0x15c] sm:$0x1] %vm2571_vm13, %v3475_v7  ;;  %v5614_v7 = vld [vmem:[%s7855_s30 + $0x10] sm:$0xff] (%p6513_p5)  ;;  %5613 = vst [vmem:[%s10167_s12 + $0x10] sm:$0xff] (%p6513_p5), %v5612_v33 }
 0x998   : > { %v4423_v39 = vpop.permute.xlu1 %4422  ;;  %5615 = vst [vmem:[%s10167_s12 + $0x20] sm:$0xff] (%p6513_p5), %v5614_v7 }
 0x999   : > { %v4501_v9 = vsel %vm4462_vm1, %v4423_v39, %v9972_v42  ;;  %v5616_v39 = vld [vmem:[%s7855_s30 + $0x18] sm:$0xff] (%p6513_p5) }
 0x99a   : > { %4597 = vst.msk [vmem:[%s7855_s30 + $0x135] sm:$0x1] %vm2571_vm13, %v4501_v9  ;;  %v3479_v11 = vpop.permute.xlu0 %3478  ;;  %v5618_v9 = vld [vmem:[%s7855_s30 + $0x20] sm:$0xff] (%p6513_p5)  ;;  %5617 = vst [vmem:[%s10167_s12 + $0x30] sm:$0xff] (%p6513_p5), %v5616_v39 }
 0x99b   : > { %3577 = vst.msk [vmem:[%s7855_s30 + $0x16c] sm:$0x1] %vm2571_vm13, %v3479_v11  ;;  %v5620_v11 = vld [vmem:[%s7855_s30 + $0x28] sm:$0xff] (%p6513_p5)  ;;  %5619 = vst [vmem:[%s10167_s12 + $0x40] sm:$0xff] (%p6513_p5), %v5618_v9 }
 0x99c   : > { %v5170_v41 = vpop.permute.xlu1 %5169  ;;  %5621 = vst [vmem:[%s10167_s12 + $0x50] sm:$0xff] (%p6513_p5), %v5620_v11 }
 0x99d   : > { %5275 = vst.msk [vmem:[%s7855_s30 + $0x136] sm:$0x1] %vm2571_vm13, %v5170_v41  ;;  %v5622_v41 = vld [vmem:[%s7855_s30 + $0x30] sm:$0xff] (%p6513_p5) }
 0x99e   : > { %v4413_v5 = vpop.permute.xlu0 %4412  ;;  %5623 = vst [vmem:[%s10167_s12 + $0x60] sm:$0xff] (%p6513_p5), %v5622_v41 }
 0x9a0   : > { %v5174_v52 = vpop.permute.xlu1 %5173 }
 0x9a1   : > { %5277 = vst.msk [vmem:[%s7855_s30 + $0x146] sm:$0x1] %vm2571_vm13, %v5174_v52  ;;  %v5626_v52 = vld [vmem:[%s7855_s30 + $0x40] sm:$0xff] (%p6513_p5) }
 0x9a2   : > { %v4429_v27 = vpop.permute.xlu0 %4428  ;;  %5627 = vst [vmem:[%s10167_s12 + $0x80] sm:$0xff] (%p6513_p5), %v5626_v52 }
 0x9a4   : > { %v5362_v14 = vpop.permute.xlu1 %5361 }
 0x9a5   : > { %5467 = vst.msk [vmem:[%s7855_s30 + $0x137] sm:$0x1] %vm2571_vm13, %v5362_v14  ;;  %v5630_v14 = vld [vmem:[%s7855_s30 + $0x50] sm:$0xff] (%p6513_p5) }
 0x9a6   : > { %v4433_v34 = vpop.permute.xlu0 %4432  ;;  %5631 = vst [vmem:[%s10167_s12 + $0xa0] sm:$0xff] (%p6513_p5), %v5630_v14 }
 0x9a8   : > { %v5366_v26 = vpop.permute.xlu1 %5365 }
 0x9a9   : > { %5469 = vst.msk [vmem:[%s7855_s30 + $0x147] sm:$0x1] %vm2571_vm13, %v5366_v26  ;;  %v5634_v26 = vld [vmem:[%s7855_s30 + $0x60] sm:$0xff] (%p6513_p5) }
 0x9aa   : > { %v4449_v55 = vpop.permute.xlu0 %4448  ;;  %5635 = vst [vmem:[%s10167_s12 + $0xc0] sm:$0xff] (%p6513_p5), %v5634_v26 }
 0x9ac   : > { %v2905_v47 = vpop.permute.xlu1 %2904 }
 0x9ad   : > { %3002 = vst.msk [vmem:[%s7855_s30 + $0x171] sm:$0x1] %vm2571_vm13, %v2905_v47  ;;  %v5638_v47 = vld [vmem:[%s7855_s30 + $0x70] sm:$0xff] (%p6513_p5) }
 0x9ae   : > { %v5172_v20 = vpop.permute.xlu0 %5171  ;;  %5639 = vst [vmem:[%s10167_s12 + $0xe0] sm:$0xff] (%p6513_p5), %v5638_v47 }
 0x9af   : > { %5276 = vst.msk [vmem:[%s7855_s30 + $0x13e] sm:$0x1] %vm2571_vm13, %v5172_v20  ;;  %v5640_v20 = vld [vmem:[%s7855_s30 + $0x78] sm:$0xff] (%p6513_p5) }
 0x9b0   : > { %v3097_v19 = vpop.permute.xlu1 %3096  ;;  %5641 = vst [vmem:[%s10167_s12 + $0xf0] sm:$0xff] (%p6513_p5), %v5640_v20 }
 0x9b1   : > { %3194 = vst.msk [vmem:[%s7855_s30 + $0x172] sm:$0x1] %vm2571_vm13, %v3097_v19  ;;  %v5642_v19 = vld [vmem:[%s7855_s30 + $0x80] sm:$0xff] (%p6513_p5) }
 0x9b2   : > { %v5176_v57 = vpop.permute.xlu0 %5175  ;;  %5643 = vst [vmem:[%s10167_s12 + $0x100] sm:$0xff] (%p6513_p5), %v5642_v19 }
 0x9b3   : > { %5278 = vst.msk [vmem:[%s7855_s30 + $0x14e] sm:$0x1] %vm2571_vm13, %v5176_v57  ;;  %v5644_v57 = vld [vmem:[%s7855_s30 + $0x88] sm:$0xff] (%p6513_p5) }
 0x9b4   : > { %v3289_v38 = vpop.permute.xlu1 %3288  ;;  %5645 = vst [vmem:[%s10167_s12 + $0x110] sm:$0xff] (%p6513_p5), %v5644_v57 }
 0x9b5   : > { %3386 = vst.msk [vmem:[%s7855_s30 + $0x173] sm:$0x1] %vm2571_vm13, %v3289_v38  ;;  %v5646_v38 = vld [vmem:[%s7855_s30 + $0x90] sm:$0xff] (%p6513_p5) }
 0x9b6   : > { %v5364_v18 = vpop.permute.xlu0 %5363  ;;  %5647 = vst [vmem:[%s10167_s12 + $0x120] sm:$0xff] (%p6513_p5), %v5646_v38 }
 0x9b7   : > { %5468 = vst.msk [vmem:[%s7855_s30 + $0x13f] sm:$0x1] %vm2571_vm13, %v5364_v18  ;;  %v5648_v18 = vld [vmem:[%s7855_s30 + $0x98] sm:$0xff] (%p6513_p5) }
 0x9b8   : > { %v3481_v43 = vpop.permute.xlu1 %3480  ;;  %5649 = vst [vmem:[%s10167_s12 + $0x130] sm:$0xff] (%p6513_p5), %v5648_v18 }
 0x9b9   : > { %3578 = vst.msk [vmem:[%s7855_s30 + $0x174] sm:$0x1] %vm2571_vm13, %v3481_v43  ;;  %v5650_v43 = vld [vmem:[%s7855_s30 + $0xa0] sm:$0xff] (%p6513_p5) }
 0x9ba   : > { %v5368_v59 = vpop.permute.xlu0 %5367  ;;  %5651 = vst [vmem:[%s10167_s12 + $0x140] sm:$0xff] (%p6513_p5), %v5650_v43 }
 0x9bb   : > { %5470 = vst.msk [vmem:[%s7855_s30 + $0x14f] sm:$0x1] %vm2571_vm13, %v5368_v59  ;;  %v5652_v59 = vld [vmem:[%s7855_s30 + $0xa8] sm:$0xff] (%p6513_p5) }
 0x9bc   : > { %v4411_v2 = vpop.permute.xlu1 %4410  ;;  %5653 = vst [vmem:[%s10167_s12 + $0x150] sm:$0xff] (%p6513_p5), %v5652_v59 }
 0x9bd   : > { %v4498_v6 = vsel %vm4462_vm1, %v4411_v2, %v4413_v5  ;;  %v5624_v5 = vld [vmem:[%s7855_s30 + $0x38] sm:$0xff] (%p6513_p5)  ;;  %v5654_v2 = vld [vmem:[%s7855_s30 + $0xb0] sm:$0xff] (%p6513_p5) }
 0x9be   : > { %4594 = vst.msk [vmem:[%s7855_s30 + $0x11d] sm:$0x1] %vm2571_vm13, %v4498_v6  ;;  %v2907_v53 = vpop.permute.xlu0 %2906  ;;  %5625 = vst [vmem:[%s10167_s12 + $0x70] sm:$0xff] (%p6513_p5), %v5624_v5  ;;  %v5656_v6 = vld [vmem:[%s7855_s30 + $0xb8] sm:$0xff] (%p6513_p5) }
 0x9bf   : > { %3003 = vst.msk [vmem:[%s7855_s30 + $0x179] sm:$0x1] %vm2571_vm13, %v2907_v53  ;;  %5655 = vst [vmem:[%s10167_s12 + $0x160] sm:$0xff] (%p6513_p5), %v5654_v2  ;;  %v5658_v53 = vld [vmem:[%s7855_s30 + $0xc0] sm:$0xff] (%p6513_p5) }
 0x9c0   : > { %v4427_v42 = vpop.permute.xlu1 %4426  ;;  %5657 = vst [vmem:[%s10167_s12 + $0x170] sm:$0xff] (%p6513_p5), %v5656_v6  ;;  %5659 = vst [vmem:[%s10167_s12 + $0x180] sm:$0xff] (%p6513_p5), %v5658_v53 }
 0x9c1   : > { %v4502_v45 = vsel %vm4462_vm1, %v4427_v42, %v4429_v27  ;;  %v5628_v27 = vld [vmem:[%s7855_s30 + $0x48] sm:$0xff] (%p6513_p5) }
 0x9c2   : > { %4598 = vst.msk [vmem:[%s7855_s30 + $0x13d] sm:$0x1] %vm2571_vm13, %v4502_v45  ;;  %v3099_v35 = vpop.permute.xlu0 %3098  ;;  %5629 = vst [vmem:[%s10167_s12 + $0x90] sm:$0xff] (%p6513_p5), %v5628_v27  ;;  %v5660_v42 = vld [vmem:[%s7855_s30 + $0xc8] sm:$0xff] (%p6513_p5)  ;;  %v5662_v45 = vld [vmem:[%s7855_s30 + $0xd0] sm:$0xff] (%p6513_p5) }
 0x9c3   : > { %3195 = vst.msk [vmem:[%s7855_s30 + $0x17a] sm:$0x1] %vm2571_vm13, %v3099_v35  ;;  %5661 = vst [vmem:[%s10167_s12 + $0x190] sm:$0xff] (%p6513_p5), %v5660_v42  ;;  %v5664_v35 = vld [vmem:[%s7855_s30 + $0xd8] sm:$0xff] (%p6513_p5) }
 0x9c4   : > { %v4431_v51 = vpop.permute.xlu1 %4430  ;;  %5663 = vst [vmem:[%s10167_s12 + $0x1a0] sm:$0xff] (%p6513_p5), %v5662_v45  ;;  %5665 = vst [vmem:[%s10167_s12 + $0x1b0] sm:$0xff] (%p6513_p5), %v5664_v35 }
 0x9c5   : > { %v4503_v32 = vsel %vm4462_vm1, %v4431_v51, %v4433_v34  ;;  %v5632_v34 = vld [vmem:[%s7855_s30 + $0x58] sm:$0xff] (%p6513_p5)  ;;  %v5666_v51 = vld [vmem:[%s7855_s30 + $0xe0] sm:$0xff] (%p6513_p5) }
 0x9c6   : > { %4599 = vst.msk [vmem:[%s7855_s30 + $0x145] sm:$0x1] %vm2571_vm13, %v4503_v32  ;;  %v3291_v61 = vpop.permute.xlu0 %3290  ;;  %5633 = vst [vmem:[%s10167_s12 + $0xb0] sm:$0xff] (%p6513_p5), %v5632_v34  ;;  %v5668_v32 = vld [vmem:[%s7855_s30 + $0xe8] sm:$0xff] (%p6513_p5) }
 0x9c7   : > { %3387 = vst.msk [vmem:[%s7855_s30 + $0x17b] sm:$0x1] %vm2571_vm13, %v3291_v61  ;;  %5667 = vst [vmem:[%s10167_s12 + $0x1c0] sm:$0xff] (%p6513_p5), %v5666_v51  ;;  %v5670_v61 = vld [vmem:[%s7855_s30 + $0xf0] sm:$0xff] (%p6513_p5) }
 0x9c8   : > { %v4447_v49 = vpop.permute.xlu1 %4446  ;;  %5669 = vst [vmem:[%s10167_s12 + $0x1d0] sm:$0xff] (%p6513_p5), %v5668_v32  ;;  %5671 = vst [vmem:[%s10167_s12 + $0x1e0] sm:$0xff] (%p6513_p5), %v5670_v61 }
 0x9c9   : > { %v4507_v62 = vsel %vm4462_vm1, %v4447_v49, %v4449_v55  ;;  %v5636_v55 = vld [vmem:[%s7855_s30 + $0x68] sm:$0xff] (%p6513_p5)  ;;  %v5672_v49 = vld [vmem:[%s7855_s30 + $0xf8] sm:$0xff] (%p6513_p5) }
 0x9ca   : > { %4603 = vst.msk [vmem:[%s7855_s30 + $0x165] sm:$0x1] %vm2571_vm13, %v4507_v62  ;;  %v3483_v56 = vpop.permute.xlu0 %3482  ;;  %5637 = vst [vmem:[%s10167_s12 + $0xd0] sm:$0xff] (%p6513_p5), %v5636_v55  ;;  %v5674_v62 = vld [vmem:[%s7855_s30 + $0x100] sm:$0xff] (%p6513_p5) }
 0x9cb   : > { %3579 = vst.msk [vmem:[%s7855_s30 + $0x17c] sm:$0x1] %vm2571_vm13, %v3483_v56  ;;  %5673 = vst [vmem:[%s10167_s12 + $0x1f0] sm:$0xff] (%p6513_p5), %v5672_v49  ;;  %v5676_v56 = vld [vmem:[%s7855_s30 + $0x108] sm:$0xff] (%p6513_p5) }
 0x9cc   : > { %v5178_v15 = vpop.permute.xlu1 %5177  ;;  %5675 = vst [vmem:[%s10167_s12 + $0x200] sm:$0xff] (%p6513_p5), %v5674_v62  ;;  %5677 = vst [vmem:[%s10167_s12 + $0x210] sm:$0xff] (%p6513_p5), %v5676_v56 }
 0x9cd   : > { %5279 = vst.msk [vmem:[%s7855_s30 + $0x156] sm:$0x1] %vm2571_vm13, %v5178_v15  ;;  %v5678_v15 = vld [vmem:[%s7855_s30 + $0x110] sm:$0xff] (%p6513_p5) }
 0x9ce   : > { %v4437_v0 = vpop.permute.xlu0 %4436  ;;  %5679 = vst [vmem:[%s10167_s12 + $0x220] sm:$0xff] (%p6513_p5), %v5678_v15 }
 0x9d0   : > { %v5182_v46 = vpop.permute.xlu1 %5181 }
 0x9d1   : > { %5281 = vst.msk [vmem:[%s7855_s30 + $0x166] sm:$0x1] %vm2571_vm13, %v5182_v46  ;;  %v5682_v46 = vld [vmem:[%s7855_s30 + $0x120] sm:$0xff] (%p6513_p5) }
 0x9d2   : > { %v4441_v1 = vpop.permute.xlu0 %4440  ;;  %5683 = vst [vmem:[%s10167_s12 + $0x240] sm:$0xff] (%p6513_p5), %v5682_v46 }
 0x9d4   : > { %v5370_v37 = vpop.permute.xlu1 %5369 }
 0x9d5   : > { %5471 = vst.msk [vmem:[%s7855_s30 + $0x157] sm:$0x1] %vm2571_vm13, %v5370_v37  ;;  %v5686_v37 = vld [vmem:[%s7855_s30 + $0x130] sm:$0xff] (%p6513_p5) }
 0x9d6   : > { %v4453_v21 = vpop.permute.xlu0 %4452  ;;  %5687 = vst [vmem:[%s10167_s12 + $0x260] sm:$0xff] (%p6513_p5), %v5686_v37 }
 0x9d8   : > { %v5374_v12 = vpop.permute.xlu1 %5373 }
 0x9d9   : > { %5473 = vst.msk [vmem:[%s7855_s30 + $0x167] sm:$0x1] %vm2571_vm13, %v5374_v12  ;;  %v5690_v12 = vld [vmem:[%s7855_s30 + $0x140] sm:$0xff] (%p6513_p5) }
 0x9da   : > { %v4457_v54 = vpop.permute.xlu0 %4456  ;;  %5691 = vst [vmem:[%s10167_s12 + $0x280] sm:$0xff] (%p6513_p5), %v5690_v12 }
 0x9dc   : > { %v4435_v30 = vpop.permute.xlu1 %4434 }
 0x9dd   : > { %v4504_v17 = vsel %vm4462_vm1, %v4435_v30, %v4437_v0  ;;  %v5680_v0 = vld [vmem:[%s7855_s30 + $0x118] sm:$0xff] (%p6513_p5) }
 0x9de   : > { %4600 = vst.msk [vmem:[%s7855_s30 + $0x14d] sm:$0x1] %vm2571_vm13, %v4504_v17  ;;  %v5180_v24 = vpop.permute.xlu0 %5179  ;;  %5681 = vst [vmem:[%s10167_s12 + $0x230] sm:$0xff] (%p6513_p5), %v5680_v0 }
 0x9df   : > { %5280 = vst.msk [vmem:[%s7855_s30 + $0x15e] sm:$0x1] %vm2571_vm13, %v5180_v24 }
 0x9e0   : > { %v4439_v4 = vpop.permute.xlu1 %4438  ;;  %v5698_v24 = vld [vmem:[%s7855_s30 + $0x160] sm:$0xff] (%p6513_p5) }
 0x9e1   : > { %v4505_v3 = vsel %vm4462_vm1, %v4439_v4, %v4441_v1  ;;  %v5684_v1 = vld [vmem:[%s7855_s30 + $0x128] sm:$0xff] (%p6513_p5)  ;;  %5699 = vst [vmem:[%s10167_s12 + $0x2c0] sm:$0xff] (%p6513_p5), %v5698_v24 }
 0x9e2   : > { %4601 = vst.msk [vmem:[%s7855_s30 + $0x155] sm:$0x1] %vm2571_vm13, %v4505_v3  ;;  %v5184_v40 = vpop.permute.xlu0 %5183  ;;  %5685 = vst [vmem:[%s10167_s12 + $0x250] sm:$0xff] (%p6513_p5), %v5684_v1 }
 0x9e3   : > { %5282 = vst.msk [vmem:[%s7855_s30 + $0x16e] sm:$0x1] %vm2571_vm13, %v5184_v40 }
 0x9e4   : > { %v4451_v23 = vpop.permute.xlu1 %4450 }
 0x9e5   : > { %v4508_v60 = vsel %vm4462_vm1, %v4451_v23, %v4453_v21  ;;  %v5688_v21 = vld [vmem:[%s7855_s30 + $0x138] sm:$0xff] (%p6513_p5) }
 0x9e6   : > { %4604 = vst.msk [vmem:[%s7855_s30 + $0x16d] sm:$0x1] %vm2571_vm13, %v4508_v60  ;;  %v5372_v16 = vpop.permute.xlu0 %5371  ;;  %5689 = vst [vmem:[%s10167_s12 + $0x270] sm:$0xff] (%p6513_p5), %v5688_v21 }
 0x9e7   : > { %5472 = vst.msk [vmem:[%s7855_s30 + $0x15f] sm:$0x1] %vm2571_vm13, %v5372_v16 }
 0x9e8   : > { %v4455_v28 = vpop.permute.xlu1 %4454 }
 0x9e9   : > { %v4509_v10 = vsel %vm4462_vm1, %v4455_v28, %v4457_v54  ;;  %v5692_v54 = vld [vmem:[%s7855_s30 + $0x148] sm:$0xff] (%p6513_p5)  ;;  %v5694_v30 = vld [vmem:[%s7855_s30 + $0x150] sm:$0xff] (%p6513_p5) }
 0x9ea   : > { %4605 = vst.msk [vmem:[%s7855_s30 + $0x175] sm:$0x1] %vm2571_vm13, %v4509_v10  ;;  %v5376_v25 = vpop.permute.xlu0 %5375  ;;  %5693 = vst [vmem:[%s10167_s12 + $0x290] sm:$0xff] (%p6513_p5), %v5692_v54 }
 0x9eb   : > { %5474 = vst.msk [vmem:[%s7855_s30 + $0x16f] sm:$0x1] %vm2571_vm13, %v5376_v25  ;;  %5695 = vst [vmem:[%s10167_s12 + $0x2a0] sm:$0xff] (%p6513_p5), %v5694_v30 }
 0x9ec   : > { %v5186_v44 = vpop.permute.xlu1 %5185 }
 0x9ed   : > { %5283 = vst.msk [vmem:[%s7855_s30 + $0x176] sm:$0x1] %vm2571_vm13, %v5186_v44 }
 0x9ee   : > { %v4445_v8 = vpop.permute.xlu0 %4444 }
 0x9f0   : > { %v4443_v48 = vpop.permute.xlu1 %4442 }
 0x9f1   : > { %v4506_v22 = vsel %vm4462_vm1, %v4443_v48, %v4445_v8 }
 0x9f2   : > { %4602 = vst.msk [vmem:[%s7855_s30 + $0x15d] sm:$0x1] %vm2571_vm13, %v4506_v22  ;;  %v4461_v29 = vpop.permute.xlu0 %4460  ;;  %v5700_v4 = vld [vmem:[%s7855_s30 + $0x168] sm:$0xff] (%p6513_p5) }
 0x9f3   : > { %5701 = vst [vmem:[%s10167_s12 + $0x2d0] sm:$0xff] (%p6513_p5), %v5700_v4 }
 0x9f4   : > { %v4459_v50 = vpop.permute.xlu1 %4458 }
 0x9f5   : > { %v4510_v31 = vsel %vm4462_vm1, %v4459_v50, %v4461_v29 }
 0x9f6   : > { %4606 = vst.msk [vmem:[%s7855_s30 + $0x17d] sm:$0x1] %vm2571_vm13, %v4510_v31  ;;  %v5188_v13 = vpop.permute.xlu0 %5187 }
 0x9f7   : > { %5284 = vst.msk [vmem:[%s7855_s30 + $0x17e] sm:$0x1] %vm2571_vm13, %v5188_v13  ;;  %5483 = sbr.rel (!%p6513_p5) target bundleno = 2564 (0xa04), region = 60 }
 0x9f8   : > { %v5378_v36 = vpop.permute.xlu1 %5377 }
 0x9f9   : > { %5475 = vst.msk [vmem:[%s7855_s30 + $0x177] sm:$0x1] %vm2571_vm13, %v5378_v36  ;;  %v5696_v17 = vld [vmem:[%s7855_s30 + $0x158] sm:$0xff] (%p6513_p5) }
 0x9fa   : > { %v5380_v63 = vpop.permute.xlu0 %5379  ;;  %5697 = vst [vmem:[%s10167_s12 + $0x2b0] sm:$0xff] (%p6513_p5), %v5696_v17 }
 0x9fb   : > { %5476 = vst.msk [vmem:[%s7855_s30 + $0x17f] sm:$0x1] %vm2571_vm13, %v5380_v63 }
 0xa00   : > { %v5702_v3 = vld [vmem:[%s7855_s30 + $0x170] sm:$0xff] }
 0xa01   : > { %5703 = vst [vmem:[%s10167_s12 + $0x2e0] sm:$0xff] %v5702_v3 }
 0xa02   : > { %v5704_v40 = vld [vmem:[%s7855_s30 + $0x178] sm:$0xff] }
 0xa03   : > { %5705 = vst [vmem:[%s10167_s12 + $0x2f0] sm:$0xff] %v5704_v40 }
 0xa04 PF: > { %s19_s15 = sadd.s32 1, %s6392_s15   ;;  %s10393_s21 = sld [smem:[#allocation3_spill]] }
 0xa05   : > { %p16_p11 = scmp.ge.s32.totalorder %s19_s15, 6   ;;  %s10394_s23 = sld [smem:[#allocation4_spill]] }
 0xa06   : > { %s10395_s30 = smov %s6372_s10  ;;  %s10396_s10 = smov %s6524_s24 }
 0xa07   : > { %s10397_s11 = smov %s6384_s13  ;;  %s10398_s12 = smov %s6388_s14 }
 0xa08   :  { %18 = sbr.rel (!%p16_p11) target bundleno = 4 (0x4), region = 128 }
 0xa0a   : > { %s10399_s13 = smov %s10393_s21 }
 0xa0b   : > { %s10400_s14 = smov %s10394_s23 }

</bundles_post_ra>
